<compile_context>
chip_gen: v7x
topology: tpu7x:2x2x1
jax: 0.10.0
libtpu: 0.0.40
codegen_flags: <defaults>
</compile_context>

<pallas_src>
import functools
import math

import jax
import jax.numpy as jnp
from jax import lax
from jax.experimental import pallas as pl
from jax.experimental.pallas import tpu as pltpu


def _round_up(x, m):
    return ((x + m - 1) // m) * m


# ----------------------------------------------------------------------------
# Pallas kernel: KPConv aggregation + BN(eval, folded) + ReLU + 1x1-conv head
# ----------------------------------------------------------------------------
def kpcls_kernel(aw_ref, nx_ref, w_ref, bnb_ref, hw_ref, hb_ref, out_ref, wf_ref,
                 *, kkp_pad, knn, cin, kp_per_group, rc):
    # aw_ref : [TN, Kpad*Knn]    f32  influence weights (shadow-masked, 1/cnt folded)
    # nx_ref : [TN, Knn*Cin]     bf16 gathered neighbor features (zeros for shadow)
    # w_ref  : [Kpad*Cin, CoutP] bf16 KPConv weights, BN scale folded, zero padded
    # bnb_ref: [1, CoutP]        f32  folded BatchNorm shift (eval mode), zero padded
    # hw_ref : [CoutP, NCP]      bf16 1x1-conv head weights, zero padded
    # hb_ref : [1, NCP]          f32  head bias, zero padded
    # out_ref: [TN, NCP]         f32
    # wf_ref : [TN, Kpad*Cin]    bf16 VMEM scratch for the per-kernel-point aggregation
    tn = aw_ref.shape[0]
    n_groups = kkp_pad // kp_per_group
    gw = kp_per_group * cin          # lane width of one dense store group (128 if cin|128)
    n_rc = tn // rc

    # ---- KPConv neighbor aggregation ---------------------------------------
    # Row-chunked (rc rows) fori_loop bounds the live vreg set; refs are sliced
    # directly (no full-tile aw/nx materialization -> no spill traffic).
    # Aggregation math stays f32 (v5e-safe; on v6e/v7x bf16 VALU mults would be
    # a further option, accumulation must stay f32 either way).
    def rc_body(r, carry):
        rows = pl.ds(pl.multiple_of(r * rc, rc), rc)
        for g in range(n_groups):
            accs = [jnp.zeros((rc, cin), jnp.float32) for _ in range(kp_per_group)]
            for j in range(knn):
                nxj = nx_ref[rows, pl.ds(j * cin, cin)].astype(jnp.float32)   # [rc, Cin]
                for t in range(kp_per_group):
                    col = (g * kp_per_group + t) * knn + j                    # static
                    a = aw_ref[rows, pl.ds(col, 1)]                           # [rc, 1]
                    accs[t] = accs[t] + a * nxj
            # One lane-dense [rc, gw] bf16 store per group instead of
            # kp_per_group masked 32-lane stores.
            slab = accs[0] if kp_per_group == 1 else jnp.concatenate(accs, axis=-1)
            wf_ref[rows, pl.ds(g * gw, gw)] = slab.astype(wf_ref.dtype)
        return carry

    lax.fori_loop(0, n_rc, rc_body, 0)

    # ---- merged K = Kpad*Cin contraction + BN shift + ReLU + 1x1 head ------
    acc = jnp.dot(wf_ref[...], w_ref[...],
                  preferred_element_type=jnp.float32)          # [TN, CoutP]
    y = jnp.maximum(acc + bnb_ref[...], 0.0)                   # BN shift + ReLU (dense 128 lanes)
    out = jnp.dot(y.astype(jnp.bfloat16), hw_ref[...],
                  preferred_element_type=jnp.float32) + hb_ref[...]
    out_ref[...] = out.astype(out_ref.dtype)


def _pick_tile(n, tn=None):
    if tn is None:
        kind = ""
        try:
            kind = jax.devices()[0].device_kind.lower()
        except Exception:
            pass
        # v5e: 128x128 MXU, M saturates at 256. v6e/v7x: bigger tiles amortize
        # the ~0.35us per-grid-step overhead; per-tile VMEM stays a few MB.
        # Whenever n > tn the grid has >= 2 steps, so both v7x TensorCores get
        # work via the "parallel" grid axis.
        tn = 256 if "v5" in kind else 512
    if n <= tn:
        tn = max(8, _round_up(n, 8))
    return tn


def kpconv_head_pallas(aw, nx, w_scaled, bn_shift, head_w, head_b, *,
                       kkp_pad, knn, cin, kp_per_group, tn=None):
    """aw: [N, Kpad*Knn] f32, nx: [N, Knn*Cin] bf16, w_scaled: [Kpad*Cin, CoutP] bf16,
    bn_shift: [1, CoutP] f32, head_w: [CoutP, NCP] bf16, head_b: [1, NCP] f32.
    Returns [N, NCP] f32."""
    n = aw.shape[0]
    kc_pad, cout_pad = w_scaled.shape
    nc_pad = head_w.shape[1]
    assert aw.shape[1] == kkp_pad * knn and nx.shape[1] == knn * cin

    tn = _pick_tile(n, tn)
    rc = tn if tn <= 64 else math.gcd(tn, 64)   # row chunk for the aggregation loop

    # No wrapper-side row padding (that would be an extra HBM read+write of both
    # inputs): the ragged last tile reads garbage rows that are never written back.
    grid = (pl.cdiv(n, tn),)

    kernel = functools.partial(kpcls_kernel, kkp_pad=kkp_pad, knn=knn, cin=cin,
                               kp_per_group=kp_per_group, rc=rc)
    return pl.pallas_call(
        kernel,
        out_shape=jax.ShapeDtypeStruct((n, nc_pad), jnp.float32),
        grid_spec=pltpu.PrefetchScalarGridSpec(
            num_scalar_prefetch=0,
            grid=grid,
            in_specs=[
                pl.BlockSpec((tn, aw.shape[1]), lambda i: (i, 0)),
                pl.BlockSpec((tn, nx.shape[1]), lambda i: (i, 0)),
                pl.BlockSpec((kc_pad, cout_pad), lambda i: (0, 0)),
                pl.BlockSpec((1, cout_pad), lambda i: (0, 0)),
                pl.BlockSpec((cout_pad, nc_pad), lambda i: (0, 0)),
                pl.BlockSpec((1, nc_pad), lambda i: (0, 0)),
            ],
            out_specs=pl.BlockSpec((tn, nc_pad), lambda i: (i, 0)),
            scratch_shapes=[pltpu.VMEM((tn, kc_pad), jnp.bfloat16)],
        ),
        compiler_params=pltpu.CompilerParams(dimension_semantics=("parallel",)),
    )(aw, nx, w_scaled, bn_shift, head_w, head_b)


# ----------------------------------------------------------------------------
# Plain-JAX glue
# ----------------------------------------------------------------------------
def grid_sample_border(img, px, py):
    """F.grid_sample(img[None], grid, align_corners=False, padding_mode='border'),
    bilinear, single image. img: [C, H, W]; px, py in [-1, 1]. Returns [len, C]."""
    c, h, w = img.shape
    ix = jnp.clip(((px + 1.0) * w - 1.0) * 0.5, 0.0, w - 1.0)
    iy = jnp.clip(((py + 1.0) * h - 1.0) * 0.5, 0.0, h - 1.0)
    ix0f = jnp.floor(ix)
    iy0f = jnp.floor(iy)
    wx1 = ix - ix0f
    wy1 = iy - iy0f
    wx0 = 1.0 - wx1
    wy0 = 1.0 - wy1
    ix0 = ix0f.astype(jnp.int32)
    iy0 = iy0f.astype(jnp.int32)
    ix1 = jnp.clip(ix0 + 1, 0, w - 1)
    iy1 = jnp.clip(iy0 + 1, 0, h - 1)

    flat = img.reshape(c, h * w)

    def take(yy, xx):
        return flat[:, yy * w + xx].T          # [len, C]

    v00, v01 = take(iy0, ix0), take(iy0, ix1)
    v10, v11 = take(iy1, ix0), take(iy1, ix1)
    return (v00 * (wy0 * wx0)[:, None] + v01 * (wy0 * wx1)[:, None]
            + v10 * (wy1 * wx0)[:, None] + v11 * (wy1 * wx1)[:, None])


def kp_classifier_forward(x, px, py, pxyz, pknn, num_points, params):
    """Full KPClassifier.forward. Returns [N_total, num_classes, 1, 1]."""
    assert px.shape[0] == py.shape[0] == pxyz.shape[0] == pknn.shape[0]
    assert px.shape[0] == int(sum(num_points))
    kernel_points = params["kernel_points"]        # [Kkp, 3]
    kp_extent = params["kp_extent"]
    kkp = kernel_points.shape[0]
    knn = pknn.shape[1]
    cin = x.shape[1]

    # Group 128//Cin consecutive kernel points per lane-dense wf store; pad the
    # kernel-point axis with zero weights / zero influence so groups are uniform.
    kp_per_group = (128 // cin) if (cin < 128 and 128 % cin == 0) else 1
    kkp_pad = _round_up(kkp, kp_per_group)

    # Fold eval-mode BN scale into the KPConv weights (scale commutes with the
    # per-point neighbor normalization); only the shift stays in the kernel.
    # Pad kernel points -> kkp_pad and Cout -> 128 lanes (zeros) so the matmul
    # output / BN / ReLU / head-matmul LHS are all dense-128-lane.
    kp_weights = params["kp_weights"]              # [Kkp, Cin, Cout]
    cout = kp_weights.shape[2]
    cout_pad = _round_up(cout, 128)
    w_scaled = kp_weights * params["bn_scale"].reshape(1, 1, -1)
    w_scaled = jnp.pad(w_scaled, ((0, kkp_pad - kkp), (0, 0), (0, cout_pad - cout)))
    w_scaled = w_scaled.reshape(kkp_pad * cin, cout_pad).astype(jnp.bfloat16)
    bn_shift_p = jnp.pad(params["bn_shift"], ((0, 0), (0, cout_pad - cout)))

    # Pad the 1x1-conv head to lane-dense (multiple of 128) output width.
    head_w = params["head_w"]                      # [Cout, NC]
    head_b = params["head_b"]                      # [1, NC]
    nc = head_w.shape[1]
    nc_pad = _round_up(nc, 128)
    head_w_p = jnp.pad(head_w, ((0, cout_pad - cout), (0, nc_pad - nc))).astype(jnp.bfloat16)
    head_b_p = jnp.pad(head_b, ((0, 0), (0, nc_pad - nc)))

    # TODO(synk): the per-batch Python loop needs host-known num_points; a real
    # pipeline would use fixed/padded per-batch shapes or segment ids instead.
    # TODO(synk): at real point-cloud scale, move the nx gather in-kernel
    # (scalar-prefetched pknn + VMEM-resident per-batch features) and compute
    # the influence weights from neighbor offsets in-kernel to cut HBM bytes.
    aw_list, nx_list = [], []
    offset = 0
    for i in range(x.shape[0]):
        ln = int(num_points[i])
        px_i = px[offset:offset + ln]
        py_i = py[offset:offset + ln]
        pts = pxyz[offset:offset + ln]
        nbr = pknn[offset:offset + ln]                                    # [ln, Knn]

        feats = grid_sample_border(x[i], px_i, py_i)                      # [ln, Cin]

        # KPConv geometry glue (shadow point at 1e6, shadow feature = 0)
        pts_pad = jnp.concatenate([pts, jnp.full((1, 3), 1e6, pts.dtype)], axis=0)
        feats_pad = jnp.concatenate(
            [feats, jnp.zeros((1, cin), feats.dtype)], axis=0)
        neighbors = pts_pad[nbr] - pts[:, None, :]                        # [ln, Knn, 3]
        diffs = neighbors[:, None, :, :] - kernel_points[None, :, None, :]
        sq = jnp.sum(diffs * diffs, axis=-1)                              # [ln, Kkp, Knn]
        aw_i = jnp.maximum(1.0 - jnp.sqrt(sq) / kp_extent, 0.0)           # linear influence

        # Explicitly zero shadow-neighbor influence (index mask, not the
        # huge-distance trick) and fold 1/valid-neighbor-count into the weights.
        valid = (nbr < ln)                                                # [ln, Knn] bool
        aw_i = jnp.where(valid[:, None, :], aw_i, 0.0)
        inv_cnt = 1.0 / jnp.maximum(jnp.sum(valid.astype(jnp.float32), axis=1), 1.0)
        aw_i = aw_i * inv_cnt[:, None, None]
        aw_i = jnp.pad(aw_i, ((0, 0), (0, kkp_pad - kkp), (0, 0)))        # pad kernel points

        nx_i = feats_pad[nbr]                                             # [ln, Knn, Cin]

        aw_list.append(aw_i.reshape(ln, kkp_pad * knn))                   # lane-dense 2-D
        nx_list.append(nx_i.reshape(ln, knn * cin))
        offset += ln

    aw = jnp.concatenate(aw_list, axis=0)                                 # [N, Kpad*Knn] f32
    # nx cast to bf16 (the MXU consumes bf16 anyway); keep f32 here if bit-level
    # parity of the aggregation with the f32 PyTorch KPConv is required.
    nx = jnp.concatenate(nx_list, axis=0).astype(jnp.bfloat16)            # [N, Knn*Cin]

    out = kpconv_head_pallas(aw, nx, w_scaled, bn_shift_p, head_w_p, head_b_p,
                             kkp_pad=kkp_pad, knn=knn, cin=cin,
                             kp_per_group=kp_per_group)
    out = out[:, :nc]                                                     # drop lane padding
    return out[:, :, None, None]                                          # NCHW, 1x1 spatial


# ----------------------------------------------------------------------------
# Main
# ----------------------------------------------------------------------------
if __name__ == "__main__":
    B, Cin, H, W = 2, 32, 16, 16
    Cout, NC = 32, 17
    Kkp, Knn = 15, 5
    KP_extent, radius = 1.2, 0.6
    num_points = [12, 20]
    N = sum(num_points)

    key = jax.random.PRNGKey(0)
    keys = jax.random.split(key, 12)

    x = jax.random.normal(keys[0], (B, Cin, H, W), jnp.float32)
    px = jax.random.uniform(keys[1], (N,), jnp.float32, -1.0, 1.0)
    py = jax.random.uniform(keys[2], (N,), jnp.float32, -1.0, 1.0)
    pxyz = jax.random.normal(keys[3], (N, 3), jnp.float32) * radius
    # per-batch local KNN indices in [0, len_i)
    pknn = jnp.concatenate(
        [jax.random.randint(jax.random.fold_in(keys[4], i), (ln, Knn), 0, ln)
         for i, ln in enumerate(num_points)], axis=0)

    # deterministic synthetic parameters
    kernel_points = jax.random.normal(keys[5], (Kkp, 3), jnp.float32) * (radius * 0.5)
    kp_weights = jax.random.normal(keys[6], (Kkp, Cin, Cout), jnp.float32) / jnp.sqrt(
        jnp.float32(Cin * Kkp))
    bn_gamma = 1.0 + 0.1 * jax.random.normal(keys[7], (Cout,), jnp.float32)
    bn_beta = 0.1 * jax.random.normal(keys[8], (Cout,), jnp.float32)
    bn_mean = 0.05 * jax.random.normal(keys[9], (Cout,), jnp.float32)
    bn_var = jnp.abs(1.0 + 0.1 * jax.random.normal(keys[10], (Cout,), jnp.float32))
    eps = 1e-5
    bn_scale = (bn_gamma / jnp.sqrt(bn_var + eps)).reshape(1, Cout)
    bn_shift = (bn_beta - bn_mean * bn_scale[0]).reshape(1, Cout)
    head_w = jax.random.normal(keys[11], (Cout, NC), jnp.float32) / jnp.sqrt(
        jnp.float32(Cout))
    head_b = (0.01 * jnp.arange(NC, dtype=jnp.float32)).reshape(1, NC)

    params = dict(kernel_points=kernel_points, kp_extent=KP_extent,
                  kp_weights=kp_weights, bn_scale=bn_scale, bn_shift=bn_shift,
                  head_w=head_w, head_b=head_b)

    out = kp_classifier_forward(x, px, py, pxyz, pknn, num_points, params)
    out = jax.block_until_ready(out)
    assert out.shape == (N, NC, 1, 1), out.shape
    assert bool(jnp.all(jnp.isfinite(out)))
    print("KERNEL_OK")
</pallas_src>

<mosaic_0001>
module attributes {stable_mosaic.version = 11 : i64} {
  func.func @kpcls_kernel(%arg0: i32, %arg1: memref<32x80xf32, #tpu.memory_space<vmem>>, %arg2: memref<32x160xbf16, #tpu.memory_space<vmem>>, %arg3: memref<512x128xbf16, #tpu.memory_space<vmem>>, %arg4: memref<1x128xf32, #tpu.memory_space<vmem>>, %arg5: memref<128x128xbf16, #tpu.memory_space<vmem>>, %arg6: memref<1x128xf32, #tpu.memory_space<vmem>>, %arg7: memref<32x128xf32, #tpu.memory_space<vmem>>, %arg8: memref<32x512xbf16, #tpu.memory_space<vmem>>) attributes {dimension_semantics = [#tpu.dimension_semantics<parallel>], iteration_bounds = array<i64: 1>, scalar_prefetch = 0 : i64, scratch_operands = 1 : i64, tpu.core_type = #tpu.core_type<tc>, window_params = [{transform_indices = @transform_0, window_bounds = array<i64: 32, 80>}, {transform_indices = @transform_1, window_bounds = array<i64: 32, 160>}, {pipeline_mode = #tpu.pipeline_mode<synchronous>, transform_indices = @transform_2, window_bounds = array<i64: 512, 128>}, {pipeline_mode = #tpu.pipeline_mode<synchronous>, transform_indices = @transform_3, window_bounds = array<i64: 1, 128>}, {pipeline_mode = #tpu.pipeline_mode<synchronous>, transform_indices = @transform_4, window_bounds = array<i64: 128, 128>}, {pipeline_mode = #tpu.pipeline_mode<synchronous>, transform_indices = @transform_5, window_bounds = array<i64: 1, 128>}, {transform_indices = @transform_6, window_bounds = array<i64: 32, 128>}]} {
    %c0_i32 = arith.constant 0 : i32
    %c32_i32 = arith.constant 32 : i32
    %0 = arith.muli %c0_i32, %c32_i32 : i32
    %1 = tpu.assume_multiple %0, 32 : i32
    %cst = arith.constant 0.000000e+00 : f32
    %2 = vector.broadcast %cst : f32 to vector<32x32xf32>
    %cst_0 = arith.constant 0.000000e+00 : f32
    %3 = vector.broadcast %cst_0 : f32 to vector<32x32xf32>
    %cst_1 = arith.constant 0.000000e+00 : f32
    %4 = vector.broadcast %cst_1 : f32 to vector<32x32xf32>
    %cst_2 = arith.constant 0.000000e+00 : f32
    %5 = vector.broadcast %cst_2 : f32 to vector<32x32xf32>
    %6 = arith.index_cast %1 : i32 to index
    %c0 = arith.constant 0 : index
    %7 = vector.load %arg2[%6, %c0] : memref<32x160xbf16, #tpu.memory_space<vmem>>, vector<32x32xbf16>
    %8 = arith.extf %7 : vector<32x32xbf16> to vector<32x32xf32>
    %9 = arith.index_cast %1 : i32 to index
    %c0_3 = arith.constant 0 : index
    %10 = vector.load %arg1[%9, %c0_3] : memref<32x80xf32, #tpu.memory_space<vmem>>, vector<32x1xf32>
    %11 = vector.broadcast %10 : vector<32x1xf32> to vector<32x32xf32>
    %12 = arith.mulf %11, %8 : vector<32x32xf32>
    %13 = arith.addf %2, %12 : vector<32x32xf32>
    %14 = arith.index_cast %1 : i32 to index
    %c5 = arith.constant 5 : index
    %15 = vector.load %arg1[%14, %c5] : memref<32x80xf32, #tpu.memory_space<vmem>>, vector<32x1xf32>
    %16 = vector.broadcast %15 : vector<32x1xf32> to vector<32x32xf32>
    %17 = arith.mulf %16, %8 : vector<32x32xf32>
    %18 = arith.addf %3, %17 : vector<32x32xf32>
    %19 = arith.index_cast %1 : i32 to index
    %c10 = arith.constant 10 : index
    %20 = vector.load %arg1[%19, %c10] : memref<32x80xf32, #tpu.memory_space<vmem>>, vector<32x1xf32>
    %21 = vector.broadcast %20 : vector<32x1xf32> to vector<32x32xf32>
    %22 = arith.mulf %21, %8 : vector<32x32xf32>
    %23 = arith.addf %4, %22 : vector<32x32xf32>
    %24 = arith.index_cast %1 : i32 to index
    %c15 = arith.constant 15 : index
    %25 = vector.load %arg1[%24, %c15] : memref<32x80xf32, #tpu.memory_space<vmem>>, vector<32x1xf32>
    %26 = vector.broadcast %25 : vector<32x1xf32> to vector<32x32xf32>
    %27 = arith.mulf %26, %8 : vector<32x32xf32>
    %28 = arith.addf %5, %27 : vector<32x32xf32>
    %29 = arith.index_cast %1 : i32 to index
    %c32 = arith.constant 32 : index
    %30 = vector.load %arg2[%29, %c32] : memref<32x160xbf16, #tpu.memory_space<vmem>>, vector<32x32xbf16>
    %31 = arith.extf %30 : vector<32x32xbf16> to vector<32x32xf32>
    %32 = arith.index_cast %1 : i32 to index
    %c1 = arith.constant 1 : index
    %33 = vector.load %arg1[%32, %c1] : memref<32x80xf32, #tpu.memory_space<vmem>>, vector<32x1xf32>
    %34 = vector.broadcast %33 : vector<32x1xf32> to vector<32x32xf32>
    %35 = arith.mulf %34, %31 : vector<32x32xf32>
    %36 = arith.addf %13, %35 : vector<32x32xf32>
    %37 = arith.index_cast %1 : i32 to index
    %c6 = arith.constant 6 : index
    %38 = vector.load %arg1[%37, %c6] : memref<32x80xf32, #tpu.memory_space<vmem>>, vector<32x1xf32>
    %39 = vector.broadcast %38 : vector<32x1xf32> to vector<32x32xf32>
    %40 = arith.mulf %39, %31 : vector<32x32xf32>
    %41 = arith.addf %18, %40 : vector<32x32xf32>
    %42 = arith.index_cast %1 : i32 to index
    %c11 = arith.constant 11 : index
    %43 = vector.load %arg1[%42, %c11] : memref<32x80xf32, #tpu.memory_space<vmem>>, vector<32x1xf32>
    %44 = vector.broadcast %43 : vector<32x1xf32> to vector<32x32xf32>
    %45 = arith.mulf %44, %31 : vector<32x32xf32>
    %46 = arith.addf %23, %45 : vector<32x32xf32>
    %47 = arith.index_cast %1 : i32 to index
    %c16 = arith.constant 16 : index
    %48 = vector.load %arg1[%47, %c16] : memref<32x80xf32, #tpu.memory_space<vmem>>, vector<32x1xf32>
    %49 = vector.broadcast %48 : vector<32x1xf32> to vector<32x32xf32>
    %50 = arith.mulf %49, %31 : vector<32x32xf32>
    %51 = arith.addf %28, %50 : vector<32x32xf32>
    %52 = arith.index_cast %1 : i32 to index
    %c64 = arith.constant 64 : index
    %53 = vector.load %arg2[%52, %c64] : memref<32x160xbf16, #tpu.memory_space<vmem>>, vector<32x32xbf16>
    %54 = arith.extf %53 : vector<32x32xbf16> to vector<32x32xf32>
    %55 = arith.index_cast %1 : i32 to index
    %c2 = arith.constant 2 : index
    %56 = vector.load %arg1[%55, %c2] : memref<32x80xf32, #tpu.memory_space<vmem>>, vector<32x1xf32>
    %57 = vector.broadcast %56 : vector<32x1xf32> to vector<32x32xf32>
    %58 = arith.mulf %57, %54 : vector<32x32xf32>
    %59 = arith.addf %36, %58 : vector<32x32xf32>
    %60 = arith.index_cast %1 : i32 to index
    %c7 = arith.constant 7 : index
    %61 = vector.load %arg1[%60, %c7] : memref<32x80xf32, #tpu.memory_space<vmem>>, vector<32x1xf32>
    %62 = vector.broadcast %61 : vector<32x1xf32> to vector<32x32xf32>
    %63 = arith.mulf %62, %54 : vector<32x32xf32>
    %64 = arith.addf %41, %63 : vector<32x32xf32>
    %65 = arith.index_cast %1 : i32 to index
    %c12 = arith.constant 12 : index
    %66 = vector.load %arg1[%65, %c12] : memref<32x80xf32, #tpu.memory_space<vmem>>, vector<32x1xf32>
    %67 = vector.broadcast %66 : vector<32x1xf32> to vector<32x32xf32>
    %68 = arith.mulf %67, %54 : vector<32x32xf32>
    %69 = arith.addf %46, %68 : vector<32x32xf32>
    %70 = arith.index_cast %1 : i32 to index
    %c17 = arith.constant 17 : index
    %71 = vector.load %arg1[%70, %c17] : memref<32x80xf32, #tpu.memory_space<vmem>>, vector<32x1xf32>
    %72 = vector.broadcast %71 : vector<32x1xf32> to vector<32x32xf32>
    %73 = arith.mulf %72, %54 : vector<32x32xf32>
    %74 = arith.addf %51, %73 : vector<32x32xf32>
    %75 = arith.index_cast %1 : i32 to index
    %c96 = arith.constant 96 : index
    %76 = vector.load %arg2[%75, %c96] : memref<32x160xbf16, #tpu.memory_space<vmem>>, vector<32x32xbf16>
    %77 = arith.extf %76 : vector<32x32xbf16> to vector<32x32xf32>
    %78 = arith.index_cast %1 : i32 to index
    %c3 = arith.constant 3 : index
    %79 = vector.load %arg1[%78, %c3] : memref<32x80xf32, #tpu.memory_space<vmem>>, vector<32x1xf32>
    %80 = vector.broadcast %79 : vector<32x1xf32> to vector<32x32xf32>
    %81 = arith.mulf %80, %77 : vector<32x32xf32>
    %82 = arith.addf %59, %81 : vector<32x32xf32>
    %83 = arith.index_cast %1 : i32 to index
    %c8 = arith.constant 8 : index
    %84 = vector.load %arg1[%83, %c8] : memref<32x80xf32, #tpu.memory_space<vmem>>, vector<32x1xf32>
    %85 = vector.broadcast %84 : vector<32x1xf32> to vector<32x32xf32>
    %86 = arith.mulf %85, %77 : vector<32x32xf32>
    %87 = arith.addf %64, %86 : vector<32x32xf32>
    %88 = arith.index_cast %1 : i32 to index
    %c13 = arith.constant 13 : index
    %89 = vector.load %arg1[%88, %c13] : memref<32x80xf32, #tpu.memory_space<vmem>>, vector<32x1xf32>
    %90 = vector.broadcast %89 : vector<32x1xf32> to vector<32x32xf32>
    %91 = arith.mulf %90, %77 : vector<32x32xf32>
    %92 = arith.addf %69, %91 : vector<32x32xf32>
    %93 = arith.index_cast %1 : i32 to index
    %c18 = arith.constant 18 : index
    %94 = vector.load %arg1[%93, %c18] : memref<32x80xf32, #tpu.memory_space<vmem>>, vector<32x1xf32>
    %95 = vector.broadcast %94 : vector<32x1xf32> to vector<32x32xf32>
    %96 = arith.mulf %95, %77 : vector<32x32xf32>
    %97 = arith.addf %74, %96 : vector<32x32xf32>
    %98 = arith.index_cast %1 : i32 to index
    %c128 = arith.constant 128 : index
    %99 = vector.load %arg2[%98, %c128] : memref<32x160xbf16, #tpu.memory_space<vmem>>, vector<32x32xbf16>
    %100 = arith.extf %99 : vector<32x32xbf16> to vector<32x32xf32>
    %101 = arith.index_cast %1 : i32 to index
    %c4 = arith.constant 4 : index
    %102 = vector.load %arg1[%101, %c4] : memref<32x80xf32, #tpu.memory_space<vmem>>, vector<32x1xf32>
    %103 = vector.broadcast %102 : vector<32x1xf32> to vector<32x32xf32>
    %104 = arith.mulf %103, %100 : vector<32x32xf32>
    %105 = arith.addf %82, %104 : vector<32x32xf32>
    %106 = arith.index_cast %1 : i32 to index
    %c9 = arith.constant 9 : index
    %107 = vector.load %arg1[%106, %c9] : memref<32x80xf32, #tpu.memory_space<vmem>>, vector<32x1xf32>
    %108 = vector.broadcast %107 : vector<32x1xf32> to vector<32x32xf32>
    %109 = arith.mulf %108, %100 : vector<32x32xf32>
    %110 = arith.addf %87, %109 : vector<32x32xf32>
    %111 = arith.index_cast %1 : i32 to index
    %c14 = arith.constant 14 : index
    %112 = vector.load %arg1[%111, %c14] : memref<32x80xf32, #tpu.memory_space<vmem>>, vector<32x1xf32>
    %113 = vector.broadcast %112 : vector<32x1xf32> to vector<32x32xf32>
    %114 = arith.mulf %113, %100 : vector<32x32xf32>
    %115 = arith.addf %92, %114 : vector<32x32xf32>
    %116 = arith.index_cast %1 : i32 to index
    %c19 = arith.constant 19 : index
    %117 = vector.load %arg1[%116, %c19] : memref<32x80xf32, #tpu.memory_space<vmem>>, vector<32x1xf32>
    %118 = vector.broadcast %117 : vector<32x1xf32> to vector<32x32xf32>
    %119 = arith.mulf %118, %100 : vector<32x32xf32>
    %120 = arith.addf %97, %119 : vector<32x32xf32>
    %121 = tpu.concatenate %105, %110, %115, %120 in 1 : vector<32x32xf32>, vector<32x32xf32>, vector<32x32xf32>, vector<32x32xf32> -> vector<32x128xf32>
    %122 = arith.truncf %121 : vector<32x128xf32> to vector<32x128xbf16>
    %123 = arith.index_cast %1 : i32 to index
    %c0_4 = arith.constant 0 : index
    %124 = vector.load %arg8[%123, %c0_4] : memref<32x512xbf16, #tpu.memory_space<vmem>>, vector<32x128xbf16>
    tpu.vector_store %arg8[%123, %c0_4], %122 {strides = array<i32>} : memref<32x512xbf16, #tpu.memory_space<vmem>>, vector<32x128xbf16>,
    %cst_5 = arith.constant 0.000000e+00 : f32
    %125 = vector.broadcast %cst_5 : f32 to vector<32x32xf32>
    %cst_6 = arith.constant 0.000000e+00 : f32
    %126 = vector.broadcast %cst_6 : f32 to vector<32x32xf32>
    %cst_7 = arith.constant 0.000000e+00 : f32
    %127 = vector.broadcast %cst_7 : f32 to vector<32x32xf32>
    %cst_8 = arith.constant 0.000000e+00 : f32
    %128 = vector.broadcast %cst_8 : f32 to vector<32x32xf32>
    %129 = arith.index_cast %1 : i32 to index
    %c0_9 = arith.constant 0 : index
    %130 = vector.load %arg2[%129, %c0_9] : memref<32x160xbf16, #tpu.memory_space<vmem>>, vector<32x32xbf16>
    %131 = arith.extf %130 : vector<32x32xbf16> to vector<32x32xf32>
    %132 = arith.index_cast %1 : i32 to index
    %c20 = arith.constant 20 : index
    %133 = vector.load %arg1[%132, %c20] : memref<32x80xf32, #tpu.memory_space<vmem>>, vector<32x1xf32>
    %134 = vector.broadcast %133 : vector<32x1xf32> to vector<32x32xf32>
    %135 = arith.mulf %134, %131 : vector<32x32xf32>
    %136 = arith.addf %125, %135 : vector<32x32xf32>
    %137 = arith.index_cast %1 : i32 to index
    %c25 = arith.constant 25 : index
    %138 = vector.load %arg1[%137, %c25] : memref<32x80xf32, #tpu.memory_space<vmem>>, vector<32x1xf32>
    %139 = vector.broadcast %138 : vector<32x1xf32> to vector<32x32xf32>
    %140 = arith.mulf %139, %131 : vector<32x32xf32>
    %141 = arith.addf %126, %140 : vector<32x32xf32>
    %142 = arith.index_cast %1 : i32 to index
    %c30 = arith.constant 30 : index
    %143 = vector.load %arg1[%142, %c30] : memref<32x80xf32, #tpu.memory_space<vmem>>, vector<32x1xf32>
    %144 = vector.broadcast %143 : vector<32x1xf32> to vector<32x32xf32>
    %145 = arith.mulf %144, %131 : vector<32x32xf32>
    %146 = arith.addf %127, %145 : vector<32x32xf32>
    %147 = arith.index_cast %1 : i32 to index
    %c35 = arith.constant 35 : index
    %148 = vector.load %arg1[%147, %c35] : memref<32x80xf32, #tpu.memory_space<vmem>>, vector<32x1xf32>
    %149 = vector.broadcast %148 : vector<32x1xf32> to vector<32x32xf32>
    %150 = arith.mulf %149, %131 : vector<32x32xf32>
    %151 = arith.addf %128, %150 : vector<32x32xf32>
    %152 = arith.index_cast %1 : i32 to index
    %c32_10 = arith.constant 32 : index
    %153 = vector.load %arg2[%152, %c32_10] : memref<32x160xbf16, #tpu.memory_space<vmem>>, vector<32x32xbf16>
    %154 = arith.extf %153 : vector<32x32xbf16> to vector<32x32xf32>
    %155 = arith.index_cast %1 : i32 to index
    %c21 = arith.constant 21 : index
    %156 = vector.load %arg1[%155, %c21] : memref<32x80xf32, #tpu.memory_space<vmem>>, vector<32x1xf32>
    %157 = vector.broadcast %156 : vector<32x1xf32> to vector<32x32xf32>
    %158 = arith.mulf %157, %154 : vector<32x32xf32>
    %159 = arith.addf %136, %158 : vector<32x32xf32>
    %160 = arith.index_cast %1 : i32 to index
    %c26 = arith.constant 26 : index
    %161 = vector.load %arg1[%160, %c26] : memref<32x80xf32, #tpu.memory_space<vmem>>, vector<32x1xf32>
    %162 = vector.broadcast %161 : vector<32x1xf32> to vector<32x32xf32>
    %163 = arith.mulf %162, %154 : vector<32x32xf32>
    %164 = arith.addf %141, %163 : vector<32x32xf32>
    %165 = arith.index_cast %1 : i32 to index
    %c31 = arith.constant 31 : index
    %166 = vector.load %arg1[%165, %c31] : memref<32x80xf32, #tpu.memory_space<vmem>>, vector<32x1xf32>
    %167 = vector.broadcast %166 : vector<32x1xf32> to vector<32x32xf32>
    %168 = arith.mulf %167, %154 : vector<32x32xf32>
    %169 = arith.addf %146, %168 : vector<32x32xf32>
    %170 = arith.index_cast %1 : i32 to index
    %c36 = arith.constant 36 : index
    %171 = vector.load %arg1[%170, %c36] : memref<32x80xf32, #tpu.memory_space<vmem>>, vector<32x1xf32>
    %172 = vector.broadcast %171 : vector<32x1xf32> to vector<32x32xf32>
    %173 = arith.mulf %172, %154 : vector<32x32xf32>
    %174 = arith.addf %151, %173 : vector<32x32xf32>
    %175 = arith.index_cast %1 : i32 to index
    %c64_11 = arith.constant 64 : index
    %176 = vector.load %arg2[%175, %c64_11] : memref<32x160xbf16, #tpu.memory_space<vmem>>, vector<32x32xbf16>
    %177 = arith.extf %176 : vector<32x32xbf16> to vector<32x32xf32>
    %178 = arith.index_cast %1 : i32 to index
    %c22 = arith.constant 22 : index
    %179 = vector.load %arg1[%178, %c22] : memref<32x80xf32, #tpu.memory_space<vmem>>, vector<32x1xf32>
    %180 = vector.broadcast %179 : vector<32x1xf32> to vector<32x32xf32>
    %181 = arith.mulf %180, %177 : vector<32x32xf32>
    %182 = arith.addf %159, %181 : vector<32x32xf32>
    %183 = arith.index_cast %1 : i32 to index
    %c27 = arith.constant 27 : index
    %184 = vector.load %arg1[%183, %c27] : memref<32x80xf32, #tpu.memory_space<vmem>>, vector<32x1xf32>
    %185 = vector.broadcast %184 : vector<32x1xf32> to vector<32x32xf32>
    %186 = arith.mulf %185, %177 : vector<32x32xf32>
    %187 = arith.addf %164, %186 : vector<32x32xf32>
    %188 = arith.index_cast %1 : i32 to index
    %c32_12 = arith.constant 32 : index
    %189 = vector.load %arg1[%188, %c32_12] : memref<32x80xf32, #tpu.memory_space<vmem>>, vector<32x1xf32>
    %190 = vector.broadcast %189 : vector<32x1xf32> to vector<32x32xf32>
    %191 = arith.mulf %190, %177 : vector<32x32xf32>
    %192 = arith.addf %169, %191 : vector<32x32xf32>
    %193 = arith.index_cast %1 : i32 to index
    %c37 = arith.constant 37 : index
    %194 = vector.load %arg1[%193, %c37] : memref<32x80xf32, #tpu.memory_space<vmem>>, vector<32x1xf32>
    %195 = vector.broadcast %194 : vector<32x1xf32> to vector<32x32xf32>
    %196 = arith.mulf %195, %177 : vector<32x32xf32>
    %197 = arith.addf %174, %196 : vector<32x32xf32>
    %198 = arith.index_cast %1 : i32 to index
    %c96_13 = arith.constant 96 : index
    %199 = vector.load %arg2[%198, %c96_13] : memref<32x160xbf16, #tpu.memory_space<vmem>>, vector<32x32xbf16>
    %200 = arith.extf %199 : vector<32x32xbf16> to vector<32x32xf32>
    %201 = arith.index_cast %1 : i32 to index
    %c23 = arith.constant 23 : index
    %202 = vector.load %arg1[%201, %c23] : memref<32x80xf32, #tpu.memory_space<vmem>>, vector<32x1xf32>
    %203 = vector.broadcast %202 : vector<32x1xf32> to vector<32x32xf32>
    %204 = arith.mulf %203, %200 : vector<32x32xf32>
    %205 = arith.addf %182, %204 : vector<32x32xf32>
    %206 = arith.index_cast %1 : i32 to index
    %c28 = arith.constant 28 : index
    %207 = vector.load %arg1[%206, %c28] : memref<32x80xf32, #tpu.memory_space<vmem>>, vector<32x1xf32>
    %208 = vector.broadcast %207 : vector<32x1xf32> to vector<32x32xf32>
    %209 = arith.mulf %208, %200 : vector<32x32xf32>
    %210 = arith.addf %187, %209 : vector<32x32xf32>
    %211 = arith.index_cast %1 : i32 to index
    %c33 = arith.constant 33 : index
    %212 = vector.load %arg1[%211, %c33] : memref<32x80xf32, #tpu.memory_space<vmem>>, vector<32x1xf32>
    %213 = vector.broadcast %212 : vector<32x1xf32> to vector<32x32xf32>
    %214 = arith.mulf %213, %200 : vector<32x32xf32>
    %215 = arith.addf %192, %214 : vector<32x32xf32>
    %216 = arith.index_cast %1 : i32 to index
    %c38 = arith.constant 38 : index
    %217 = vector.load %arg1[%216, %c38] : memref<32x80xf32, #tpu.memory_space<vmem>>, vector<32x1xf32>
    %218 = vector.broadcast %217 : vector<32x1xf32> to vector<32x32xf32>
    %219 = arith.mulf %218, %200 : vector<32x32xf32>
    %220 = arith.addf %197, %219 : vector<32x32xf32>
    %221 = arith.index_cast %1 : i32 to index
    %c128_14 = arith.constant 128 : index
    %222 = vector.load %arg2[%221, %c128_14] : memref<32x160xbf16, #tpu.memory_space<vmem>>, vector<32x32xbf16>
    %223 = arith.extf %222 : vector<32x32xbf16> to vector<32x32xf32>
    %224 = arith.index_cast %1 : i32 to index
    %c24 = arith.constant 24 : index
    %225 = vector.load %arg1[%224, %c24] : memref<32x80xf32, #tpu.memory_space<vmem>>, vector<32x1xf32>
    %226 = vector.broadcast %225 : vector<32x1xf32> to vector<32x32xf32>
    %227 = arith.mulf %226, %223 : vector<32x32xf32>
    %228 = arith.addf %205, %227 : vector<32x32xf32>
    %229 = arith.index_cast %1 : i32 to index
    %c29 = arith.constant 29 : index
    %230 = vector.load %arg1[%229, %c29] : memref<32x80xf32, #tpu.memory_space<vmem>>, vector<32x1xf32>
    %231 = vector.broadcast %230 : vector<32x1xf32> to vector<32x32xf32>
    %232 = arith.mulf %231, %223 : vector<32x32xf32>
    %233 = arith.addf %210, %232 : vector<32x32xf32>
    %234 = arith.index_cast %1 : i32 to index
    %c34 = arith.constant 34 : index
    %235 = vector.load %arg1[%234, %c34] : memref<32x80xf32, #tpu.memory_space<vmem>>, vector<32x1xf32>
    %236 = vector.broadcast %235 : vector<32x1xf32> to vector<32x32xf32>
    %237 = arith.mulf %236, %223 : vector<32x32xf32>
    %238 = arith.addf %215, %237 : vector<32x32xf32>
    %239 = arith.index_cast %1 : i32 to index
    %c39 = arith.constant 39 : index
    %240 = vector.load %arg1[%239, %c39] : memref<32x80xf32, #tpu.memory_space<vmem>>, vector<32x1xf32>
    %241 = vector.broadcast %240 : vector<32x1xf32> to vector<32x32xf32>
    %242 = arith.mulf %241, %223 : vector<32x32xf32>
    %243 = arith.addf %220, %242 : vector<32x32xf32>
    %244 = tpu.concatenate %228, %233, %238, %243 in 1 : vector<32x32xf32>, vector<32x32xf32>, vector<32x32xf32>, vector<32x32xf32> -> vector<32x128xf32>
    %245 = arith.truncf %244 : vector<32x128xf32> to vector<32x128xbf16>
    %246 = arith.index_cast %1 : i32 to index
    %c128_15 = arith.constant 128 : index
    %247 = vector.load %arg8[%246, %c128_15] : memref<32x512xbf16, #tpu.memory_space<vmem>>, vector<32x128xbf16>
    tpu.vector_store %arg8[%246, %c128_15], %245 {strides = array<i32>} : memref<32x512xbf16, #tpu.memory_space<vmem>>, vector<32x128xbf16>,
    %cst_16 = arith.constant 0.000000e+00 : f32
    %248 = vector.broadcast %cst_16 : f32 to vector<32x32xf32>
    %cst_17 = arith.constant 0.000000e+00 : f32
    %249 = vector.broadcast %cst_17 : f32 to vector<32x32xf32>
    %cst_18 = arith.constant 0.000000e+00 : f32
    %250 = vector.broadcast %cst_18 : f32 to vector<32x32xf32>
    %cst_19 = arith.constant 0.000000e+00 : f32
    %251 = vector.broadcast %cst_19 : f32 to vector<32x32xf32>
    %252 = arith.index_cast %1 : i32 to index
    %c0_20 = arith.constant 0 : index
    %253 = vector.load %arg2[%252, %c0_20] : memref<32x160xbf16, #tpu.memory_space<vmem>>, vector<32x32xbf16>
    %254 = arith.extf %253 : vector<32x32xbf16> to vector<32x32xf32>
    %255 = arith.index_cast %1 : i32 to index
    %c40 = arith.constant 40 : index
    %256 = vector.load %arg1[%255, %c40] : memref<32x80xf32, #tpu.memory_space<vmem>>, vector<32x1xf32>
    %257 = vector.broadcast %256 : vector<32x1xf32> to vector<32x32xf32>
    %258 = arith.mulf %257, %254 : vector<32x32xf32>
    %259 = arith.addf %248, %258 : vector<32x32xf32>
    %260 = arith.index_cast %1 : i32 to index
    %c45 = arith.constant 45 : index
    %261 = vector.load %arg1[%260, %c45] : memref<32x80xf32, #tpu.memory_space<vmem>>, vector<32x1xf32>
    %262 = vector.broadcast %261 : vector<32x1xf32> to vector<32x32xf32>
    %263 = arith.mulf %262, %254 : vector<32x32xf32>
    %264 = arith.addf %249, %263 : vector<32x32xf32>
    %265 = arith.index_cast %1 : i32 to index
    %c50 = arith.constant 50 : index
    %266 = vector.load %arg1[%265, %c50] : memref<32x80xf32, #tpu.memory_space<vmem>>, vector<32x1xf32>
    %267 = vector.broadcast %266 : vector<32x1xf32> to vector<32x32xf32>
    %268 = arith.mulf %267, %254 : vector<32x32xf32>
    %269 = arith.addf %250, %268 : vector<32x32xf32>
    %270 = arith.index_cast %1 : i32 to index
    %c55 = arith.constant 55 : index
    %271 = vector.load %arg1[%270, %c55] : memref<32x80xf32, #tpu.memory_space<vmem>>, vector<32x1xf32>
    %272 = vector.broadcast %271 : vector<32x1xf32> to vector<32x32xf32>
    %273 = arith.mulf %272, %254 : vector<32x32xf32>
    %274 = arith.addf %251, %273 : vector<32x32xf32>
    %275 = arith.index_cast %1 : i32 to index
    %c32_21 = arith.constant 32 : index
    %276 = vector.load %arg2[%275, %c32_21] : memref<32x160xbf16, #tpu.memory_space<vmem>>, vector<32x32xbf16>
    %277 = arith.extf %276 : vector<32x32xbf16> to vector<32x32xf32>
    %278 = arith.index_cast %1 : i32 to index
    %c41 = arith.constant 41 : index
    %279 = vector.load %arg1[%278, %c41] : memref<32x80xf32, #tpu.memory_space<vmem>>, vector<32x1xf32>
    %280 = vector.broadcast %279 : vector<32x1xf32> to vector<32x32xf32>
    %281 = arith.mulf %280, %277 : vector<32x32xf32>
    %282 = arith.addf %259, %281 : vector<32x32xf32>
    %283 = arith.index_cast %1 : i32 to index
    %c46 = arith.constant 46 : index
    %284 = vector.load %arg1[%283, %c46] : memref<32x80xf32, #tpu.memory_space<vmem>>, vector<32x1xf32>
    %285 = vector.broadcast %284 : vector<32x1xf32> to vector<32x32xf32>
    %286 = arith.mulf %285, %277 : vector<32x32xf32>
    %287 = arith.addf %264, %286 : vector<32x32xf32>
    %288 = arith.index_cast %1 : i32 to index
    %c51 = arith.constant 51 : index
    %289 = vector.load %arg1[%288, %c51] : memref<32x80xf32, #tpu.memory_space<vmem>>, vector<32x1xf32>
    %290 = vector.broadcast %289 : vector<32x1xf32> to vector<32x32xf32>
    %291 = arith.mulf %290, %277 : vector<32x32xf32>
    %292 = arith.addf %269, %291 : vector<32x32xf32>
    %293 = arith.index_cast %1 : i32 to index
    %c56 = arith.constant 56 : index
    %294 = vector.load %arg1[%293, %c56] : memref<32x80xf32, #tpu.memory_space<vmem>>, vector<32x1xf32>
    %295 = vector.broadcast %294 : vector<32x1xf32> to vector<32x32xf32>
    %296 = arith.mulf %295, %277 : vector<32x32xf32>
    %297 = arith.addf %274, %296 : vector<32x32xf32>
    %298 = arith.index_cast %1 : i32 to index
    %c64_22 = arith.constant 64 : index
    %299 = vector.load %arg2[%298, %c64_22] : memref<32x160xbf16, #tpu.memory_space<vmem>>, vector<32x32xbf16>
    %300 = arith.extf %299 : vector<32x32xbf16> to vector<32x32xf32>
    %301 = arith.index_cast %1 : i32 to index
    %c42 = arith.constant 42 : index
    %302 = vector.load %arg1[%301, %c42] : memref<32x80xf32, #tpu.memory_space<vmem>>, vector<32x1xf32>
    %303 = vector.broadcast %302 : vector<32x1xf32> to vector<32x32xf32>
    %304 = arith.mulf %303, %300 : vector<32x32xf32>
    %305 = arith.addf %282, %304 : vector<32x32xf32>
    %306 = arith.index_cast %1 : i32 to index
    %c47 = arith.constant 47 : index
    %307 = vector.load %arg1[%306, %c47] : memref<32x80xf32, #tpu.memory_space<vmem>>, vector<32x1xf32>
    %308 = vector.broadcast %307 : vector<32x1xf32> to vector<32x32xf32>
    %309 = arith.mulf %308, %300 : vector<32x32xf32>
    %310 = arith.addf %287, %309 : vector<32x32xf32>
    %311 = arith.index_cast %1 : i32 to index
    %c52 = arith.constant 52 : index
    %312 = vector.load %arg1[%311, %c52] : memref<32x80xf32, #tpu.memory_space<vmem>>, vector<32x1xf32>
    %313 = vector.broadcast %312 : vector<32x1xf32> to vector<32x32xf32>
    %314 = arith.mulf %313, %300 : vector<32x32xf32>
    %315 = arith.addf %292, %314 : vector<32x32xf32>
    %316 = arith.index_cast %1 : i32 to index
    %c57 = arith.constant 57 : index
    %317 = vector.load %arg1[%316, %c57] : memref<32x80xf32, #tpu.memory_space<vmem>>, vector<32x1xf32>
    %318 = vector.broadcast %317 : vector<32x1xf32> to vector<32x32xf32>
    %319 = arith.mulf %318, %300 : vector<32x32xf32>
    %320 = arith.addf %297, %319 : vector<32x32xf32>
    %321 = arith.index_cast %1 : i32 to index
    %c96_23 = arith.constant 96 : index
    %322 = vector.load %arg2[%321, %c96_23] : memref<32x160xbf16, #tpu.memory_space<vmem>>, vector<32x32xbf16>
    %323 = arith.extf %322 : vector<32x32xbf16> to vector<32x32xf32>
    %324 = arith.index_cast %1 : i32 to index
    %c43 = arith.constant 43 : index
    %325 = vector.load %arg1[%324, %c43] : memref<32x80xf32, #tpu.memory_space<vmem>>, vector<32x1xf32>
    %326 = vector.broadcast %325 : vector<32x1xf32> to vector<32x32xf32>
    %327 = arith.mulf %326, %323 : vector<32x32xf32>
    %328 = arith.addf %305, %327 : vector<32x32xf32>
    %329 = arith.index_cast %1 : i32 to index
    %c48 = arith.constant 48 : index
    %330 = vector.load %arg1[%329, %c48] : memref<32x80xf32, #tpu.memory_space<vmem>>, vector<32x1xf32>
    %331 = vector.broadcast %330 : vector<32x1xf32> to vector<32x32xf32>
    %332 = arith.mulf %331, %323 : vector<32x32xf32>
    %333 = arith.addf %310, %332 : vector<32x32xf32>
    %334 = arith.index_cast %1 : i32 to index
    %c53 = arith.constant 53 : index
    %335 = vector.load %arg1[%334, %c53] : memref<32x80xf32, #tpu.memory_space<vmem>>, vector<32x1xf32>
    %336 = vector.broadcast %335 : vector<32x1xf32> to vector<32x32xf32>
    %337 = arith.mulf %336, %323 : vector<32x32xf32>
    %338 = arith.addf %315, %337 : vector<32x32xf32>
    %339 = arith.index_cast %1 : i32 to index
    %c58 = arith.constant 58 : index
    %340 = vector.load %arg1[%339, %c58] : memref<32x80xf32, #tpu.memory_space<vmem>>, vector<32x1xf32>
    %341 = vector.broadcast %340 : vector<32x1xf32> to vector<32x32xf32>
    %342 = arith.mulf %341, %323 : vector<32x32xf32>
    %343 = arith.addf %320, %342 : vector<32x32xf32>
    %344 = arith.index_cast %1 : i32 to index
    %c128_24 = arith.constant 128 : index
    %345 = vector.load %arg2[%344, %c128_24] : memref<32x160xbf16, #tpu.memory_space<vmem>>, vector<32x32xbf16>
    %346 = arith.extf %345 : vector<32x32xbf16> to vector<32x32xf32>
    %347 = arith.index_cast %1 : i32 to index
    %c44 = arith.constant 44 : index
    %348 = vector.load %arg1[%347, %c44] : memref<32x80xf32, #tpu.memory_space<vmem>>, vector<32x1xf32>
    %349 = vector.broadcast %348 : vector<32x1xf32> to vector<32x32xf32>
    %350 = arith.mulf %349, %346 : vector<32x32xf32>
    %351 = arith.addf %328, %350 : vector<32x32xf32>
    %352 = arith.index_cast %1 : i32 to index
    %c49 = arith.constant 49 : index
    %353 = vector.load %arg1[%352, %c49] : memref<32x80xf32, #tpu.memory_space<vmem>>, vector<32x1xf32>
    %354 = vector.broadcast %353 : vector<32x1xf32> to vector<32x32xf32>
    %355 = arith.mulf %354, %346 : vector<32x32xf32>
    %356 = arith.addf %333, %355 : vector<32x32xf32>
    %357 = arith.index_cast %1 : i32 to index
    %c54 = arith.constant 54 : index
    %358 = vector.load %arg1[%357, %c54] : memref<32x80xf32, #tpu.memory_space<vmem>>, vector<32x1xf32>
    %359 = vector.broadcast %358 : vector<32x1xf32> to vector<32x32xf32>
    %360 = arith.mulf %359, %346 : vector<32x32xf32>
    %361 = arith.addf %338, %360 : vector<32x32xf32>
    %362 = arith.index_cast %1 : i32 to index
    %c59 = arith.constant 59 : index
    %363 = vector.load %arg1[%362, %c59] : memref<32x80xf32, #tpu.memory_space<vmem>>, vector<32x1xf32>
    %364 = vector.broadcast %363 : vector<32x1xf32> to vector<32x32xf32>
    %365 = arith.mulf %364, %346 : vector<32x32xf32>
    %366 = arith.addf %343, %365 : vector<32x32xf32>
    %367 = tpu.concatenate %351, %356, %361, %366 in 1 : vector<32x32xf32>, vector<32x32xf32>, vector<32x32xf32>, vector<32x32xf32> -> vector<32x128xf32>
    %368 = arith.truncf %367 : vector<32x128xf32> to vector<32x128xbf16>
    %369 = arith.index_cast %1 : i32 to index
    %c256 = arith.constant 256 : index
    %370 = vector.load %arg8[%369, %c256] : memref<32x512xbf16, #tpu.memory_space<vmem>>, vector<32x128xbf16>
    tpu.vector_store %arg8[%369, %c256], %368 {strides = array<i32>} : memref<32x512xbf16, #tpu.memory_space<vmem>>, vector<32x128xbf16>,
    %cst_25 = arith.constant 0.000000e+00 : f32
    %371 = vector.broadcast %cst_25 : f32 to vector<32x32xf32>
    %cst_26 = arith.constant 0.000000e+00 : f32
    %372 = vector.broadcast %cst_26 : f32 to vector<32x32xf32>
    %cst_27 = arith.constant 0.000000e+00 : f32
    %373 = vector.broadcast %cst_27 : f32 to vector<32x32xf32>
    %cst_28 = arith.constant 0.000000e+00 : f32
    %374 = vector.broadcast %cst_28 : f32 to vector<32x32xf32>
    %375 = arith.index_cast %1 : i32 to index
    %c0_29 = arith.constant 0 : index
    %376 = vector.load %arg2[%375, %c0_29] : memref<32x160xbf16, #tpu.memory_space<vmem>>, vector<32x32xbf16>
    %377 = arith.extf %376 : vector<32x32xbf16> to vector<32x32xf32>
    %378 = arith.index_cast %1 : i32 to index
    %c60 = arith.constant 60 : index
    %379 = vector.load %arg1[%378, %c60] : memref<32x80xf32, #tpu.memory_space<vmem>>, vector<32x1xf32>
    %380 = vector.broadcast %379 : vector<32x1xf32> to vector<32x32xf32>
    %381 = arith.mulf %380, %377 : vector<32x32xf32>
    %382 = arith.addf %371, %381 : vector<32x32xf32>
    %383 = arith.index_cast %1 : i32 to index
    %c65 = arith.constant 65 : index
    %384 = vector.load %arg1[%383, %c65] : memref<32x80xf32, #tpu.memory_space<vmem>>, vector<32x1xf32>
    %385 = vector.broadcast %384 : vector<32x1xf32> to vector<32x32xf32>
    %386 = arith.mulf %385, %377 : vector<32x32xf32>
    %387 = arith.addf %372, %386 : vector<32x32xf32>
    %388 = arith.index_cast %1 : i32 to index
    %c70 = arith.constant 70 : index
    %389 = vector.load %arg1[%388, %c70] : memref<32x80xf32, #tpu.memory_space<vmem>>, vector<32x1xf32>
    %390 = vector.broadcast %389 : vector<32x1xf32> to vector<32x32xf32>
    %391 = arith.mulf %390, %377 : vector<32x32xf32>
    %392 = arith.addf %373, %391 : vector<32x32xf32>
    %393 = arith.index_cast %1 : i32 to index
    %c75 = arith.constant 75 : index
    %394 = vector.load %arg1[%393, %c75] : memref<32x80xf32, #tpu.memory_space<vmem>>, vector<32x1xf32>
    %395 = vector.broadcast %394 : vector<32x1xf32> to vector<32x32xf32>
    %396 = arith.mulf %395, %377 : vector<32x32xf32>
    %397 = arith.addf %374, %396 : vector<32x32xf32>
    %398 = arith.index_cast %1 : i32 to index
    %c32_30 = arith.constant 32 : index
    %399 = vector.load %arg2[%398, %c32_30] : memref<32x160xbf16, #tpu.memory_space<vmem>>, vector<32x32xbf16>
    %400 = arith.extf %399 : vector<32x32xbf16> to vector<32x32xf32>
    %401 = arith.index_cast %1 : i32 to index
    %c61 = arith.constant 61 : index
    %402 = vector.load %arg1[%401, %c61] : memref<32x80xf32, #tpu.memory_space<vmem>>, vector<32x1xf32>
    %403 = vector.broadcast %402 : vector<32x1xf32> to vector<32x32xf32>
    %404 = arith.mulf %403, %400 : vector<32x32xf32>
    %405 = arith.addf %382, %404 : vector<32x32xf32>
    %406 = arith.index_cast %1 : i32 to index
    %c66 = arith.constant 66 : index
    %407 = vector.load %arg1[%406, %c66] : memref<32x80xf32, #tpu.memory_space<vmem>>, vector<32x1xf32>
    %408 = vector.broadcast %407 : vector<32x1xf32> to vector<32x32xf32>
    %409 = arith.mulf %408, %400 : vector<32x32xf32>
    %410 = arith.addf %387, %409 : vector<32x32xf32>
    %411 = arith.index_cast %1 : i32 to index
    %c71 = arith.constant 71 : index
    %412 = vector.load %arg1[%411, %c71] : memref<32x80xf32, #tpu.memory_space<vmem>>, vector<32x1xf32>
    %413 = vector.broadcast %412 : vector<32x1xf32> to vector<32x32xf32>
    %414 = arith.mulf %413, %400 : vector<32x32xf32>
    %415 = arith.addf %392, %414 : vector<32x32xf32>
    %416 = arith.index_cast %1 : i32 to index
    %c76 = arith.constant 76 : index
    %417 = vector.load %arg1[%416, %c76] : memref<32x80xf32, #tpu.memory_space<vmem>>, vector<32x1xf32>
    %418 = vector.broadcast %417 : vector<32x1xf32> to vector<32x32xf32>
    %419 = arith.mulf %418, %400 : vector<32x32xf32>
    %420 = arith.addf %397, %419 : vector<32x32xf32>
    %421 = arith.index_cast %1 : i32 to index
    %c64_31 = arith.constant 64 : index
    %422 = vector.load %arg2[%421, %c64_31] : memref<32x160xbf16, #tpu.memory_space<vmem>>, vector<32x32xbf16>
    %423 = arith.extf %422 : vector<32x32xbf16> to vector<32x32xf32>
    %424 = arith.index_cast %1 : i32 to index
    %c62 = arith.constant 62 : index
    %425 = vector.load %arg1[%424, %c62] : memref<32x80xf32, #tpu.memory_space<vmem>>, vector<32x1xf32>
    %426 = vector.broadcast %425 : vector<32x1xf32> to vector<32x32xf32>
    %427 = arith.mulf %426, %423 : vector<32x32xf32>
    %428 = arith.addf %405, %427 : vector<32x32xf32>
    %429 = arith.index_cast %1 : i32 to index
    %c67 = arith.constant 67 : index
    %430 = vector.load %arg1[%429, %c67] : memref<32x80xf32, #tpu.memory_space<vmem>>, vector<32x1xf32>
    %431 = vector.broadcast %430 : vector<32x1xf32> to vector<32x32xf32>
    %432 = arith.mulf %431, %423 : vector<32x32xf32>
    %433 = arith.addf %410, %432 : vector<32x32xf32>
    %434 = arith.index_cast %1 : i32 to index
    %c72 = arith.constant 72 : index
    %435 = vector.load %arg1[%434, %c72] : memref<32x80xf32, #tpu.memory_space<vmem>>, vector<32x1xf32>
    %436 = vector.broadcast %435 : vector<32x1xf32> to vector<32x32xf32>
    %437 = arith.mulf %436, %423 : vector<32x32xf32>
    %438 = arith.addf %415, %437 : vector<32x32xf32>
    %439 = arith.index_cast %1 : i32 to index
    %c77 = arith.constant 77 : index
    %440 = vector.load %arg1[%439, %c77] : memref<32x80xf32, #tpu.memory_space<vmem>>, vector<32x1xf32>
    %441 = vector.broadcast %440 : vector<32x1xf32> to vector<32x32xf32>
    %442 = arith.mulf %441, %423 : vector<32x32xf32>
    %443 = arith.addf %420, %442 : vector<32x32xf32>
    %444 = arith.index_cast %1 : i32 to index
    %c96_32 = arith.constant 96 : index
    %445 = vector.load %arg2[%444, %c96_32] : memref<32x160xbf16, #tpu.memory_space<vmem>>, vector<32x32xbf16>
    %446 = arith.extf %445 : vector<32x32xbf16> to vector<32x32xf32>
    %447 = arith.index_cast %1 : i32 to index
    %c63 = arith.constant 63 : index
    %448 = vector.load %arg1[%447, %c63] : memref<32x80xf32, #tpu.memory_space<vmem>>, vector<32x1xf32>
    %449 = vector.broadcast %448 : vector<32x1xf32> to vector<32x32xf32>
    %450 = arith.mulf %449, %446 : vector<32x32xf32>
    %451 = arith.addf %428, %450 : vector<32x32xf32>
    %452 = arith.index_cast %1 : i32 to index
    %c68 = arith.constant 68 : index
    %453 = vector.load %arg1[%452, %c68] : memref<32x80xf32, #tpu.memory_space<vmem>>, vector<32x1xf32>
    %454 = vector.broadcast %453 : vector<32x1xf32> to vector<32x32xf32>
    %455 = arith.mulf %454, %446 : vector<32x32xf32>
    %456 = arith.addf %433, %455 : vector<32x32xf32>
    %457 = arith.index_cast %1 : i32 to index
    %c73 = arith.constant 73 : index
    %458 = vector.load %arg1[%457, %c73] : memref<32x80xf32, #tpu.memory_space<vmem>>, vector<32x1xf32>
    %459 = vector.broadcast %458 : vector<32x1xf32> to vector<32x32xf32>
    %460 = arith.mulf %459, %446 : vector<32x32xf32>
    %461 = arith.addf %438, %460 : vector<32x32xf32>
    %462 = arith.index_cast %1 : i32 to index
    %c78 = arith.constant 78 : index
    %463 = vector.load %arg1[%462, %c78] : memref<32x80xf32, #tpu.memory_space<vmem>>, vector<32x1xf32>
    %464 = vector.broadcast %463 : vector<32x1xf32> to vector<32x32xf32>
    %465 = arith.mulf %464, %446 : vector<32x32xf32>
    %466 = arith.addf %443, %465 : vector<32x32xf32>
    %467 = arith.index_cast %1 : i32 to index
    %c128_33 = arith.constant 128 : index
    %468 = vector.load %arg2[%467, %c128_33] : memref<32x160xbf16, #tpu.memory_space<vmem>>, vector<32x32xbf16>
    %469 = arith.extf %468 : vector<32x32xbf16> to vector<32x32xf32>
    %470 = arith.index_cast %1 : i32 to index
    %c64_34 = arith.constant 64 : index
    %471 = vector.load %arg1[%470, %c64_34] : memref<32x80xf32, #tpu.memory_space<vmem>>, vector<32x1xf32>
    %472 = vector.broadcast %471 : vector<32x1xf32> to vector<32x32xf32>
    %473 = arith.mulf %472, %469 : vector<32x32xf32>
    %474 = arith.addf %451, %473 : vector<32x32xf32>
    %475 = arith.index_cast %1 : i32 to index
    %c69 = arith.constant 69 : index
    %476 = vector.load %arg1[%475, %c69] : memref<32x80xf32, #tpu.memory_space<vmem>>, vector<32x1xf32>
    %477 = vector.broadcast %476 : vector<32x1xf32> to vector<32x32xf32>
    %478 = arith.mulf %477, %469 : vector<32x32xf32>
    %479 = arith.addf %456, %478 : vector<32x32xf32>
    %480 = arith.index_cast %1 : i32 to index
    %c74 = arith.constant 74 : index
    %481 = vector.load %arg1[%480, %c74] : memref<32x80xf32, #tpu.memory_space<vmem>>, vector<32x1xf32>
    %482 = vector.broadcast %481 : vector<32x1xf32> to vector<32x32xf32>
    %483 = arith.mulf %482, %469 : vector<32x32xf32>
    %484 = arith.addf %461, %483 : vector<32x32xf32>
    %485 = arith.index_cast %1 : i32 to index
    %c79 = arith.constant 79 : index
    %486 = vector.load %arg1[%485, %c79] : memref<32x80xf32, #tpu.memory_space<vmem>>, vector<32x1xf32>
    %487 = vector.broadcast %486 : vector<32x1xf32> to vector<32x32xf32>
    %488 = arith.mulf %487, %469 : vector<32x32xf32>
    %489 = arith.addf %466, %488 : vector<32x32xf32>
    %490 = tpu.concatenate %474, %479, %484, %489 in 1 : vector<32x32xf32>, vector<32x32xf32>, vector<32x32xf32>, vector<32x32xf32> -> vector<32x128xf32>
    %491 = arith.truncf %490 : vector<32x128xf32> to vector<32x128xbf16>
    %492 = arith.index_cast %1 : i32 to index
    %c384 = arith.constant 384 : index
    %493 = vector.load %arg8[%492, %c384] : memref<32x512xbf16, #tpu.memory_space<vmem>>, vector<32x128xbf16>
    tpu.vector_store %arg8[%492, %c384], %491 {strides = array<i32>} : memref<32x512xbf16, #tpu.memory_space<vmem>>, vector<32x128xbf16>,
    %c1_i32 = arith.constant 1 : i32
    %c0_35 = arith.constant 0 : index
    %c0_36 = arith.constant 0 : index
    %494 = vector.load %arg8[%c0_35, %c0_36] : memref<32x512xbf16, #tpu.memory_space<vmem>>, vector<32x512xbf16>
    %c0_37 = arith.constant 0 : index
    %c0_38 = arith.constant 0 : index
    %495 = vector.load %arg3[%c0_37, %c0_38] : memref<512x128xbf16, #tpu.memory_space<vmem>>, vector<512x128xbf16>
    %cst_39 = arith.constant dense<0.000000e+00> : vector<32x128xf32>
    %496 = tpu.matmul %494, %495, %cst_39 {dimension_numbers = #tpu.dot_dimension_numbers<[1], [0], [0], [1], [0, 0, 1, 1], [], []>} : vector<32x512xbf16>, vector<512x128xbf16>, vector<32x128xf32> -> vector<32x128xf32>
    %c0_40 = arith.constant 0 : index
    %c0_41 = arith.constant 0 : index
    %497 = vector.load %arg4[%c0_40, %c0_41] : memref<1x128xf32, #tpu.memory_space<vmem>>, vector<1x128xf32>
    %498 = vector.broadcast %497 : vector<1x128xf32> to vector<32x128xf32>
    %499 = arith.addf %496, %498 : vector<32x128xf32>
    %cst_42 = arith.constant 0.000000e+00 : f32
    %500 = vector.broadcast %cst_42 : f32 to vector<32x128xf32>
    %501 = arith.maximumf %499, %500 : vector<32x128xf32>
    %502 = arith.truncf %501 : vector<32x128xf32> to vector<32x128xbf16>
    %c0_43 = arith.constant 0 : index
    %c0_44 = arith.constant 0 : index
    %503 = vector.load %arg5[%c0_43, %c0_44] : memref<128x128xbf16, #tpu.memory_space<vmem>>, vector<128x128xbf16>
    %cst_45 = arith.constant dense<0.000000e+00> : vector<32x128xf32>
    %504 = tpu.matmul %502, %503, %cst_45 {dimension_numbers = #tpu.dot_dimension_numbers<[1], [0], [0], [1], [0, 0, 1, 1], [], []>} : vector<32x128xbf16>, vector<128x128xbf16>, vector<32x128xf32> -> vector<32x128xf32>
    %c0_46 = arith.constant 0 : index
    %c0_47 = arith.constant 0 : index
    %505 = vector.load %arg6[%c0_46, %c0_47] : memref<1x128xf32, #tpu.memory_space<vmem>>, vector<1x128xf32>
    %506 = vector.broadcast %505 : vector<1x128xf32> to vector<32x128xf32>
    %507 = arith.addf %504, %506 : vector<32x128xf32>
    %c0_48 = arith.constant 0 : index
    %c0_49 = arith.constant 0 : index
    %508 = vector.load %arg7[%c0_48, %c0_49] : memref<32x128xf32, #tpu.memory_space<vmem>>, vector<32x128xf32>
    tpu.vector_store %arg7[%c0_48, %c0_49], %507 {strides = array<i32>} : memref<32x128xf32, #tpu.memory_space<vmem>>, vector<32x128xf32>,
    return
  }
  func.func @transform_0(%arg0: i32) -> (i32, i32) {
    %c0_i32 = arith.constant 0 : i32
    %c0_i32_0 = arith.constant 0 : i32
    return %arg0, %c0_i32 : i32, i32
  }
  func.func @transform_1(%arg0: i32) -> (i32, i32) {
    %c0_i32 = arith.constant 0 : i32
    %c0_i32_0 = arith.constant 0 : i32
    return %arg0, %c0_i32 : i32, i32
  }
  func.func @transform_2(%arg0: i32) -> (i32, i32) {
    %c0_i32 = arith.constant 0 : i32
    %c0_i32_0 = arith.constant 0 : i32
    %c0_i32_1 = arith.constant 0 : i32
    return %c0_i32, %c0_i32_0 : i32, i32
  }
  func.func @transform_3(%arg0: i32) -> (i32, i32) {
    %c0_i32 = arith.constant 0 : i32
    %c0_i32_0 = arith.constant 0 : i32
    %c0_i32_1 = arith.constant 0 : i32
    return %c0_i32, %c0_i32_0 : i32, i32
  }
  func.func @transform_4(%arg0: i32) -> (i32, i32) {
    %c0_i32 = arith.constant 0 : i32
    %c0_i32_0 = arith.constant 0 : i32
    %c0_i32_1 = arith.constant 0 : i32
    return %c0_i32, %c0_i32_0 : i32, i32
  }
  func.func @transform_5(%arg0: i32) -> (i32, i32) {
    %c0_i32 = arith.constant 0 : i32
    %c0_i32_0 = arith.constant 0 : i32
    %c0_i32_1 = arith.constant 0 : i32
    return %c0_i32, %c0_i32_0 : i32, i32
  }
  func.func @transform_6(%arg0: i32) -> (i32, i32) {
    %c0_i32 = arith.constant 0 : i32
    %c0_i32_0 = arith.constant 0 : i32
    return %arg0, %c0_i32 : i32, i32
  }
}

</mosaic_0001>

<bundles_post_ra>
// kernel: tpu_custom_call.1
= control target key start
LH: loop header
LB: loop body
LE: loop exit
PB: predicated region body
PF: predicated region fallthrough
CT: control target
= control target key end

     0   :  { %11 = vsyncpa [#allocation4], 0  ;;  %s6607_s0 = inlined_call_operand.hbm [shape: f32[32,80], index: 0, kind: input, shape index: {}]   ;;  %s6608_s1 = inlined_call_operand.hbm [shape: bf16[32,160], index: 1, kind: input, shape index: {}]   ;;  %s6609_s2 = inlined_call_operand.hbm [shape: bf16[512,128], index: 2, kind: input, shape index: {}]   ;;  %s6610_s3 = inlined_call_operand.vmem [shape: f32[1,128], index: 3, kind: input, shape index: {}]   ;;  %s6611_s4 = inlined_call_operand.hbm [shape: bf16[128,128], index: 4, kind: input, shape index: {}]   ;;  %s6612_s5 = inlined_call_operand.vmem [shape: f32[1,128], index: 5, kind: input, shape index: {}]   ;;  %s6613_s6 = inlined_call_operand.hbm [shape: f32[32,128], index: 6, kind: output, shape index: {}]  }
   0x1   :  { %12 = vsyncpa [#allocation7], 0 }
   0x2   :  { %13 = vsyncpa [#allocation10], 0 }
   0x3   :  { %14 = vsyncpa [#allocation5], 0  ;;  %s4341_s21 = smov [#allocation6]   ;;  %s4342_s23 = smov [#allocation3]  }
   0x4   :  { %s32_s22 = sshll.u32 %s4341_s21, 4  ;;  %s20_s24 = sshll.u32 %s4342_s23, 4  ;;  %s33_s22 = int_to_ptr.vmem [resolvable:$true] %s32_s22  ;;  %s4467_s24 = int_to_ptr.vmem [resolvable:$true] %s20_s24 }
   0x5   :  { %s4223_s27 = scalar_lea.hbm %s6608_s1, 512 }
   0x6   :  { %p4224_p0 = scmp.ne.s32.totalorder %s6608_s1, %s4223_s27  ;;  %p4227_p1 = scmp.lt.u32.totalorder %s4223_s27, %s6608_s1 }
   0x8   :  { %p4229_p2 = pnand %p4227_p1, %p4224_p0 }
   0xa   :  { %4232 = shalt.err (!%p4229_p2)
}
   0xb   :  { %s4233_s8 = scalar_lea.vmem %s33_s22, 512  ;;  %p4238_p4 = scmp.lt.s32.totalorder %s33_s22, %s33_s22 }
   0xc   :  { %p4234_p3 = scmp.ne.s32.totalorder %s33_s22, %s4233_s8  ;;  %p4239_p5 = scmp.lt.s32.totalorder %s4233_s8, %s4233_s8 }
   0xe   :  { %p4240_p6 = por %p4239_p5, %p4238_p4 }
  0x10   :  { %p4241_p7 = pnand %p4240_p6, %p4234_p3 }
  0x12   :  { %4244 = shalt.err (!%p4241_p7)
}
  0x13   :  { %s4343_s9 = smov 128   ;;  %s4344_s10 = smov 8  }
  0x14   :  { %38 = dma.hbm_to_vmem [thread:$0]  %s6608_s1, 512, %s33_s22, [#allocation7], %s4343_s9, %s4343_s9, %s4344_s10  }
  0x15   :  { %s4245_s15 = scalar_lea.hbm %s6607_s0, 512 }
  0x16   :  { %p4246_p8 = scmp.ne.s32.totalorder %s6607_s0, %s4245_s15  ;;  %p4249_p9 = scmp.lt.u32.totalorder %s4245_s15, %s6607_s0 }
  0x18   :  { %p4251_p10 = pnand %p4249_p9, %p4246_p8 }
  0x1a   :  { %4254 = shalt.err (!%p4251_p10)
}
  0x1b   :  { %s4255_s20 = scalar_lea.vmem %s4467_s24, 512  ;;  %p4260_p12 = scmp.lt.s32.totalorder %s4467_s24, %s4467_s24 }
  0x1c   :  { %p4256_p11 = scmp.ne.s32.totalorder %s4467_s24, %s4255_s20  ;;  %p4261_p13 = scmp.lt.s32.totalorder %s4255_s20, %s4255_s20 }
  0x1e   :  { %p4262_p0 = por %p4261_p13, %p4260_p12 }
  0x20   :  { %p4263_p1 = pnand %p4262_p0, %p4256_p11 }
  0x22   :  { %4266 = shalt.err (!%p4263_p1)
}
  0x23   :  { %26 = dma.hbm_to_vmem [thread:$0]  %s6607_s0, 512, %s4467_s24, [#allocation4], %s4343_s9, %s4343_s9, %s4344_s10  }
  0x24   :  { %s4345_s22 = smov [#allocation8]   ;;  %s4267_s27 = scalar_lea.hbm %s6609_s2, 4096 }
  0x25   :  { %s44_s23 = sshll.u32 %s4345_s22, 4  ;;  %p4268_p2 = scmp.ne.s32.totalorder %s6609_s2, %s4267_s27  ;;  %s45_s23 = int_to_ptr.vmem [resolvable:$true] %s44_s23 }
  0x26   :  { %p4271_p3 = scmp.lt.u32.totalorder %s4267_s27, %s6609_s2 }
  0x28   :  { %p4273_p4 = pnand %p4271_p3, %p4268_p2 }
  0x2a   :  { %4276 = shalt.err (!%p4273_p4)
}
  0x2b   :  { %s4277_s8 = scalar_lea.vmem %s45_s23, 4096  ;;  %p4282_p6 = scmp.lt.s32.totalorder %s45_s23, %s45_s23 }
  0x2c   :  { %p4278_p5 = scmp.ne.s32.totalorder %s45_s23, %s4277_s8  ;;  %p4283_p7 = scmp.lt.s32.totalorder %s4277_s8, %s4277_s8 }
  0x2e   :  { %p4284_p8 = por %p4283_p7, %p4282_p6 }
  0x30   :  { %p4285_p9 = pnand %p4284_p8, %p4278_p5 }
  0x32   :  { %4288 = shalt.err (!%p4285_p9)
}
  0x33   :  { %s4346_s0 = smov 64   ;;  %s4347_s24 = smov 4  }
  0x34   :  { %50 = dma.hbm_to_vmem [thread:$0]  %s6609_s2, 4096, %s45_s23, [#allocation7], %s4346_s0, %s4346_s0, %s4347_s24  }
  0x35   :  { %s4348_s13 = smov [#allocation9]   ;;  %s4289_s17 = scalar_lea.hbm %s6611_s4, 1024 }
  0x36   :  { %s58_s14 = sshll.u32 %s4348_s13, 4  ;;  %p4290_p10 = scmp.ne.s32.totalorder %s6611_s4, %s4289_s17  ;;  %s59_s14 = int_to_ptr.vmem [resolvable:$true] %s58_s14 }
  0x37   :  { %p4293_p11 = scmp.lt.u32.totalorder %s4289_s17, %s6611_s4 }
  0x39   :  { %p4295_p12 = pnand %p4293_p11, %p4290_p10 }
  0x3b   :  { %4298 = shalt.err (!%p4295_p12)
}
  0x3c   :  { %s4299_s21 = scalar_lea.vmem %s59_s14, 1024  ;;  %p4304_p0 = scmp.lt.s32.totalorder %s59_s14, %s59_s14 }
  0x3d   :  { %p4300_p13 = scmp.ne.s32.totalorder %s59_s14, %s4299_s21  ;;  %p4305_p1 = scmp.lt.s32.totalorder %s4299_s21, %s4299_s21 }
  0x3f   :  { %p4306_p2 = por %p4305_p1, %p4304_p0 }
  0x41   :  { %p4307_p3 = pnand %p4306_p2, %p4300_p13 }
  0x43   :  { %4310 = shalt.err (!%p4307_p3)
}
  0x44   :  { %64 = dma.hbm_to_vmem [thread:$0]  %s6611_s4, 1024, %s59_s14, [#allocation10], %s4346_s0, %s4346_s0, %s4347_s24  }
  0x45   :  { %4333 = dma.done.wait [#allocation4], 512  }
  0x46   :  { %4334 = vsyncadd [#allocation4], 4294966784 }
  0x47   :  { %4335 = dma.done.wait [#allocation7], 4608  }
  0x48   :  { %4336 = vsyncadd [#allocation7], 4294962688 }
  0x49   :  { %4337 = dma.done.wait [#allocation10], 1024  }
  0x4a   :  { %4338 = vsyncadd [#allocation10], 4294966272  ;;  %v4349_v0 = vmov 0   ;;  %v4532_v1 = vld [vmem:[#allocation3 + $0x10] sm:$0xff]  ;;  %v4534_v2 = vld [vmem:[#allocation3] sm:$0xff]  ;;  %v4350_v5 = vmov 5  }
  0x4b   :  { %3867 = vset.pattern.permute.xlu1 %v4349_v0  ;;  %3866 = vset.pattern.permute.xlu0 %v4349_v0  ;;  %v4538_v3 = vld [vmem:[#allocation3 + $0x18] sm:$0xff]  ;;  %v4540_v4 = vld [vmem:[#allocation3 + $0x8] sm:$0xff]  ;;  %v4351_v6 = vmov 10   ;;  %v4352_v7 = vmov 15   ;;  %v4353_v8 = vmov 1   ;;  %v4354_v9 = vmov 6  }
  0x4c   :  { %107 = vperm.xlu1 %3867, %v4532_v1   ;;  %97 = vperm.xlu0 %3866, %v4534_v2   ;;  %v4355_v10 = vmov 11   ;;  %v4356_v11 = vmov 16   ;;  %v4357_v12 = vmov 2   ;;  %v4358_v13 = vmov 7   ;;  %v83_v29 = vld [vmem:[#allocation6] ss:$8 sps:$4 sm:$0xff]  }
  0x4d   :  { %v4359_v14 = vmov 12   ;;  %v4608_v30 = vunpack.c.h.bf16 %v83_v29  ;;  %s4360_s4 = smov 96   ;;  %v4616_v35 = vunpack.c.l.bf16 %v83_v29  ;;  %v85_v36 = vld [vmem:[#allocation6 + $0x10] ss:$8 sps:$4 sm:$0xff]   ;;  %s4364_s23 = smov 32   ;;  %vm827_vm0 = vcmask 261120  }
  0x4e   :  { %v4619_v39 = vunpack.c.l.bf16 %v85_v36  ;;  %v4623_v43 = vunpack.c.h.bf16 %v85_v36  ;;  %vm832_vm1 = vcmask 523264   ;;  %vm837_vm2 = vcmask 785408   ;;  %s4431_s28 = smov [#allocation11]  }
  0x4f   :  { %s3633_s29 = sshll.u32 %s4431_s28, 4  ;;  %s3634_s29 = int_to_ptr.vmem [resolvable:$true] %s3633_s29 }
  0x50   :  { %112 = vperm.xlu1 %3867, %v4538_v3   ;;  %102 = vperm.xlu0 %3866, %v4540_v4   ;;  %s4311_s30 = scalar_lea.vmem %s3634_s29, 512  ;;  %p4316_p5 = scmp.lt.s32.totalorder %s3634_s29, %s3634_s29 }
  0x51   :  { %p4312_p4 = scmp.ne.s32.totalorder %s3634_s29, %s4311_s30  ;;  %p4317_p6 = scmp.lt.s32.totalorder %s4311_s30, %s4311_s30 }
  0x53   :  { %p4318_p7 = por %p4317_p6, %p4316_p5 }
  0x54   :  { %3869 = vset.pattern.permute.xlu1 %v4350_v5  ;;  %3868 = vset.pattern.permute.xlu0 %v4350_v5 }
  0x55   :  { %128 = vperm.xlu1 %3869, %v4540_v4   ;;  %124 = vperm.xlu0 %3868, %v4534_v2   ;;  %p4319_p8 = pnand %p4318_p7, %p4312_p4 }
  0x59   :  { %132 = vperm.xlu1 %3869, %v4532_v1   ;;  %136 = vperm.xlu0 %3868, %v4538_v3  }
  0x5d   :  { %3870 = vset.pattern.permute.xlu1 %v4351_v6  ;;  %3871 = vset.pattern.permute.xlu0 %v4351_v6 }
  0x5e   :  { %148 = vperm.xlu1 %3870, %v4534_v2   ;;  %152 = vperm.xlu0 %3871, %v4540_v4  }
  0x62   :  { %156 = vperm.xlu1 %3870, %v4532_v1   ;;  %3872 = vset.pattern.permute.xlu0 %v4352_v7 }
  0x63   :  { %172 = vperm.xlu0 %3872, %v4534_v2  }
  0x66   :  { %160 = vperm.xlu1 %3870, %v4538_v3  }
  0x67   :  { %184 = vperm.xlu0 %3872, %v4538_v3  }
  0x6a   :  { %3873 = vset.pattern.permute.xlu1 %v4352_v7 }
  0x6b   :  { %176 = vperm.xlu1 %3873, %v4540_v4   ;;  %3875 = vset.pattern.permute.xlu0 %v4353_v8 }
  0x6c   :  { %200 = vperm.xlu0 %3875, %v4540_v4  }
  0x6f   :  { %180 = vperm.xlu1 %3873, %v4532_v1  }
  0x70   :  { %3876 = vset.pattern.permute.xlu0 %v4354_v9 }
  0x71   :  { %236 = vperm.xlu0 %3876, %v4534_v2  }
  0x73   :  { %3874 = vset.pattern.permute.xlu1 %v4353_v8 }
  0x74   :  { %196 = vperm.xlu1 %3874, %v4534_v2  }
  0x75   :  { %248 = vperm.xlu0 %3876, %v4538_v3  }
  0x78   :  { %204 = vperm.xlu1 %3874, %v4532_v1  }
  0x79   :  { %3879 = vset.pattern.permute.xlu0 %v4355_v10 }
  0x7a   :  { %280 = vperm.xlu0 %3879, %v4540_v4  }
  0x7c   :  { %208 = vperm.xlu1 %3874, %v4538_v3  }
  0x7e   :  { %3880 = vset.pattern.permute.xlu0 %v4356_v11 }
  0x7f   :  { %316 = vperm.xlu0 %3880, %v4534_v2  }
  0x80   :  { %3877 = vset.pattern.permute.xlu1 %v4354_v9 }
  0x81   :  { %240 = vperm.xlu1 %3877, %v4540_v4  }
  0x83   :  { %328 = vperm.xlu0 %3880, %v4538_v3  }
  0x85   :  { %244 = vperm.xlu1 %3877, %v4532_v1  }
  0x87   :  { %3883 = vset.pattern.permute.xlu0 %v4357_v12 }
  0x88   :  { %360 = vperm.xlu0 %3883, %v4540_v4  }
  0x89   :  { %3878 = vset.pattern.permute.xlu1 %v4355_v10 }
  0x8a   :  { %276 = vperm.xlu1 %3878, %v4534_v2  }
  0x8c   :  { %3884 = vset.pattern.permute.xlu0 %v4358_v13 }
  0x8d   :  { %396 = vperm.xlu0 %3884, %v4534_v2  }
  0x8e   :  { %284 = vperm.xlu1 %3878, %v4532_v1  }
  0x91   :  { %408 = vperm.xlu0 %3884, %v4538_v3  }
  0x92   :  { %288 = vperm.xlu1 %3878, %v4538_v3  }
  0x95   :  { %3887 = vset.pattern.permute.xlu0 %v4359_v14 }
  0x96   :  { %3881 = vset.pattern.permute.xlu1 %v4356_v11 }
  0x97   :  { %320 = vperm.xlu1 %3881, %v4540_v4  }
  0x9b   :  { %324 = vperm.xlu1 %3881, %v4532_v1  }
  0x9f   :  { %3882 = vset.pattern.permute.xlu1 %v4357_v12 }
  0xa0   :  { %356 = vperm.xlu1 %3882, %v4534_v2  }
  0xa4   :  { %364 = vperm.xlu1 %3882, %v4532_v1  }
  0xa8   :  { %368 = vperm.xlu1 %3882, %v4538_v3  }
  0xac   :  { %3885 = vset.pattern.permute.xlu1 %v4358_v13 }
  0xad   :  { %400 = vperm.xlu1 %3885, %v4540_v4  }
  0xb1   :  { %404 = vperm.xlu1 %3885, %v4532_v1  }
  0xb5   :  { %3886 = vset.pattern.permute.xlu1 %v4359_v14 }
  0xcb   :  { %v4580_v15 = vpop.permute.xlu1 %107  ;;  %v4582_v16 = vpop.permute.xlu0 %97 }
  0xcc   :  { %6665 = vst [vmem:[#allocation16_spill] sm:$0xff] %v4580_v15  ;;  %6666 = vst [vmem:[#allocation17_spill] sm:$0xff] %v4582_v16  ;;  %v4890_v16 = vld [vmem:[#allocation6 + $0x14] sm:$0xff]  }
  0xcf   :  { %v4584_v17 = vpop.permute.xlu1 %112  ;;  %v4586_v18 = vpop.permute.xlu0 %102 }
  0xd0   :  { %6667 = vst [vmem:[#allocation18_spill] sm:$0xff] %v4584_v17  ;;  %6668 = vst [vmem:[#allocation19_spill] sm:$0xff] %v4586_v18 }
  0xd4   :  { %v4588_v19 = vpop.permute.xlu1 %128  ;;  %v4590_v20 = vpop.permute.xlu0 %124 }
  0xd8   :  { %v4592_v21 = vpop.permute.xlu1 %132  ;;  %v4594_v22 = vpop.permute.xlu0 %136 }
  0xd9   :  { %v142_v18 = vmul.f32 %v4594_v22, %v4623_v43 }
  0xdd   :  { %v4596_v23 = vpop.permute.xlu1 %148  ;;  %v4598_v24 = vpop.permute.xlu0 %152 }
  0xe1   :  { %v4600_v25 = vpop.permute.xlu1 %156 }
  0xe2   :  { %v4602_v26 = vpop.permute.xlu0 %172 }
  0xe5   :  { %v4604_v27 = vpop.permute.xlu1 %160 }
  0xe6   :  { %v4606_v28 = vpop.permute.xlu0 %184 }
  0xea   :  { %v4610_v31 = vpop.permute.xlu1 %176 }
  0xeb   :  { %v201_v32 = vpop.permute.xlu0 %200 }
  0xec   :  { %v212_v33 = vmul.f32 %v201_v32, %v4608_v30 }
  0xee   :  { %v4613_v34 = vpop.permute.xlu1 %180  ;;  %221 = vrot.lane.b32.xlu1 %v212_v33, %s4360_s4 }
  0xf0   :  { %v237_v42 = vpop.permute.xlu0 %236 }
  0xf1   :  { %v251_v46 = vmul.f32 %v237_v42, %v4616_v35 }
  0xf3   :  { %v197_v37 = vpop.permute.xlu1 %196 }
  0xf4   :  { %v211_v38 = vmul.f32 %v197_v37, %v4616_v35  ;;  %v249_v47 = vpop.permute.xlu0 %248 }
  0xf5   :  { %v254_v50 = vmul.f32 %v249_v47, %v4623_v43 }
  0xf6   :  { %219 = vrot.lane.b32.xlu0 %v211_v38, %s4360_s4 }
  0xf7   :  { %v205_v40 = vpop.permute.xlu1 %204 }
  0xf8   :  { %v213_v41 = vmul.f32 %v205_v40, %v4619_v39 }
  0xf9   :  { %v281_v52 = vpop.permute.xlu0 %280 }
  0xfa   :  { %223 = vrot.lane.b32.xlu0 %v213_v41, %s4360_s4  ;;  %v292_v54 = vmul.f32 %v281_v52, %v4608_v30 }
  0xfb   :  { %v209_v44 = vpop.permute.xlu1 %208 }
  0xfc   :  { %v214_v45 = vmul.f32 %v209_v44, %v4623_v43 }
  0xfe   :  { %225 = vrot.lane.b32.xlu1 %v214_v45, %s4360_s4  ;;  %v317_v59 = vpop.permute.xlu0 %316  ;;  %v4361_v45 = vmov 17  }
  0xff   :  { %v331_v62 = vmul.f32 %v317_v59, %v4616_v35 }
 0x100   :  { %v241_v48 = vpop.permute.xlu1 %240 }
 0x101   :  { %v252_v49 = vmul.f32 %v241_v48, %v4608_v30 }
 0x102   :  { %259 = vrot.lane.b32.xlu1 %v251_v46, %s4360_s4  ;;  %v329_v63 = vpop.permute.xlu0 %328 }
 0x103   :  { %261 = vrot.lane.b32.xlu0 %v252_v49, %s4360_s4  ;;  %v334_v6 = vmul.f32 %v329_v63, %v4623_v43 }
 0x104   :  { %v245_v51 = vpop.permute.xlu1 %244 }
 0x105   :  { %v253_v53 = vmul.f32 %v245_v51, %v4619_v39 }
 0x107   :  { %263 = vrot.lane.b32.xlu1 %v253_v53, %s4360_s4  ;;  %265 = vrot.lane.b32.xlu0 %v254_v50, %s4360_s4  ;;  %v361_v8 = vpop.permute.xlu0 %360 }
 0x108   :  { %v372_v10 = vmul.f32 %v361_v8, %v4608_v30 }
 0x109   :  { %v277_v55 = vpop.permute.xlu1 %276 }
 0x10a   :  { %v291_v56 = vmul.f32 %v277_v55, %v4616_v35 }
 0x10b   :  { %301 = vrot.lane.b32.xlu1 %v292_v54, %s4360_s4 }
 0x10c   :  { %299 = vrot.lane.b32.xlu0 %v291_v56, %s4360_s4  ;;  %v397_v32 = vpop.permute.xlu0 %396 }
 0x10d   :  { %v285_v57 = vpop.permute.xlu1 %284  ;;  %v411_v36 = vmul.f32 %v397_v32, %v4616_v35 }
 0x10e   :  { %v293_v58 = vmul.f32 %v285_v57, %v4619_v39 }
 0x110   :  { %303 = vrot.lane.b32.xlu0 %v293_v58, %s4360_s4  ;;  %v409_v40 = vpop.permute.xlu0 %408 }
 0x111   :  { %v289_v60 = vpop.permute.xlu1 %288  ;;  %v414_v44 = vmul.f32 %v409_v40, %v4623_v43 }
 0x112   :  { %v294_v61 = vmul.f32 %v289_v60, %v4623_v43 }
 0x114   :  { %305 = vrot.lane.b32.xlu1 %v294_v61, %s4360_s4 }
 0x116   :  { %v321_v0 = vpop.permute.xlu1 %320 }
 0x117   :  { %v332_v5 = vmul.f32 %v321_v0, %v4608_v30 }
 0x118   :  { %339 = vrot.lane.b32.xlu1 %v331_v62, %s4360_s4 }
 0x119   :  { %341 = vrot.lane.b32.xlu0 %v332_v5, %s4360_s4 }
 0x11a   :  { %v325_v7 = vpop.permute.xlu1 %324 }
 0x11b   :  { %v333_v9 = vmul.f32 %v325_v7, %v4619_v39 }
 0x11d   :  { %343 = vrot.lane.b32.xlu1 %v333_v9, %s4360_s4  ;;  %345 = vrot.lane.b32.xlu0 %v334_v6, %s4360_s4 }
 0x11f   :  { %v357_v11 = vpop.permute.xlu1 %356 }
 0x120   :  { %v371_v12 = vmul.f32 %v357_v11, %v4616_v35 }
 0x121   :  { %381 = vrot.lane.b32.xlu1 %v372_v10, %s4346_s0 }
 0x122   :  { %379 = vrot.lane.b32.xlu0 %v371_v12, %s4346_s0 }
 0x123   :  { %v365_v13 = vpop.permute.xlu1 %364 }
 0x124   :  { %v373_v14 = vmul.f32 %v365_v13, %v4619_v39 }
 0x126   :  { %383 = vrot.lane.b32.xlu0 %v373_v14, %s4346_s0 }
 0x127   :  { %v369_v29 = vpop.permute.xlu1 %368 }
 0x128   :  { %v374_v33 = vmul.f32 %v369_v29, %v4623_v43 }
 0x12a   :  { %385 = vrot.lane.b32.xlu1 %v374_v33, %s4346_s0 }
 0x12c   :  { %v401_v37 = vpop.permute.xlu1 %400 }
 0x12d   :  { %v412_v38 = vmul.f32 %v401_v37, %v4608_v30 }
 0x12e   :  { %419 = vrot.lane.b32.xlu1 %v411_v36, %s4346_s0  ;;  %v4362_v36 = vmov 3  }
 0x12f   :  { %421 = vrot.lane.b32.xlu0 %v412_v38, %s4346_s0 }
 0x130   :  { %v405_v41 = vpop.permute.xlu1 %404 }
 0x131   :  { %v413_v42 = vmul.f32 %v405_v41, %v4619_v39 }
 0x133   :  { %423 = vrot.lane.b32.xlu1 %v413_v42, %s4346_s0  ;;  %425 = vrot.lane.b32.xlu0 %v414_v44, %s4346_s0 }
 0x137   :  { %436 = vperm.xlu1 %3886, %v4534_v2   ;;  %440 = vperm.xlu0 %3887, %v4540_v4  }
 0x13b   :  { %444 = vperm.xlu1 %3886, %v4532_v1   ;;  %3888 = vset.pattern.permute.xlu0 %v4361_v45 }
 0x13f   :  { %448 = vperm.xlu1 %3886, %v4538_v3  }
 0x143   :  { %3889 = vset.pattern.permute.xlu1 %v4361_v45 }
 0x160   :  { %v4672_v46 = vpop.permute.xlu1 %221 }
 0x161   :  { %6669 = vst [vmem:[#allocation20_spill] sm:$0xff] %v4672_v46  ;;  %v4867_v46 = vld [vmem:[#allocation6 + $0xc] sm:$0xff]  }
 0x162   :  { %6686 = vst [vmem:[#allocation37_spill] sm:$0xff] %v4867_v46 }
 0x168   :  { %v4674_v47 = vpop.permute.xlu0 %219 }
 0x169   :  { %6670 = vst [vmem:[#allocation21_spill] sm:$0xff] %v4674_v47 }
 0x16c   :  { %v4678_v49 = vpop.permute.xlu0 %223 }
 0x16d   :  { %6672 = vst [vmem:[#allocation23_spill] sm:$0xff] %v4678_v49 }
 0x170   :  { %v4676_v48 = vpop.permute.xlu1 %225 }
 0x171   :  { %6671 = vst [vmem:[#allocation22_spill] sm:$0xff] %v4676_v48 }
 0x174   :  { %v4680_v50 = vpop.permute.xlu1 %259 }
 0x175   :  { %v4682_v51 = vpop.permute.xlu0 %261 }
 0x179   :  { %v4684_v52 = vpop.permute.xlu1 %263  ;;  %v4686_v53 = vpop.permute.xlu0 %265 }
 0x17d   :  { %v4688_v54 = vpop.permute.xlu1 %301 }
 0x17e   :  { %v4690_v55 = vpop.permute.xlu0 %299 }
 0x182   :  { %v4694_v57 = vpop.permute.xlu0 %303 }
 0x186   :  { %v4692_v56 = vpop.permute.xlu1 %305 }
 0x18a   :  { %v4696_v58 = vpop.permute.xlu1 %339 }
 0x18b   :  { %v4698_v59 = vpop.permute.xlu0 %341 }
 0x18f   :  { %v4700_v60 = vpop.permute.xlu1 %343  ;;  %v4702_v61 = vpop.permute.xlu0 %345 }
 0x193   :  { %v4704_v62 = vpop.permute.xlu1 %381 }
 0x194   :  { %6673 = vst [vmem:[#allocation24_spill] sm:$0xff] %v4704_v62  ;;  %v4706_v63 = vpop.permute.xlu0 %379 }
 0x195   :  { %6674 = vst [vmem:[#allocation25_spill] sm:$0xff] %v4706_v63 }
 0x198   :  { %v4710_v5 = vpop.permute.xlu0 %383 }
 0x199   :  { %6676 = vst [vmem:[#allocation27_spill] sm:$0xff] %v4710_v5 }
 0x19c   :  { %v4708_v0 = vpop.permute.xlu1 %385 }
 0x19d   :  { %6675 = vst [vmem:[#allocation26_spill] sm:$0xff] %v4708_v0 }
 0x1a0   :  { %v4712_v6 = vpop.permute.xlu1 %419 }
 0x1a1   :  { %v4714_v7 = vpop.permute.xlu0 %421 }
 0x1a5   :  { %v4716_v8 = vpop.permute.xlu1 %423  ;;  %v4718_v9 = vpop.permute.xlu0 %425 }
 0x1b6   :  { %v437_v10 = vpop.permute.xlu1 %436  ;;  %v441_v11 = vpop.permute.xlu0 %440 }
 0x1b7   :  { %v451_v12 = vmul.f32 %v437_v10, %v4616_v35  ;;  %v452_v13 = vmul.f32 %v441_v11, %v4608_v30 }
 0x1b9   :  { %459 = vrot.lane.b32.xlu0 %v451_v12, %s4346_s0  ;;  %461 = vrot.lane.b32.xlu1 %v452_v13, %s4346_s0 }
 0x1ba   :  { %v445_v14 = vpop.permute.xlu1 %444 }
 0x1bb   :  { %v453_v29 = vmul.f32 %v445_v14, %v4619_v39 }
 0x1bd   :  { %463 = vrot.lane.b32.xlu0 %v453_v29, %s4346_s0  ;;  %v4363_v29 = vmov 8  }
 0x1be   :  { %v449_v32 = vpop.permute.xlu1 %448 }
 0x1bf   :  { %v454_v33 = vmul.f32 %v449_v32, %v4623_v43 }
 0x1c1   :  { %476 = vperm.xlu0 %3888, %v4534_v2   ;;  %465 = vrot.lane.b32.xlu1 %v454_v33, %s4346_s0 }
 0x1c5   :  { %488 = vperm.xlu0 %3888, %v4538_v3   ;;  %480 = vperm.xlu1 %3889, %v4540_v4  }
 0x1c9   :  { %484 = vperm.xlu1 %3889, %v4532_v1   ;;  %3891 = vset.pattern.permute.xlu0 %v4362_v36 }
 0x1cd   :  { %3890 = vset.pattern.permute.xlu1 %v4362_v36 }
 0x22b   :  { %v4732_v37 = vpop.permute.xlu0 %459  ;;  %v4734_v38 = vpop.permute.xlu1 %461 }
 0x22f   :  { %v4736_v40 = vpop.permute.xlu0 %463 }
 0x233   :  { %v4738_v41 = vpop.permute.xlu1 %465 }
 0x240   :  { %v477_v42 = vpop.permute.xlu0 %476 }
 0x241   :  { %v491_v44 = vmul.f32 %v477_v42, %v4616_v35 }
 0x243   :  { %499 = vrot.lane.b32.xlu1 %v491_v44, %s4346_s0 }
 0x244   :  { %v481_v45 = vpop.permute.xlu1 %480  ;;  %v489_v11 = vpop.permute.xlu0 %488 }
 0x245   :  { %v492_v10 = vmul.f32 %v481_v45, %v4608_v30  ;;  %v494_v14 = vmul.f32 %v489_v11, %v4623_v43 }
 0x247   :  { %501 = vrot.lane.b32.xlu0 %v492_v10, %s4346_s0 }
 0x248   :  { %v485_v12 = vpop.permute.xlu1 %484 }
 0x249   :  { %v493_v13 = vmul.f32 %v485_v12, %v4619_v39 }
 0x24b   :  { %503 = vrot.lane.b32.xlu1 %v493_v13, %s4346_s0  ;;  %505 = vrot.lane.b32.xlu0 %v494_v14, %s4346_s0 }
 0x24f   :  { %516 = vperm.xlu1 %3890, %v4534_v2   ;;  %520 = vperm.xlu0 %3891, %v4540_v4  }
 0x253   :  { %524 = vperm.xlu1 %3890, %v4532_v1   ;;  %3892 = vset.pattern.permute.xlu0 %v4363_v29 }
 0x257   :  { %528 = vperm.xlu1 %3890, %v4538_v3  }
 0x25b   :  { %3893 = vset.pattern.permute.xlu1 %v4363_v29 }
 0x2b5   :  { %v4754_v33 = vpop.permute.xlu1 %499 }
 0x2b9   :  { %v4752_v32 = vpop.permute.xlu0 %501 }
 0x2bd   :  { %v4756_v36 = vpop.permute.xlu1 %503  ;;  %v4758_v42 = vpop.permute.xlu0 %505 }
 0x2ce   :  { %v517_v44 = vpop.permute.xlu1 %516  ;;  %v521_v45 = vpop.permute.xlu0 %520 }
 0x2cf   :  { %v531_v10 = vmul.f32 %v517_v44, %v4616_v35  ;;  %v532_v11 = vmul.f32 %v521_v45, %v4608_v30  ;;  %v4365_v44 = vmov 13  }
 0x2d1   :  { %539 = vrot.lane.b32.xlu0 %v531_v10, %s4364_s23  ;;  %541 = vrot.lane.b32.xlu1 %v532_v11, %s4364_s23 }
 0x2d2   :  { %v525_v12 = vpop.permute.xlu1 %524 }
 0x2d3   :  { %v533_v13 = vmul.f32 %v525_v12, %v4619_v39 }
 0x2d5   :  { %543 = vrot.lane.b32.xlu0 %v533_v13, %s4364_s23 }
 0x2d6   :  { %v529_v14 = vpop.permute.xlu1 %528 }
 0x2d7   :  { %v534_v29 = vmul.f32 %v529_v14, %v4623_v43 }
 0x2d9   :  { %556 = vperm.xlu0 %3892, %v4534_v2   ;;  %545 = vrot.lane.b32.xlu1 %v534_v29, %s4364_s23 }
 0x2dd   :  { %568 = vperm.xlu0 %3892, %v4538_v3   ;;  %560 = vperm.xlu1 %3893, %v4540_v4  }
 0x2e1   :  { %564 = vperm.xlu1 %3893, %v4532_v1   ;;  %3895 = vset.pattern.permute.xlu0 %v4365_v44 }
 0x2e5   :  { %3894 = vset.pattern.permute.xlu1 %v4365_v44 }
 0x343   :  { %v4772_v45 = vpop.permute.xlu0 %539  ;;  %v4774_v10 = vpop.permute.xlu1 %541 }
 0x344   :  { %6677 = vst [vmem:[#allocation28_spill] sm:$0xff] %v4772_v45  ;;  %6678 = vst [vmem:[#allocation29_spill] sm:$0xff] %v4774_v10 }
 0x347   :  { %v4776_v11 = vpop.permute.xlu0 %543 }
 0x348   :  { %6679 = vst [vmem:[#allocation30_spill] sm:$0xff] %v4776_v11 }
 0x34b   :  { %v4778_v12 = vpop.permute.xlu1 %545 }
 0x34c   :  { %6680 = vst [vmem:[#allocation31_spill] sm:$0xff] %v4778_v12 }
 0x358   :  { %v557_v13 = vpop.permute.xlu0 %556 }
 0x359   :  { %v571_v14 = vmul.f32 %v557_v13, %v4616_v35  ;;  %v4366_v13 = vmov 18  }
 0x35b   :  { %579 = vrot.lane.b32.xlu1 %v571_v14, %s4364_s23 }
 0x35c   :  { %v561_v29 = vpop.permute.xlu1 %560  ;;  %v569_v5 = vpop.permute.xlu0 %568 }
 0x35d   :  { %v572_v0 = vmul.f32 %v561_v29, %v4608_v30  ;;  %v574_v45 = vmul.f32 %v569_v5, %v4623_v43 }
 0x35f   :  { %581 = vrot.lane.b32.xlu0 %v572_v0, %s4364_s23 }
 0x360   :  { %v565_v44 = vpop.permute.xlu1 %564 }
 0x361   :  { %v573_v10 = vmul.f32 %v565_v44, %v4619_v39 }
 0x363   :  { %583 = vrot.lane.b32.xlu1 %v573_v10, %s4364_s23  ;;  %585 = vrot.lane.b32.xlu0 %v574_v45, %s4364_s23 }
 0x367   :  { %596 = vperm.xlu1 %3894, %v4534_v2   ;;  %600 = vperm.xlu0 %3895, %v4540_v4  }
 0x36b   :  { %604 = vperm.xlu1 %3894, %v4532_v1   ;;  %3896 = vset.pattern.permute.xlu0 %v4366_v13 }
 0x36f   :  { %608 = vperm.xlu1 %3894, %v4538_v3  }
 0x373   :  { %3897 = vset.pattern.permute.xlu1 %v4366_v13 }
 0x3cd   :  { %v4794_v5 = vpop.permute.xlu1 %579 }
 0x3d1   :  { %v4792_v0 = vpop.permute.xlu0 %581 }
 0x3d5   :  { %v4796_v14 = vpop.permute.xlu1 %583  ;;  %v4798_v10 = vpop.permute.xlu0 %585 }
 0x3e6   :  { %v597_v45 = vpop.permute.xlu1 %596  ;;  %v601_v29 = vpop.permute.xlu0 %600 }
 0x3e7   :  { %v611_v44 = vmul.f32 %v597_v45, %v4616_v35  ;;  %v612_v12 = vmul.f32 %v601_v29, %v4608_v30  ;;  %v4367_v45 = vmov 4  }
 0x3e9   :  { %619 = vrot.lane.b32.xlu0 %v611_v44, %s4364_s23  ;;  %621 = vrot.lane.b32.xlu1 %v612_v12, %s4364_s23 }
 0x3ea   :  { %v605_v11 = vpop.permute.xlu1 %604 }
 0x3eb   :  { %v613_v13 = vmul.f32 %v605_v11, %v4619_v39 }
 0x3ed   :  { %623 = vrot.lane.b32.xlu0 %v613_v13, %s4364_s23 }
 0x3ee   :  { %v609_v48 = vpop.permute.xlu1 %608 }
 0x3ef   :  { %v614_v49 = vmul.f32 %v609_v48, %v4623_v43 }
 0x3f1   :  { %636 = vperm.xlu0 %3896, %v4534_v2   ;;  %625 = vrot.lane.b32.xlu1 %v614_v49, %s4364_s23 }
 0x3f5   :  { %648 = vperm.xlu0 %3896, %v4538_v3   ;;  %640 = vperm.xlu1 %3897, %v4540_v4  }
 0x3f9   :  { %644 = vperm.xlu1 %3897, %v4532_v1   ;;  %3899 = vset.pattern.permute.xlu0 %v4367_v45 }
 0x3fd   :  { %3898 = vset.pattern.permute.xlu1 %v4367_v45 }
 0x45b   :  { %v4812_v12 = vpop.permute.xlu0 %619  ;;  %v4814_v11 = vpop.permute.xlu1 %621 }
 0x45f   :  { %v4816_v29 = vpop.permute.xlu0 %623 }
 0x463   :  { %v4818_v48 = vpop.permute.xlu1 %625 }
 0x470   :  { %v637_v44 = vpop.permute.xlu0 %636 }
 0x471   :  { %v651_v49 = vmul.f32 %v637_v44, %v4616_v35  ;;  %v4368_v44 = vmov 9  }
 0x473   :  { %659 = vrot.lane.b32.xlu1 %v651_v49, %s4364_s23 }
 0x474   :  { %v641_v13 = vpop.permute.xlu1 %640  ;;  %v649_v62 = vpop.permute.xlu0 %648 }
 0x475   :  { %v652_v63 = vmul.f32 %v641_v13, %v4608_v30  ;;  %v654_v17 = vmul.f32 %v649_v62, %v4623_v43  ;;  %v4371_v62 = vmov 20  }
 0x477   :  { %661 = vrot.lane.b32.xlu0 %v652_v63, %s4364_s23 }
 0x478   :  { %v645_v45 = vpop.permute.xlu1 %644 }
 0x479   :  { %v653_v15 = vmul.f32 %v645_v45, %v4619_v39 }
 0x47b   :  { %663 = vrot.lane.b32.xlu1 %v653_v15, %s4364_s23  ;;  %665 = vrot.lane.b32.xlu0 %v654_v17, %s4364_s23  ;;  %v4369_v15 = vmov 14   ;;  %v4370_v17 = vmov 19  }
 0x47f   :  { %684 = vperm.xlu1 %3898, %v4534_v2   ;;  %688 = vperm.xlu0 %3899, %v4540_v4  }
 0x483   :  { %692 = vperm.xlu1 %3898, %v4532_v1   ;;  %3900 = vset.pattern.permute.xlu0 %v4368_v44 }
 0x484   :  { %708 = vperm.xlu0 %3900, %v4534_v2  }
 0x487   :  { %696 = vperm.xlu1 %3898, %v4538_v3  }
 0x488   :  { %720 = vperm.xlu0 %3900, %v4538_v3  }
 0x48b   :  { %3901 = vset.pattern.permute.xlu1 %v4368_v44 }
 0x48c   :  { %712 = vperm.xlu1 %3901, %v4540_v4   ;;  %3903 = vset.pattern.permute.xlu0 %v4369_v15 }
 0x48d   :  { %736 = vperm.xlu0 %3903, %v4540_v4  }
 0x490   :  { %716 = vperm.xlu1 %3901, %v4532_v1  }
 0x491   :  { %3904 = vset.pattern.permute.xlu0 %v4370_v17 }
 0x492   :  { %756 = vperm.xlu0 %3904, %v4534_v2  }
 0x494   :  { %3902 = vset.pattern.permute.xlu1 %v4369_v15  ;;  %v4860_v15 = vld [vmem:[#allocation6 + $0x4] sm:$0xff]  }
 0x495   :  { %732 = vperm.xlu1 %3902, %v4534_v2   ;;  %6684 = vst [vmem:[#allocation35_spill] sm:$0xff] %v4860_v15 }
 0x496   :  { %768 = vperm.xlu0 %3904, %v4538_v3  }
 0x499   :  { %740 = vperm.xlu1 %3902, %v4532_v1  }
 0x49a   :  { %3937 = vset.pattern.permute.xlu0 %v4371_v62 }
 0x49d   :  { %744 = vperm.xlu1 %3902, %v4538_v3  }
 0x4a1   :  { %3905 = vset.pattern.permute.xlu1 %v4370_v17  ;;  %v140_v17 = vmul.f32 %v4588_v19, %v4608_v30 }
 0x4a2   :  { %760 = vperm.xlu1 %3905, %v4540_v4  }
 0x4a6   :  { %764 = vperm.xlu1 %3905, %v4532_v1   ;;  %v139_v1 = vmul.f32 %v4590_v20, %v4616_v35  ;;  %v141_v20 = vmul.f32 %v4592_v21, %v4619_v39  ;;  %v274_v21 = vadd.f32 %v4686_v53, %v142_v18  ;;  %v163_v53 = vmul.f32 %v4596_v23, %v4616_v35 }
 0x4a8   :  { %v271_v47 = vadd.f32 %v4680_v50, %v139_v1  ;;  %v4882_v50 = vunpack.c.l.bf16 %v4867_v46  ;;  %v4898_v46 = vunpack.c.l.bf16 %v4890_v16 }
 0x4aa   :  { %3936 = vset.pattern.permute.xlu1 %v4371_v62  ;;  %v431_v19 = vadd.f32 %v4712_v6, %v271_v47 }
 0x4ac   :  { %v591_v47 = vadd.f32 %v4794_v5, %v431_v19  ;;  %v164_v5 = vmul.f32 %v4598_v24, %v4608_v30 }
 0x4ae   :  { %v312_v19 = vadd.f32 %v4688_v54, %v164_v5 }
 0x4b0   :  { %v472_v23 = vadd.f32 %v4734_v38, %v312_v19  ;;  %v166_v38 = vmul.f32 %v4604_v27, %v4623_v43  ;;  %v188_v27 = vmul.f32 %v4610_v31, %v4608_v30 }
 0x4e5   :  { %v4846_v49 = vpop.permute.xlu1 %659 }
 0x4e9   :  { %v4844_v63 = vpop.permute.xlu0 %661 }
 0x4ed   :  { %v4848_v13 = vpop.permute.xlu1 %663  ;;  %v4850_v2 = vpop.permute.xlu0 %665 }
 0x4fe   :  { %v4852_v45 = vpop.permute.xlu1 %684  ;;  %v4854_v44 = vpop.permute.xlu0 %688 }
 0x4ff   :  { %6681 = vst [vmem:[#allocation32_spill] sm:$0xff] %v4852_v45  ;;  %6682 = vst [vmem:[#allocation33_spill] sm:$0xff] %v4854_v44  ;;  %v4869_v45 = vld [vmem:[#allocation6] ss:$28 sps:$4 sm:$0xff]   ;;  %v272_v44 = vadd.f32 %v4682_v51, %v140_v17 }
 0x500   :  { %6687 = vst [vmem:[#allocation38_spill] sm:$0xff] %v4869_v45  ;;  %v4886_v51 = vunpack.c.h.bf16 %v4869_v45 }
 0x502   :  { %v4856_v3 = vpop.permute.xlu1 %692 }
 0x503   :  { %6683 = vst [vmem:[#allocation34_spill] sm:$0xff] %v4856_v3  ;;  %v709_v4 = vpop.permute.xlu0 %708  ;;  %v4873_v3 = vunpack.c.l.bf16 %v4860_v15  ;;  %v273_v15 = vadd.f32 %v4684_v52, %v141_v20 }
 0x505   :  { %v723_v1 = vmul.f32 %v709_v4, %v4873_v3  ;;  %v434_v4 = vadd.f32 %v4718_v9, %v274_v21 }
 0x506   :  { %v4864_v62 = vpop.permute.xlu1 %696 }
 0x507   :  { %6685 = vst [vmem:[#allocation36_spill] sm:$0xff] %v4864_v62  ;;  %v432_v62 = vadd.f32 %v4714_v7, %v272_v44  ;;  %v721_v17 = vpop.permute.xlu0 %720  ;;  %v433_v44 = vadd.f32 %v4716_v8, %v273_v15  ;;  %v727_v45 = vadd.f32 %v723_v1, %v591_v47  ;;  %v594_v8 = vadd.f32 %v4798_v10, %v434_v4 }
 0x508   :  { %v726_v52 = vmul.f32 %v721_v17, %v4886_v51  ;;  %v311_v1 = vadd.f32 %v4690_v55, %v163_v53  ;;  %v165_v55 = vmul.f32 %v4600_v25, %v4619_v39  ;;  %v314_v4 = vadd.f32 %v4692_v56, %v166_v38 }
 0x509   :  { %v592_v6 = vadd.f32 %v4792_v0, %v432_v62  ;;  %v593_v62 = vadd.f32 %v4796_v14, %v433_v44  ;;  %v187_v25 = vmul.f32 %v4602_v26, %v4616_v35  ;;  %v190_v26 = vmul.f32 %v4606_v28, %v4623_v43 }
 0x50a   :  { %v730_v17 = vadd.f32 %v726_v52, %v594_v8  ;;  %v471_v24 = vadd.f32 %v4732_v37, %v311_v1  ;;  %v313_v44 = vadd.f32 %v4694_v57, %v165_v55  ;;  %v474_v52 = vadd.f32 %v4738_v41, %v314_v4 }
 0x50b   :  { %v713_v22 = vpop.permute.xlu1 %712  ;;  %v351_v41 = vadd.f32 %v4696_v58, %v187_v25  ;;  %v4375_v55 = vmov 21   ;;  %v4376_v38 = vmov 26  }
 0x50c   :  { %v724_v7 = vmul.f32 %v713_v22, %v4882_v50  ;;  %v737_v9 = vpop.permute.xlu0 %736  ;;  %v631_v47 = vadd.f32 %v4812_v12, %v471_v24  ;;  %v473_v12 = vadd.f32 %v4736_v40, %v313_v44  ;;  %v634_v56 = vadd.f32 %v4818_v48, %v474_v52  ;;  %v6691_v52 = vld [vmem:[#allocation21_spill] sm:$0xff] }
 0x50d   :  { %v748_v14 = vmul.f32 %v737_v9, %v4882_v50  ;;  %v511_v31 = vadd.f32 %v4754_v33, %v351_v41 }
 0x50e   :  { %v728_v18 = vadd.f32 %v724_v7, %v592_v6  ;;  %v633_v57 = vadd.f32 %v4816_v29, %v473_v12 }
 0x50f   :  { %v717_v0 = vpop.permute.xlu1 %716 }
 0x510   :  { %v3906_v15 = vpack.i.bf16 %v728_v18, %v727_v45  ;;  %v725_v20 = vmul.f32 %v717_v0, %v4898_v46  ;;  %v632_v45 = vadd.f32 %v4814_v11, %v472_v23  ;;  %v352_v0 = vadd.f32 %v4698_v59, %v188_v27  ;;  %v6693_v27 = vld [vmem:[#allocation18_spill] sm:$0xff] }
 0x511   :  { %v757_v18 = vpop.permute.xlu0 %756  ;;  %v354_v59 = vadd.f32 %v4702_v61, %v190_v26  ;;  %v6699_v26 = vld [vmem:[#allocation22_spill] sm:$0xff] }
 0x512   :  { %v729_v21 = vadd.f32 %v725_v20, %v593_v62  ;;  %3907 = vrot.lane.b32.xlu1 %v3906_v15, %s4364_s23  ;;  %v752_v6 = vadd.f32 %v748_v14, %v632_v45  ;;  %v189_v62 = vmul.f32 %v4613_v34, %v4619_v39  ;;  %v512_v29 = vadd.f32 %v4752_v32, %v352_v0  ;;  %v4967_v45 = vld [vmem:[#allocation3 + $0x18] sm:$0xff] }
 0x513   :  { %v771_v48 = vmul.f32 %v757_v18, %v4873_v3  ;;  %v671_v34 = vadd.f32 %v4846_v49, %v511_v31  ;;  %v514_v32 = vadd.f32 %v4758_v42, %v354_v59  ;;  %v4958_v42 = vld [vmem:[#allocation3] sm:$0xff]  ;;  %v6702_v59 = vld [vmem:[#allocation27_spill] sm:$0xff] }
 0x514   :  { %v3911_v22 = vpack.i.bf16 %v730_v17, %v729_v21  ;;  %v733_v10 = vpop.permute.xlu1 %732  ;;  %v353_v9 = vadd.f32 %v4700_v60, %v189_v62  ;;  %v672_v1 = vadd.f32 %v4844_v63, %v512_v29 }
 0x515   :  { %v747_v54 = vmul.f32 %v733_v10, %v4873_v3  ;;  %v769_v20 = vpop.permute.xlu0 %768  ;;  %v775_v33 = vadd.f32 %v771_v48, %v671_v34  ;;  %v674_v61 = vadd.f32 %v4850_v2, %v514_v32  ;;  %v4961_v10 = vld [vmem:[#allocation3 + $0x8] sm:$0xff]  ;;  %v4372_v2 = vmov 25  }
 0x516   :  { %3912 = vrot.lane.b32.xlu0 %v3911_v22, %s4364_s23  ;;  %v513_v28 = vadd.f32 %v4756_v36, %v353_v9  ;;  %v774_v60 = vmul.f32 %v769_v20, %v4886_v51  ;;  %v6701_v20 = vld [vmem:[#allocation28_spill] sm:$0xff] }
 0x517   :  { %v751_v37 = vadd.f32 %v747_v54, %v631_v47  ;;  %v4373_v47 = vmov 30   ;;  %v4374_v54 = vmov 35  }
 0x518   :  { %v741_v7 = vpop.permute.xlu1 %740  ;;  %v673_v24 = vadd.f32 %v4848_v13, %v513_v28  ;;  %v778_v14 = vadd.f32 %v774_v60, %v674_v61  ;;  %v4964_v13 = vld [vmem:[#allocation3 + $0x10] sm:$0xff] }
 0x519   :  { %v3916_v11 = vpack.i.bf16 %v752_v6, %v751_v37  ;;  %v749_v53 = vmul.f32 %v741_v7, %v4898_v46  ;;  %v6688_v6 = vld [vmem:[#allocation17_spill] sm:$0xff]  ;;  %v6689_v7 = vld [vmem:[#allocation19_spill] sm:$0xff] }
 0x51a   :  { %v115_v37 = vmul.f32 %v6688_v6, %v4616_v35  ;;  %v116_v44 = vmul.f32 %v6689_v7, %v4608_v30  ;;  %v6696_v35 = vld [vmem:[#allocation32_spill] sm:$0xff]  ;;  %v6697_v30 = vld [vmem:[#allocation33_spill] sm:$0xff] }
 0x51b   :  { %3917 = vrot.lane.b32.xlu1 %v3916_v11, %s4346_s0  ;;  %v753_v8 = vadd.f32 %v749_v53, %v633_v57  ;;  %v6690_v11 = vld [vmem:[#allocation20_spill] sm:$0xff]  ;;  %v699_v0 = vmul.f32 %v6696_v35, %v4873_v3  ;;  %v700_v62 = vmul.f32 %v6697_v30, %v4882_v50 }
 0x51c   :  { %v745_v5 = vpop.permute.xlu1 %744  ;;  %v232_v12 = vadd.f32 %v6690_v11, %v116_v44  ;;  %v231_v18 = vadd.f32 %v6691_v52, %v115_v37  ;;  %v6692_v53 = vld [vmem:[#allocation16_spill] sm:$0xff] }
 0x51d   :  { %v750_v40 = vmul.f32 %v745_v5, %v4886_v51  ;;  %v117_v25 = vmul.f32 %v6692_v53, %v4619_v39  ;;  %v118_v5 = vmul.f32 %v6693_v27, %v4623_v43  ;;  %v6694_v57 = vld [vmem:[#allocation24_spill] sm:$0xff]  ;;  %v6700_v39 = vld [vmem:[#allocation29_spill] sm:$0xff] }
 0x51f   :  { %v754_v15 = vadd.f32 %v750_v40, %v634_v56  ;;  %v392_v56 = vadd.f32 %v6694_v57, %v232_v12  ;;  %v6695_v40 = vld [vmem:[#allocation25_spill] sm:$0xff]  ;;  %v234_v31 = vadd.f32 %v6699_v26, %v118_v5 }
 0x520   :  { %v391_v41 = vadd.f32 %v6695_v40, %v231_v18 }
 0x521   :  { %v761_v58 = vpop.permute.xlu1 %760  ;;  %v3921_v19 = vpack.i.bf16 %v754_v15, %v753_v8  ;;  %v6698_v8 = vld [vmem:[#allocation23_spill] sm:$0xff]  ;;  %v552_v9 = vadd.f32 %v6700_v39, %v392_v56 }
 0x522   :  { %v772_v17 = vmul.f32 %v761_v58, %v4882_v50  ;;  %v233_v15 = vadd.f32 %v6698_v8, %v117_v25  ;;  %v551_v43 = vadd.f32 %v6701_v20, %v391_v41 }
 0x523   :  { %3922 = vrot.lane.b32.xlu0 %v3921_v19, %s4346_s0  ;;  %v704_v28 = vadd.f32 %v700_v62, %v552_v9 }
 0x524   :  { %v776_v21 = vadd.f32 %v772_v17, %v672_v1  ;;  %v393_v34 = vadd.f32 %v6702_v59, %v233_v15  ;;  %v6703_v1 = vld [vmem:[#allocation26_spill] sm:$0xff]  ;;  %v703_v3 = vadd.f32 %v699_v0, %v551_v43 }
 0x525   :  { %v765_v23 = vpop.permute.xlu1 %764  ;;  %v394_v17 = vadd.f32 %v6703_v1, %v234_v31 }
 0x526   :  { %v3926_v49 = vpack.i.bf16 %v776_v21, %v775_v33  ;;  %v773_v63 = vmul.f32 %v765_v23, %v4898_v46  ;;  %v6704_v33 = vld [vmem:[#allocation30_spill] sm:$0xff] }
 0x527   :  { %v553_v60 = vadd.f32 %v6704_v33, %v393_v34  ;;  %v6705_v21 = vld [vmem:[#allocation34_spill] sm:$0xff]  ;;  %v6718_v33 = vld [vmem:[#allocation37_spill] sm:$0xff] }
 0x528   :  { %v777_v22 = vadd.f32 %v773_v63, %v673_v24  ;;  %3927 = vrot.lane.b32.xlu1 %v3926_v49, %s4360_s4  ;;  %v701_v23 = vmul.f32 %v6705_v21, %v4898_v46  ;;  %v6706_v24 = vld [vmem:[#allocation36_spill] sm:$0xff]  ;;  %v6707_v63 = vld [vmem:[#allocation31_spill] sm:$0xff] }
 0x529   :  { %v702_v61 = vmul.f32 %v6706_v24, %v4886_v51  ;;  %v5085_v24 = vunpack.c.h.bf16 %v4890_v16 }
 0x52a   :  { %v3931_v36 = vpack.i.bf16 %v778_v14, %v777_v22  ;;  %v554_v14 = vadd.f32 %v6707_v63, %v394_v17  ;;  %v705_v7 = vadd.f32 %v701_v23, %v553_v60  ;;  %v5080_v60 = vunpack.c.h.bf16 %v6718_v33 }
 0x52b   :  { %v4377_v63 = vmov 31  }
 0x52c   :  { %3932 = vrot.lane.b32.xlu0 %v3931_v36, %s4360_s4  ;;  %863 = vperm.xlu1 %3936, %v4958_v42   ;;  %v706_v44 = vadd.f32 %v702_v61, %v554_v14 }
 0x530   :  { %868 = vperm.xlu0 %3937, %v4961_v10   ;;  %873 = vperm.xlu1 %3936, %v4964_v13  }
 0x534   :  { %3938 = vset.pattern.permute.xlu0 %v4372_v2  ;;  %878 = vperm.xlu1 %3936, %v4967_v45  }
 0x535   :  { %890 = vperm.xlu0 %3938, %v4958_v42  }
 0x538   :  { %3939 = vset.pattern.permute.xlu1 %v4372_v2 }
 0x539   :  { %902 = vperm.xlu0 %3938, %v4967_v45   ;;  %894 = vperm.xlu1 %3939, %v4961_v10  }
 0x53d   :  { %3941 = vset.pattern.permute.xlu0 %v4373_v47  ;;  %898 = vperm.xlu1 %3939, %v4964_v13  }
 0x53e   :  { %918 = vperm.xlu0 %3941, %v4961_v10  }
 0x541   :  { %3940 = vset.pattern.permute.xlu1 %v4373_v47 }
 0x542   :  { %3942 = vset.pattern.permute.xlu0 %v4374_v54  ;;  %914 = vperm.xlu1 %3940, %v4958_v42  }
 0x543   :  { %938 = vperm.xlu0 %3942, %v4958_v42  }
 0x546   :  { %922 = vperm.xlu1 %3940, %v4964_v13  }
 0x547   :  { %950 = vperm.xlu0 %3942, %v4967_v45  }
 0x54a   :  { %926 = vperm.xlu1 %3940, %v4967_v45  }
 0x54b   :  { %3945 = vset.pattern.permute.xlu0 %v4375_v55 }
 0x54c   :  { %966 = vperm.xlu0 %3945, %v4961_v10  }
 0x54e   :  { %3943 = vset.pattern.permute.xlu1 %v4374_v54 }
 0x54f   :  { %942 = vperm.xlu1 %3943, %v4961_v10  }
 0x550   :  { %3946 = vset.pattern.permute.xlu0 %v4376_v38 }
 0x553   :  { %946 = vperm.xlu1 %3943, %v4964_v13  }
 0x557   :  { %3944 = vset.pattern.permute.xlu1 %v4375_v55 }
 0x558   :  { %962 = vperm.xlu1 %3944, %v4958_v42  }
 0x55c   :  { %970 = vperm.xlu1 %3944, %v4964_v13  }
 0x560   :  { %974 = vperm.xlu1 %3944, %v4967_v45  }
 0x564   :  { %3947 = vset.pattern.permute.xlu1 %v4376_v38 }
 0x584   :  { %v3908_v4 = vpop.permute.xlu1 %3907 }
 0x585   :  { %v3910_v58 = vunpack.i.h.bf16 %v3908_v4  ;;  %v3909_v19 = vunpack.i.l.bf16 %v3908_v4 }
 0x587   :  { %v829_v22 = vsel %vm827_vm0, %v704_v28, %v3910_v58  ;;  %v828_v36 = vsel %vm827_vm0, %v703_v3, %v3909_v19  ;;  %v6716_v58 = vld [vmem:[#allocation35_spill] sm:$0xff]  ;;  %v6717_v3 = vld [vmem:[#allocation38_spill] sm:$0xff] }
 0x588   :  { %v3913_v29 = vpop.permute.xlu0 %3912  ;;  %v5067_v19 = vunpack.c.h.bf16 %v6716_v58  ;;  %v5076_v28 = vunpack.c.l.bf16 %v6717_v3  ;;  %v4379_v3 = vmov 22  }
 0x589   :  { %v3915_v47 = vunpack.i.h.bf16 %v3913_v29  ;;  %v3914_v54 = vunpack.i.l.bf16 %v3913_v29 }
 0x58b   :  { %v831_v18 = vsel %vm827_vm0, %v706_v44, %v3915_v47  ;;  %v830_v53 = vsel %vm827_vm0, %v705_v7, %v3914_v54 }
 0x58d   :  { %v3918_v48 = vpop.permute.xlu1 %3917 }
 0x58e   :  { %v3920_v50 = vunpack.i.h.bf16 %v3918_v48  ;;  %v3919_v32 = vunpack.i.l.bf16 %v3918_v48 }
 0x590   :  { %v833_v46 = vsel %vm832_vm1, %v828_v36, %v3919_v32  ;;  %v834_v51 = vsel %vm832_vm1, %v829_v22, %v3920_v50 }
 0x595   :  { %v3923_v49 = vpop.permute.xlu0 %3922 }
 0x596   :  { %v3925_v6 = vunpack.i.h.bf16 %v3923_v49  ;;  %v3924_v37 = vunpack.i.l.bf16 %v3923_v49 }
 0x598   :  { %v835_v5 = vsel %vm832_vm1, %v830_v53, %v3924_v37  ;;  %v836_v57 = vsel %vm832_vm1, %v831_v18, %v3925_v6 }
 0x59a   :  { %v3928_v2 = vpop.permute.xlu1 %3927 }
 0x59b   :  { %v3930_v55 = vunpack.i.h.bf16 %v3928_v2  ;;  %v3929_v38 = vunpack.i.l.bf16 %v3928_v2 }
 0x59d   :  { %v5019_v4 = vsel %vm837_vm2, %v833_v46, %v3929_v38  ;;  %v5022_v11 = vsel %vm837_vm2, %v834_v51, %v3930_v55  ;;  %v4378_v51 = vmov 36  }
 0x59e   :  { %6708 = vst [vmem:[#allocation17_spill] sm:$0xff] %v5019_v4  ;;  %6709 = vst [vmem:[#allocation19_spill] sm:$0xff] %v5022_v11  ;;  %v3933_v12 = vpop.permute.xlu0 %3932 }
 0x59f   :  { %v3935_v25 = vunpack.i.h.bf16 %v3933_v12  ;;  %v3934_v27 = vunpack.i.l.bf16 %v3933_v12 }
 0x5a1   :  { %v5031_v56 = vsel %vm837_vm2, %v835_v5, %v3934_v27  ;;  %v5034_v40 = vsel %vm837_vm2, %v836_v57, %v3935_v25 }
 0x5a2   :  { %6710 = vst [vmem:[#allocation20_spill] sm:$0xff] %v5031_v56  ;;  %6711 = vst [vmem:[#allocation21_spill] sm:$0xff] %v5034_v40 }
 0x5ab   :  { %v5038_v35 = vpop.permute.xlu1 %863 }
 0x5ac   :  { %6712 = vst [vmem:[#allocation16_spill] sm:$0xff] %v5038_v35 }
 0x5af   :  { %v5040_v0 = vpop.permute.xlu1 %873  ;;  %v5042_v30 = vpop.permute.xlu0 %868 }
 0x5b0   :  { %6713 = vst [vmem:[#allocation18_spill] sm:$0xff] %v5040_v0  ;;  %6714 = vst [vmem:[#allocation24_spill] sm:$0xff] %v5042_v30  ;;  %v4179_v30 = vld [vmem:[#allocation8 + $0x50] sm:$0xff]  }
 0x5b3   :  { %v5044_v62 = vpop.permute.xlu1 %878 }
 0x5b4   :  { %6715 = vst [vmem:[#allocation25_spill] sm:$0xff] %v5044_v62  ;;  %v5046_v8 = vpop.permute.xlu0 %890 }
 0x5b8   :  { %v5048_v15 = vpop.permute.xlu1 %894  ;;  %v5050_v26 = vpop.permute.xlu0 %902 }
 0x5bc   :  { %v5052_v31 = vpop.permute.xlu1 %898 }
 0x5bd   :  { %v5054_v29 = vpop.permute.xlu0 %918 }
 0x5c1   :  { %v5056_v48 = vpop.permute.xlu1 %914 }
 0x5c2   :  { %v5058_v39 = vpop.permute.xlu0 %938 }
 0x5c5   :  { %v5060_v9 = vpop.permute.xlu1 %922 }
 0x5c6   :  { %v5062_v20 = vpop.permute.xlu0 %950 }
 0x5c9   :  { %v5064_v43 = vpop.permute.xlu1 %926 }
 0x5cb   :  { %v967_v59 = vpop.permute.xlu0 %966 }
 0x5cc   :  { %v978_v34 = vmul.f32 %v967_v59, %v5067_v19 }
 0x5ce   :  { %987 = vrot.lane.b32.xlu1 %v978_v34, %s4360_s4  ;;  %v5071_v1 = vpop.permute.xlu1 %942 }
 0x5d2   :  { %v5073_v17 = vpop.permute.xlu1 %946 }
 0x5d7   :  { %v963_v50 = vpop.permute.xlu1 %962 }
 0x5d8   :  { %v977_v32 = vmul.f32 %v963_v50, %v5076_v28 }
 0x5da   :  { %985 = vrot.lane.b32.xlu0 %v977_v32, %s4360_s4 }
 0x5db   :  { %v971_v21 = vpop.permute.xlu1 %970 }
 0x5dc   :  { %v979_v23 = vmul.f32 %v971_v21, %v5080_v60 }
 0x5de   :  { %989 = vrot.lane.b32.xlu0 %v979_v23, %s4360_s4 }
 0x5df   :  { %v975_v61 = vpop.permute.xlu1 %974 }
 0x5e0   :  { %v980_v49 = vmul.f32 %v975_v61, %v5085_v24 }
 0x5e2   :  { %1002 = vperm.xlu0 %3946, %v4958_v42   ;;  %991 = vrot.lane.b32.xlu1 %v980_v49, %s4360_s4 }
 0x5e6   :  { %1014 = vperm.xlu0 %3946, %v4967_v45   ;;  %1006 = vperm.xlu1 %3947, %v4961_v10  }
 0x5ea   :  { %1010 = vperm.xlu1 %3947, %v4964_v13   ;;  %3949 = vset.pattern.permute.xlu0 %v4377_v63 }
 0x5ee   :  { %3948 = vset.pattern.permute.xlu1 %v4377_v63 }
 0x640   :  { %v5096_v14 = vpop.permute.xlu1 %987 }
 0x641   :  { %6720 = vst [vmem:[#allocation33_spill] sm:$0xff] %v5096_v14 }
 0x64c   :  { %v5094_v16 = vpop.permute.xlu0 %985 }
 0x64d   :  { %6719 = vst [vmem:[#allocation32_spill] sm:$0xff] %v5094_v16  ;;  %v906_v16 = vmul.f32 %v5048_v15, %v5067_v19  ;;  %v907_v15 = vmul.f32 %v5052_v31, %v5080_v60  ;;  %v5372_v31 = vld [vmem:[#allocation6 + $0x14] sm:$0xff]  }
 0x650   :  { %v5098_v22 = vpop.permute.xlu0 %989 }
 0x651   :  { %6721 = vst [vmem:[#allocation23_spill] sm:$0xff] %v5098_v22 }
 0x654   :  { %v5100_v36 = vpop.permute.xlu1 %991 }
 0x655   :  { %6722 = vst [vmem:[#allocation22_spill] sm:$0xff] %v5100_v36 }
 0x661   :  { %v1003_v2 = vpop.permute.xlu0 %1002 }
 0x662   :  { %v1017_v47 = vmul.f32 %v1003_v2, %v5076_v28 }
 0x664   :  { %1025 = vrot.lane.b32.xlu1 %v1017_v47, %s4360_s4 }
 0x665   :  { %v1007_v54 = vpop.permute.xlu1 %1006  ;;  %v1015_v38 = vpop.permute.xlu0 %1014 }
 0x666   :  { %v1018_v55 = vmul.f32 %v1007_v54, %v5067_v19  ;;  %v1020_v37 = vmul.f32 %v1015_v38, %v5085_v24  ;;  %v4380_v38 = vmov 27  }
 0x668   :  { %1027 = vrot.lane.b32.xlu0 %v1018_v55, %s4360_s4 }
 0x669   :  { %v1011_v6 = vpop.permute.xlu1 %1010 }
 0x66a   :  { %v1019_v46 = vmul.f32 %v1011_v6, %v5080_v60 }
 0x66c   :  { %1031 = vrot.lane.b32.xlu0 %v1020_v37, %s4360_s4  ;;  %1029 = vrot.lane.b32.xlu1 %v1019_v46, %s4360_s4 }
 0x670   :  { %1046 = vperm.xlu0 %3949, %v4961_v10   ;;  %1042 = vperm.xlu1 %3948, %v4958_v42  }
 0x674   :  { %1050 = vperm.xlu1 %3948, %v4964_v13   ;;  %3950 = vset.pattern.permute.xlu0 %v4378_v51 }
 0x678   :  { %1054 = vperm.xlu1 %3948, %v4967_v45  }
 0x67c   :  { %3951 = vset.pattern.permute.xlu1 %v4378_v51 }
 0x6d6   :  { %v5116_v44 = vpop.permute.xlu1 %1025 }
 0x6da   :  { %v5114_v7 = vpop.permute.xlu0 %1027 }
 0x6db   :  { %v1038_v35 = vadd.f32 %v5114_v7, %v906_v16 }
 0x6de   :  { %v5118_v12 = vpop.permute.xlu0 %1031  ;;  %v5120_v18 = vpop.permute.xlu1 %1029 }
 0x6ef   :  { %v1047_v53 = vpop.permute.xlu0 %1046  ;;  %v1043_v25 = vpop.permute.xlu1 %1042 }
 0x6f0   :  { %v1058_v27 = vmul.f32 %v1047_v53, %v5067_v19  ;;  %v1057_v5 = vmul.f32 %v1043_v25, %v5076_v28 }
 0x6f2   :  { %1067 = vrot.lane.b32.xlu1 %v1058_v27, %s4360_s4  ;;  %1065 = vrot.lane.b32.xlu0 %v1057_v5, %s4360_s4 }
 0x6f3   :  { %v1051_v57 = vpop.permute.xlu1 %1050 }
 0x6f4   :  { %v1059_v58 = vmul.f32 %v1051_v57, %v5080_v60 }
 0x6f6   :  { %1069 = vrot.lane.b32.xlu0 %v1059_v58, %s4360_s4 }
 0x6f7   :  { %v1055_v59 = vpop.permute.xlu1 %1054 }
 0x6f8   :  { %v1060_v34 = vmul.f32 %v1055_v59, %v5085_v24 }
 0x6fa   :  { %1082 = vperm.xlu0 %3950, %v4958_v42   ;;  %1071 = vrot.lane.b32.xlu1 %v1060_v34, %s4360_s4 }
 0x6fe   :  { %1094 = vperm.xlu0 %3950, %v4967_v45   ;;  %1086 = vperm.xlu1 %3951, %v4961_v10  }
 0x702   :  { %1090 = vperm.xlu1 %3951, %v4964_v13   ;;  %3953 = vset.pattern.permute.xlu0 %v4379_v3 }
 0x706   :  { %3952 = vset.pattern.permute.xlu1 %v4379_v3  ;;  %v4381_v3 = vmov 32  }
 0x764   :  { %v5134_v50 = vpop.permute.xlu0 %1065  ;;  %v5136_v32 = vpop.permute.xlu1 %1067 }
 0x768   :  { %v5138_v33 = vpop.permute.xlu0 %1069 }
 0x76c   :  { %v5140_v21 = vpop.permute.xlu1 %1071 }
 0x779   :  { %v1083_v23 = vpop.permute.xlu0 %1082 }
 0x77a   :  { %v1097_v61 = vmul.f32 %v1083_v23, %v5076_v28 }
 0x77c   :  { %1105 = vrot.lane.b32.xlu1 %v1097_v61, %s4360_s4 }
 0x77d   :  { %v1087_v49 = vpop.permute.xlu1 %1086  ;;  %v1095_v2 = vpop.permute.xlu0 %1094 }
 0x77e   :  { %v1098_v63 = vmul.f32 %v1087_v49, %v5067_v19  ;;  %v1100_v54 = vmul.f32 %v1095_v2, %v5085_v24 }
 0x780   :  { %1107 = vrot.lane.b32.xlu0 %v1098_v63, %s4360_s4 }
 0x781   :  { %v1091_v47 = vpop.permute.xlu1 %1090 }
 0x782   :  { %v1099_v55 = vmul.f32 %v1091_v47, %v5080_v60 }
 0x784   :  { %1111 = vrot.lane.b32.xlu0 %v1100_v54, %s4360_s4  ;;  %1109 = vrot.lane.b32.xlu1 %v1099_v55, %s4360_s4 }
 0x788   :  { %1126 = vperm.xlu0 %3953, %v4961_v10   ;;  %1122 = vperm.xlu1 %3952, %v4958_v42  }
 0x78c   :  { %1130 = vperm.xlu1 %3952, %v4964_v13   ;;  %3954 = vset.pattern.permute.xlu0 %v4380_v38 }
 0x790   :  { %1134 = vperm.xlu1 %3952, %v4967_v45  }
 0x794   :  { %3955 = vset.pattern.permute.xlu1 %v4380_v38 }
 0x7ee   :  { %v5156_v37 = vpop.permute.xlu1 %1105 }
 0x7f2   :  { %v5154_v6 = vpop.permute.xlu0 %1107 }
 0x7f6   :  { %v5158_v46 = vpop.permute.xlu0 %1111  ;;  %v5160_v51 = vpop.permute.xlu1 %1109 }
 0x807   :  { %v1127_v53 = vpop.permute.xlu0 %1126  ;;  %v1123_v25 = vpop.permute.xlu1 %1122 }
 0x808   :  { %v1138_v27 = vmul.f32 %v1127_v53, %v5067_v19  ;;  %v1137_v5 = vmul.f32 %v1123_v25, %v5076_v28 }
 0x80a   :  { %1147 = vrot.lane.b32.xlu1 %v1138_v27, %s4346_s0  ;;  %1145 = vrot.lane.b32.xlu0 %v1137_v5, %s4346_s0  ;;  %v4382_v5 = vmov 37  }
 0x80b   :  { %v1131_v57 = vpop.permute.xlu1 %1130 }
 0x80c   :  { %v1139_v58 = vmul.f32 %v1131_v57, %v5080_v60 }
 0x80e   :  { %1149 = vrot.lane.b32.xlu0 %v1139_v58, %s4346_s0 }
 0x80f   :  { %v1135_v59 = vpop.permute.xlu1 %1134 }
 0x810   :  { %v1140_v34 = vmul.f32 %v1135_v59, %v5085_v24 }
 0x812   :  { %1162 = vperm.xlu0 %3954, %v4958_v42   ;;  %1151 = vrot.lane.b32.xlu1 %v1140_v34, %s4346_s0 }
 0x816   :  { %1174 = vperm.xlu0 %3954, %v4967_v45   ;;  %1166 = vperm.xlu1 %3955, %v4961_v10  }
 0x81a   :  { %1170 = vperm.xlu1 %3955, %v4964_v13   ;;  %3957 = vset.pattern.permute.xlu0 %v4381_v3 }
 0x81e   :  { %3956 = vset.pattern.permute.xlu1 %v4381_v3 }
 0x87c   :  { %v5174_v23 = vpop.permute.xlu0 %1145  ;;  %v5176_v61 = vpop.permute.xlu1 %1147 }
 0x87d   :  { %6723 = vst [vmem:[#allocation29_spill] sm:$0xff] %v5174_v23  ;;  %6724 = vst [vmem:[#allocation28_spill] sm:$0xff] %v5176_v61 }
 0x880   :  { %v5178_v49 = vpop.permute.xlu0 %1149 }
 0x881   :  { %6725 = vst [vmem:[#allocation27_spill] sm:$0xff] %v5178_v49 }
 0x884   :  { %v5180_v63 = vpop.permute.xlu1 %1151 }
 0x885   :  { %6726 = vst [vmem:[#allocation26_spill] sm:$0xff] %v5180_v63 }
 0x891   :  { %v1163_v2 = vpop.permute.xlu0 %1162 }
 0x892   :  { %v1177_v47 = vmul.f32 %v1163_v2, %v5076_v28 }
 0x894   :  { %1185 = vrot.lane.b32.xlu1 %v1177_v47, %s4346_s0 }
 0x895   :  { %v1167_v54 = vpop.permute.xlu1 %1166  ;;  %v1175_v38 = vpop.permute.xlu0 %1174 }
 0x896   :  { %v1178_v55 = vmul.f32 %v1167_v54, %v5067_v19  ;;  %v1180_v25 = vmul.f32 %v1175_v38, %v5085_v24 }
 0x898   :  { %1187 = vrot.lane.b32.xlu0 %v1178_v55, %s4346_s0 }
 0x899   :  { %v1171_v53 = vpop.permute.xlu1 %1170 }
 0x89a   :  { %v1179_v27 = vmul.f32 %v1171_v53, %v5080_v60 }
 0x89c   :  { %1191 = vrot.lane.b32.xlu0 %v1180_v25, %s4346_s0  ;;  %1189 = vrot.lane.b32.xlu1 %v1179_v27, %s4346_s0  ;;  %v4383_v27 = vmov 23  }
 0x8a0   :  { %1206 = vperm.xlu0 %3957, %v4961_v10   ;;  %1202 = vperm.xlu1 %3956, %v4958_v42  }
 0x8a4   :  { %1210 = vperm.xlu1 %3956, %v4964_v13   ;;  %3958 = vset.pattern.permute.xlu0 %v4382_v5 }
 0x8a8   :  { %1214 = vperm.xlu1 %3956, %v4967_v45  }
 0x8ac   :  { %3959 = vset.pattern.permute.xlu1 %v4382_v5 }
 0x906   :  { %v5196_v58 = vpop.permute.xlu1 %1185 }
 0x90a   :  { %v5194_v57 = vpop.permute.xlu0 %1187 }
 0x90e   :  { %v5198_v59 = vpop.permute.xlu0 %1191  ;;  %v5200_v34 = vpop.permute.xlu1 %1189 }
 0x91f   :  { %v1207_v3 = vpop.permute.xlu0 %1206  ;;  %v1203_v2 = vpop.permute.xlu1 %1202 }
 0x920   :  { %v1218_v47 = vmul.f32 %v1207_v3, %v5067_v19  ;;  %v1217_v54 = vmul.f32 %v1203_v2, %v5076_v28 }
 0x922   :  { %1227 = vrot.lane.b32.xlu1 %v1218_v47, %s4346_s0  ;;  %1225 = vrot.lane.b32.xlu0 %v1217_v54, %s4346_s0 }
 0x923   :  { %v1211_v55 = vpop.permute.xlu1 %1210 }
 0x924   :  { %v1219_v38 = vmul.f32 %v1211_v55, %v5080_v60 }
 0x926   :  { %1229 = vrot.lane.b32.xlu0 %v1219_v38, %s4346_s0 }
 0x927   :  { %v1215_v53 = vpop.permute.xlu1 %1214 }
 0x928   :  { %v1220_v25 = vmul.f32 %v1215_v53, %v5085_v24 }
 0x92a   :  { %1242 = vperm.xlu0 %3958, %v4958_v42   ;;  %1231 = vrot.lane.b32.xlu1 %v1220_v25, %s4346_s0 }
 0x92e   :  { %1254 = vperm.xlu0 %3958, %v4967_v45   ;;  %1246 = vperm.xlu1 %3959, %v4961_v10  }
 0x932   :  { %1250 = vperm.xlu1 %3959, %v4964_v13   ;;  %3961 = vset.pattern.permute.xlu0 %v4383_v27 }
 0x936   :  { %3960 = vset.pattern.permute.xlu1 %v4383_v27 }
 0x994   :  { %v5214_v5 = vpop.permute.xlu0 %1225  ;;  %v5216_v3 = vpop.permute.xlu1 %1227 }
 0x998   :  { %v5218_v2 = vpop.permute.xlu0 %1229 }
 0x99c   :  { %v5220_v47 = vpop.permute.xlu1 %1231 }
 0x9a9   :  { %v1243_v54 = vpop.permute.xlu0 %1242 }
 0x9aa   :  { %v1257_v55 = vmul.f32 %v1243_v54, %v5076_v28  ;;  %v4384_v54 = vmov 28  }
 0x9ac   :  { %1265 = vrot.lane.b32.xlu1 %v1257_v55, %s4346_s0 }
 0x9ad   :  { %v1247_v38 = vpop.permute.xlu1 %1246  ;;  %v1255_v25 = vpop.permute.xlu0 %1254 }
 0x9ae   :  { %v1258_v53 = vmul.f32 %v1247_v38, %v5067_v19  ;;  %v1260_v41 = vmul.f32 %v1255_v25, %v5085_v24 }
 0x9b0   :  { %1267 = vrot.lane.b32.xlu0 %v1258_v53, %s4346_s0 }
 0x9b1   :  { %v1251_v27 = vpop.permute.xlu1 %1250 }
 0x9b2   :  { %v1259_v52 = vmul.f32 %v1251_v27, %v5080_v60 }
 0x9b4   :  { %1271 = vrot.lane.b32.xlu0 %v1260_v41, %s4346_s0  ;;  %1269 = vrot.lane.b32.xlu1 %v1259_v52, %s4346_s0 }
 0x9b8   :  { %1286 = vperm.xlu0 %3961, %v4961_v10   ;;  %1282 = vperm.xlu1 %3960, %v4958_v42  }
 0x9bc   :  { %1290 = vperm.xlu1 %3960, %v4964_v13   ;;  %3962 = vset.pattern.permute.xlu0 %v4384_v54 }
 0x9c0   :  { %1294 = vperm.xlu1 %3960, %v4967_v45  }
 0x9c4   :  { %3963 = vset.pattern.permute.xlu1 %v4384_v54 }
 0xa1e   :  { %v5236_v38 = vpop.permute.xlu1 %1265 }
 0xa22   :  { %v5234_v55 = vpop.permute.xlu0 %1267 }
 0xa26   :  { %v5238_v53 = vpop.permute.xlu0 %1271  ;;  %v5240_v41 = vpop.permute.xlu1 %1269 }
 0xa37   :  { %v1287_v52 = vpop.permute.xlu0 %1286  ;;  %v1283_v25 = vpop.permute.xlu1 %1282 }
 0xa38   :  { %v1298_v27 = vmul.f32 %v1287_v52, %v5067_v19  ;;  %v1297_v56 = vmul.f32 %v1283_v25, %v5076_v28  ;;  %v4385_v52 = vmov 33  }
 0xa3a   :  { %1307 = vrot.lane.b32.xlu1 %v1298_v27, %s4364_s23  ;;  %1305 = vrot.lane.b32.xlu0 %v1297_v56, %s4364_s23 }
 0xa3b   :  { %v1291_v40 = vpop.permute.xlu1 %1290 }
 0xa3c   :  { %v1299_v54 = vmul.f32 %v1291_v40, %v5080_v60 }
 0xa3e   :  { %1309 = vrot.lane.b32.xlu0 %v1299_v54, %s4364_s23 }
 0xa3f   :  { %v1295_v4 = vpop.permute.xlu1 %1294 }
 0xa40   :  { %v1300_v11 = vmul.f32 %v1295_v4, %v5085_v24 }
 0xa42   :  { %1322 = vperm.xlu0 %3962, %v4958_v42   ;;  %1311 = vrot.lane.b32.xlu1 %v1300_v11, %s4364_s23 }
 0xa46   :  { %1334 = vperm.xlu0 %3962, %v4967_v45   ;;  %1326 = vperm.xlu1 %3963, %v4961_v10  }
 0xa4a   :  { %1330 = vperm.xlu1 %3963, %v4964_v13   ;;  %3965 = vset.pattern.permute.xlu0 %v4385_v52 }
 0xa4e   :  { %3964 = vset.pattern.permute.xlu1 %v4385_v52 }
 0xaac   :  { %v5254_v56 = vpop.permute.xlu0 %1305  ;;  %v5256_v40 = vpop.permute.xlu1 %1307 }
 0xaad   :  { %6727 = vst [vmem:[#allocation30_spill] sm:$0xff] %v5254_v56  ;;  %6728 = vst [vmem:[#allocation34_spill] sm:$0xff] %v5256_v40 }
 0xab0   :  { %v5258_v25 = vpop.permute.xlu0 %1309 }
 0xab1   :  { %6729 = vst [vmem:[#allocation36_spill] sm:$0xff] %v5258_v25 }
 0xab4   :  { %v5260_v4 = vpop.permute.xlu1 %1311 }
 0xab5   :  { %6730 = vst [vmem:[#allocation31_spill] sm:$0xff] %v5260_v4 }
 0xac1   :  { %v1323_v27 = vpop.permute.xlu0 %1322 }
 0xac2   :  { %v1337_v11 = vmul.f32 %v1323_v27, %v5076_v28  ;;  %v4386_v27 = vmov 38  }
 0xac4   :  { %1345 = vrot.lane.b32.xlu1 %v1337_v11, %s4364_s23 }
 0xac5   :  { %v1327_v54 = vpop.permute.xlu1 %1326  ;;  %v1335_v49 = vpop.permute.xlu0 %1334 }
 0xac6   :  { %v1338_v63 = vmul.f32 %v1327_v54, %v5067_v19  ;;  %v1340_v56 = vmul.f32 %v1335_v49, %v5085_v24 }
 0xac8   :  { %1347 = vrot.lane.b32.xlu0 %v1338_v63, %s4364_s23 }
 0xac9   :  { %v1331_v52 = vpop.permute.xlu1 %1330 }
 0xaca   :  { %v1339_v40 = vmul.f32 %v1331_v52, %v5080_v60 }
 0xacc   :  { %1351 = vrot.lane.b32.xlu0 %v1340_v56, %s4364_s23  ;;  %1349 = vrot.lane.b32.xlu1 %v1339_v40, %s4364_s23 }
 0xad0   :  { %1366 = vperm.xlu0 %3965, %v4961_v10   ;;  %1362 = vperm.xlu1 %3964, %v4958_v42  }
 0xad4   :  { %1370 = vperm.xlu1 %3964, %v4964_v13   ;;  %3966 = vset.pattern.permute.xlu0 %v4386_v27 }
 0xad8   :  { %1374 = vperm.xlu1 %3964, %v4967_v45  }
 0xadc   :  { %3967 = vset.pattern.permute.xlu1 %v4386_v27 }
 0xb36   :  { %v5276_v49 = vpop.permute.xlu1 %1345 }
 0xb3a   :  { %v5274_v63 = vpop.permute.xlu0 %1347 }
 0xb3e   :  { %v5278_v11 = vpop.permute.xlu0 %1351  ;;  %v5280_v56 = vpop.permute.xlu1 %1349 }
 0xb4f   :  { %v1367_v40 = vpop.permute.xlu0 %1366  ;;  %v1363_v54 = vpop.permute.xlu1 %1362 }
 0xb50   :  { %v1378_v52 = vmul.f32 %v1367_v40, %v5067_v19  ;;  %v1377_v4 = vmul.f32 %v1363_v54, %v5076_v28  ;;  %v4387_v40 = vmov 24  }
 0xb52   :  { %1387 = vrot.lane.b32.xlu1 %v1378_v52, %s4364_s23  ;;  %1385 = vrot.lane.b32.xlu0 %v1377_v4, %s4364_s23 }
 0xb53   :  { %v1371_v25 = vpop.permute.xlu1 %1370 }
 0xb54   :  { %v1379_v27 = vmul.f32 %v1371_v25, %v5080_v60 }
 0xb56   :  { %1389 = vrot.lane.b32.xlu0 %v1379_v27, %s4364_s23 }
 0xb57   :  { %v1375_v36 = vpop.permute.xlu1 %1374 }
 0xb58   :  { %v1380_v22 = vmul.f32 %v1375_v36, %v5085_v24 }
 0xb5a   :  { %1402 = vperm.xlu0 %3966, %v4958_v42   ;;  %1391 = vrot.lane.b32.xlu1 %v1380_v22, %s4364_s23 }
 0xb5e   :  { %1414 = vperm.xlu0 %3966, %v4967_v45   ;;  %1406 = vperm.xlu1 %3967, %v4961_v10  }
 0xb62   :  { %1410 = vperm.xlu1 %3967, %v4964_v13   ;;  %3969 = vset.pattern.permute.xlu0 %v4387_v40 }
 0xb66   :  { %3968 = vset.pattern.permute.xlu1 %v4387_v40 }
 0xbc4   :  { %v5294_v4 = vpop.permute.xlu0 %1385  ;;  %v5296_v25 = vpop.permute.xlu1 %1387 }
 0xbc8   :  { %v5298_v54 = vpop.permute.xlu0 %1389 }
 0xbcc   :  { %v5300_v36 = vpop.permute.xlu1 %1391 }
 0xbd9   :  { %v1403_v52 = vpop.permute.xlu0 %1402 }
 0xbda   :  { %v1417_v22 = vmul.f32 %v1403_v52, %v5076_v28  ;;  %v4388_v52 = vmov 29  }
 0xbdc   :  { %1425 = vrot.lane.b32.xlu1 %v1417_v22, %s4364_s23  ;;  %v4176_v22 = vld [vmem:[#allocation8] sm:$0xff]  }
 0xbdd   :  { %v1407_v27 = vpop.permute.xlu1 %1406  ;;  %v1415_v23 = vpop.permute.xlu0 %1414 }
 0xbde   :  { %v1418_v61 = vmul.f32 %v1407_v27, %v5067_v19  ;;  %v1420_v62 = vmul.f32 %v1415_v23, %v5085_v24  ;;  %v4389_v23 = vmov 34  }
 0xbe0   :  { %1427 = vrot.lane.b32.xlu0 %v1418_v61, %s4364_s23  ;;  %v4175_v61 = vld [vmem:[#allocation8 + $0x40] sm:$0xff]  }
 0xbe1   :  { %v1411_v40 = vpop.permute.xlu1 %1410  ;;  %3689 = vmatprep.subr.bf16.mxu0 %v4175_v61  ;;  %v905_v61 = vmul.f32 %v5046_v8, %v5076_v28 }
 0xbe2   :  { %v1419_v0 = vmul.f32 %v1411_v40, %v5080_v60  ;;  %3690 = vmatpush3.bf16.msra.mxu0 %v4176_v22  ;;  %v5342_v22 = vld [vmem:[#allocation6 + $0x4] sm:$0xff]  }
 0xbe3   :  { %6735 = vst [vmem:[#allocation40_spill] sm:$0xff] %v5342_v22  ;;  %v5355_v8 = vunpack.c.l.bf16 %v5342_v22 }
 0xbe4   :  { %1431 = vrot.lane.b32.xlu0 %v1420_v62, %s4364_s23  ;;  %1429 = vrot.lane.b32.xlu1 %v1419_v0, %s4364_s23  ;;  %v4390_v0 = vmov 39   ;;  %v4391_v62 = vmov 40  }
 0xbe8   :  { %1454 = vperm.xlu0 %3969, %v4961_v10   ;;  %1450 = vperm.xlu1 %3968, %v4958_v42  }
 0xbec   :  { %3970 = vset.pattern.permute.xlu0 %v4388_v52  ;;  %1458 = vperm.xlu1 %3968, %v4964_v13  }
 0xbed   :  { %1474 = vperm.xlu0 %3970, %v4958_v42  }
 0xbf0   :  { %1462 = vperm.xlu1 %3968, %v4967_v45  }
 0xbf1   :  { %1486 = vperm.xlu0 %3970, %v4967_v45  }
 0xbf4   :  { %3971 = vset.pattern.permute.xlu1 %v4388_v52 }
 0xbf5   :  { %3973 = vset.pattern.permute.xlu0 %v4389_v23  ;;  %1478 = vperm.xlu1 %3971, %v4961_v10  }
 0xbf6   :  { %1502 = vperm.xlu0 %3973, %v4961_v10  }
 0xbf9   :  { %1482 = vperm.xlu1 %3971, %v4964_v13  }
 0xbfa   :  { %3974 = vset.pattern.permute.xlu0 %v4390_v0 }
 0xbfb   :  { %1522 = vperm.xlu0 %3974, %v4958_v42  }
 0xbfd   :  { %3972 = vset.pattern.permute.xlu1 %v4389_v23  ;;  %v4177_v23 = vld [vmem:[#allocation8 + $0x48] sm:$0xff]  }
 0xbfe   :  { %1498 = vperm.xlu1 %3972, %v4958_v42   ;;  %3691 = vmatprep.subr.bf16.mxu0 %v4177_v23  ;;  %v908_v23 = vmul.f32 %v5050_v26, %v5085_v24 }
 0xbff   :  { %1534 = vperm.xlu0 %3974, %v4967_v45  }
 0xc00   :  { %v1040_v26 = vadd.f32 %v5118_v12, %v908_v23  ;;  %v5380_v12 = vunpack.c.l.bf16 %v5372_v31 }
 0xc02   :  { %1506 = vperm.xlu1 %3972, %v4964_v13  }
 0xc03   :  { %4007 = vset.pattern.permute.xlu0 %v4391_v62 }
 0xc06   :  { %1510 = vperm.xlu1 %3972, %v4967_v45  }
 0xc0a   :  { %3975 = vset.pattern.permute.xlu1 %v4390_v0 }
 0xc0b   :  { %1526 = vperm.xlu1 %3975, %v4961_v10  }
 0xc0f   :  { %1530 = vperm.xlu1 %3975, %v4964_v13  }
 0xc13   :  { %4006 = vset.pattern.permute.xlu1 %v4391_v62  ;;  %v4178_v62 = vld [vmem:[#allocation8 + $0x8] sm:$0xff]  }
 0xc14   :  { %3692 = vmatpush3.bf16.msra.mxu0 %v4178_v62 }
 0xc15   :  { %3693 = vmatprep.subr.bf16.mxu0 %v4179_v30  ;;  %v4181_v30 = vld [vmem:[#allocation8 + $0x58] sm:$0xff]  }
 0xc4e   :  { %v5328_v42 = vpop.permute.xlu1 %1425 }
 0xc52   :  { %v5326_v27 = vpop.permute.xlu0 %1427 }
 0xc56   :  { %v5330_v40 = vpop.permute.xlu0 %1431  ;;  %v5332_v52 = vpop.permute.xlu1 %1429 }
 0xc57   :  { %6731 = vst [vmem:[#allocation35_spill] sm:$0xff] %v5332_v52  ;;  %v4180_v52 = vld [vmem:[#allocation8 + $0x10] sm:$0xff]  }
 0xc58   :  { %3694 = vmatpush3.bf16.msra.mxu0 %v4180_v52 }
 0xc59   :  { %3695 = vmatprep.subr.bf16.mxu0 %v4181_v30 }
 0xc67   :  { %v5334_v45 = vpop.permute.xlu0 %1454  ;;  %v5336_v10 = vpop.permute.xlu1 %1450 }
 0xc68   :  { %6732 = vst [vmem:[#allocation38_spill] sm:$0xff] %v5334_v45  ;;  %6733 = vst [vmem:[#allocation37_spill] sm:$0xff] %v5336_v10  ;;  %v1037_v45 = vadd.f32 %v5116_v44, %v905_v61  ;;  %v5349_v10 = vld [vmem:[#allocation6 + $0xc] sm:$0xff]   ;;  %v1198_v44 = vadd.f32 %v5194_v57, %v1038_v35 }
 0xc69   :  { %6737 = vst [vmem:[#allocation42_spill] sm:$0xff] %v5349_v10  ;;  %v5364_v61 = vunpack.c.l.bf16 %v5349_v10  ;;  %v1200_v10 = vadd.f32 %v5198_v59, %v1040_v26 }
 0xc6a   :  { %v1197_v62 = vadd.f32 %v5196_v58, %v1037_v45  ;;  %v1358_v57 = vadd.f32 %v5274_v63, %v1198_v44  ;;  %v930_v63 = vmul.f32 %v5054_v29, %v5067_v19  ;;  %v4185_v44 = vld [vmem:[#allocation8 + $0x68] sm:$0xff]  }
 0xc6b   :  { %v5338_v13 = vpop.permute.xlu1 %1458 }
 0xc6c   :  { %6734 = vst [vmem:[#allocation39_spill] sm:$0xff] %v5338_v13  ;;  %v1475_v0 = vpop.permute.xlu0 %1474  ;;  %v5351_v13 = vld [vmem:[#allocation6] ss:$28 sps:$4 sm:$0xff]   ;;  %v1357_v35 = vadd.f32 %v5276_v49, %v1197_v62  ;;  %v929_v62 = vmul.f32 %v5056_v48, %v5076_v28  ;;  %v1078_v30 = vadd.f32 %v5136_v32, %v930_v63 }
 0xc6d   :  { %6738 = vst [vmem:[#allocation43_spill] sm:$0xff] %v5351_v13  ;;  %v1489_v16 = vmul.f32 %v1475_v0, %v5355_v8  ;;  %v5368_v7 = vunpack.c.h.bf16 %v5351_v13  ;;  %v4182_v0 = vld [vmem:[#allocation8 + $0x18] sm:$0xff]   ;;  %v4184_v49 = vld [vmem:[#allocation8 + $0x20] sm:$0xff]  }
 0xc6e   :  { %3696 = vmatpush3.bf16.msra.mxu0 %v4182_v0  ;;  %v4187_v0 = vld [vmem:[#allocation8 + $0x70] sm:$0xff]  }
 0xc6f   :  { %v5346_v14 = vpop.permute.xlu1 %1462 }
 0xc70   :  { %6736 = vst [vmem:[#allocation41_spill] sm:$0xff] %v5346_v14  ;;  %v1487_v22 = vpop.permute.xlu0 %1486  ;;  %v1039_v14 = vadd.f32 %v5120_v18, %v907_v15  ;;  %v1493_v18 = vadd.f32 %v1489_v16, %v1357_v35  ;;  %v4183_v15 = vld [vmem:[#allocation8 + $0x60] sm:$0xff]  }
 0xc71   :  { %v1492_v52 = vmul.f32 %v1487_v22, %v5368_v7  ;;  %3697 = vmatprep.subr.bf16.mxu0 %v4183_v15 }
 0xc72   :  { %v1199_v13 = vadd.f32 %v5200_v34, %v1039_v14  ;;  %v1360_v14 = vadd.f32 %v5278_v11, %v1200_v10  ;;  %3698 = vmatpush3.bf16.msra.mxu0 %v4184_v49  ;;  %v1238_v11 = vadd.f32 %v5216_v3, %v1078_v30  ;;  %v932_v3 = vmul.f32 %v5064_v43, %v5085_v24  ;;  %v4189_v43 = vld [vmem:[#allocation8 + $0x78] sm:$0xff]  }
 0xc73   :  { %3699 = vmatprep.subr.bf16.mxu0 %v4185_v44  ;;  %v4190_v44 = vld [vmem:[#allocation8 + $0x38] sm:$0xff]  }
 0xc74   :  { %v1479_v58 = vpop.permute.xlu1 %1478  ;;  %v1359_v34 = vadd.f32 %v5280_v56, %v1199_v13  ;;  %v1496_v35 = vadd.f32 %v1492_v52, %v1360_v14  ;;  %v953_v14 = vmul.f32 %v5058_v39, %v5076_v28 }
 0xc75   :  { %v1490_v45 = vmul.f32 %v1479_v58, %v5364_v61  ;;  %v1503_v16 = vpop.permute.xlu0 %1502  ;;  %v1077_v58 = vadd.f32 %v5134_v50, %v929_v62  ;;  %v1398_v50 = vadd.f32 %v5296_v25, %v1238_v11  ;;  %v1080_v25 = vadd.f32 %v5140_v21, %v932_v3 }
 0xc76   :  { %v1514_v56 = vmul.f32 %v1503_v16, %v5364_v61  ;;  %v4393_v3 = vmov 50  }
 0xc77   :  { %v1494_v23 = vadd.f32 %v1490_v45, %v1358_v57  ;;  %v1237_v48 = vadd.f32 %v5214_v5, %v1077_v58  ;;  %v4186_v57 = vld [vmem:[#allocation8 + $0x28] sm:$0xff]   ;;  %v931_v5 = vmul.f32 %v5060_v9, %v5080_v60  ;;  %v1240_v62 = vadd.f32 %v5220_v47, %v1080_v25 }
 0xc78   :  { %v1483_v59 = vpop.permute.xlu1 %1482  ;;  %3700 = vmatpush3.bf16.msra.mxu0 %v4186_v57  ;;  %v1518_v52 = vadd.f32 %v1514_v56, %v1398_v50 }
 0xc79   :  { %v3976_v26 = vpack.i.bf16 %v1494_v23, %v1493_v18  ;;  %v1491_v22 = vmul.f32 %v1483_v59, %v5380_v12  ;;  %v1397_v45 = vadd.f32 %v5294_v4, %v1237_v48  ;;  %v4188_v18 = vld [vmem:[#allocation8 + $0x30] sm:$0xff]   ;;  %3701 = vmatprep.subr.bf16.mxu0 %v4187_v0  ;;  %v1079_v4 = vadd.f32 %v5138_v33, %v931_v5 }
 0xc7a   :  { %v1523_v59 = vpop.permute.xlu0 %1522  ;;  %v954_v33 = vmul.f32 %v5071_v1, %v5067_v19  ;;  %v955_v1 = vmul.f32 %v5073_v17, %v5080_v60  ;;  %v4392_v5 = vmov 45  }
 0xc7b   :  { %v1495_v29 = vadd.f32 %v1491_v22, %v1359_v34  ;;  %3977 = vrot.lane.b32.xlu1 %v3976_v26, %s4364_s23  ;;  %v1239_v63 = vadd.f32 %v5218_v2, %v1079_v4  ;;  %v1400_v2 = vadd.f32 %v5300_v36, %v1240_v62  ;;  %v1117_v26 = vadd.f32 %v5156_v37, %v953_v14  ;;  %v6740_v4 = vld [vmem:[#allocation16_spill] sm:$0xff]  ;;  %v6744_v14 = vld [vmem:[#allocation18_spill] sm:$0xff] }
 0xc7c   :  { %3702 = vmatpush3.bf16.msra.mxu0 %v4188_v18  ;;  %v1118_v16 = vadd.f32 %v5154_v6, %v954_v33  ;;  %v956_v22 = vmul.f32 %v5062_v20, %v5085_v24  ;;  %v1537_v30 = vmul.f32 %v1523_v59, %v5355_v8  ;;  %v1119_v48 = vadd.f32 %v5160_v51, %v955_v1  ;;  %v6739_v51 = vld [vmem:[#allocation35_spill] sm:$0xff]  ;;  %v5445_v18 = vld [vmem:[#allocation3 + $0x8] sm:$0xff] }
 0xc7d   :  { %v3981_v10 = vpack.i.bf16 %v1496_v35, %v1495_v29  ;;  %v1499_v13 = vpop.permute.xlu1 %1498  ;;  %v1399_v34 = vadd.f32 %v5298_v54, %v1239_v63  ;;  %3703 = vmatprep.subr.bf16.mxu0 %v4189_v43  ;;  %v1277_v54 = vadd.f32 %v5236_v38, %v1117_v26  ;;  %v881_v25 = vmul.f32 %v6740_v4, %v5076_v28  ;;  %v6742_v59 = vld [vmem:[#allocation33_spill] sm:$0xff]  ;;  %v6743_v43 = vld [vmem:[#allocation32_spill] sm:$0xff]  ;;  %v6748_v28 = vld [vmem:[#allocation38_spill] sm:$0xff] }
 0xc7e   :  { %v1513_v32 = vmul.f32 %v1499_v13, %v5355_v8  ;;  %v1278_v36 = vadd.f32 %v5234_v55, %v1118_v16  ;;  %v1120_v35 = vadd.f32 %v5158_v46, %v956_v22  ;;  %v1535_v37 = vpop.permute.xlu0 %1534  ;;  %v1279_v55 = vadd.f32 %v5240_v41, %v1119_v48  ;;  %v5443_v41 = vld [vmem:[#allocation3 + $0x10] sm:$0xff]  ;;  %v6747_v26 = vld [vmem:[#allocation28_spill] sm:$0xff] }
 0xc7f   :  { %3982 = vrot.lane.b32.xlu0 %v3981_v10, %s4364_s23  ;;  %v1437_v20 = vadd.f32 %v5328_v42, %v1277_v54  ;;  %v1540_v46 = vmul.f32 %v1535_v37, %v5368_v7  ;;  %v883_v33 = vmul.f32 %v6744_v14, %v5080_v60  ;;  %v1466_v22 = vmul.f32 %v6748_v28, %v5364_v61  ;;  %v6751_v54 = vld [vmem:[#allocation22_spill] sm:$0xff] }
 0xc80   :  { %v1517_v23 = vadd.f32 %v1513_v32, %v1397_v45  ;;  %3704 = vmatpush3.bf16.msra.mxu0 %v4190_v44  ;;  %v1438_v11 = vadd.f32 %v5326_v27, %v1278_v36  ;;  %v1280_v17 = vadd.f32 %v5238_v53, %v1120_v35  ;;  %v1439_v45 = vadd.f32 %v6739_v51, %v1279_v55  ;;  %v5439_v53 = vld [vmem:[#allocation3] sm:$0xff]  ;;  %v6752_v60 = vld [vmem:[#allocation30_spill] sm:$0xff] }
 0xc81   :  { %v1507_v15 = vpop.permute.xlu1 %1506  ;;  %v1541_v38 = vadd.f32 %v1537_v30, %v1437_v20  ;;  %v997_v44 = vadd.f32 %v6743_v43, %v881_v25  ;;  %v6754_v20 = vld [vmem:[#allocation27_spill] sm:$0xff] }
 0xc82   :  { %v3986_v49 = vpack.i.bf16 %v1518_v52, %v1517_v23  ;;  %v1515_v9 = vmul.f32 %v1507_v15, %v5380_v12  ;;  %v1440_v57 = vadd.f32 %v5330_v40, %v1280_v17  ;;  %v5449_v40 = vld [vmem:[#allocation3 + $0x18] sm:$0xff]  ;;  %v4394_v52 = vmov 55  }
 0xc83   :  { %v4395_v23 = vmov 41   ;;  %v4396_v15 = vmov 46  }
 0xc84   :  { %3987 = vrot.lane.b32.xlu1 %v3986_v49, %s4346_s0  ;;  %v1519_v39 = vadd.f32 %v1515_v9, %v1399_v34  ;;  %v1544_v50 = vadd.f32 %v1540_v46, %v1440_v57  ;;  %v6741_v49 = vld [vmem:[#allocation24_spill] sm:$0xff]  ;;  %v6756_v46 = vld [vmem:[#allocation39_spill] sm:$0xff] }
 0xc85   :  { %v1511_v21 = vpop.permute.xlu1 %1510  ;;  %v882_v63 = vmul.f32 %v6741_v49, %v5067_v19  ;;  %v6749_v19 = vld [vmem:[#allocation37_spill] sm:$0xff] }
 0xc86   :  { %v1516_v47 = vmul.f32 %v1511_v21, %v5368_v7  ;;  %v6745_v21 = vld [vmem:[#allocation25_spill] sm:$0xff] }
 0xc87   :  { %v998_v9 = vadd.f32 %v6742_v59, %v882_v63  ;;  %v884_v34 = vmul.f32 %v6745_v21, %v5085_v24 }
 0xc88   :  { %v1520_v58 = vadd.f32 %v1516_v47, %v1400_v2  ;;  %v6746_v2 = vld [vmem:[#allocation29_spill] sm:$0xff] }
 0xc89   :  { %v1157_v47 = vadd.f32 %v6746_v2, %v997_v44  ;;  %v1158_v16 = vadd.f32 %v6747_v26, %v998_v9  ;;  %v1000_v36 = vadd.f32 %v6751_v54, %v884_v34  ;;  %v6761_v26 = vld [vmem:[#allocation17_spill] sm:$0xff] }
 0xc8a   :  { %v1527_v29 = vpop.permute.xlu1 %1526  ;;  %v3991_v6 = vpack.i.bf16 %v1520_v58, %v1519_v39  ;;  %v1465_v39 = vmul.f32 %v6749_v19, %v5355_v8  ;;  %v6750_v58 = vld [vmem:[#allocation23_spill] sm:$0xff] }
 0xc8b   :  { %v1538_v56 = vmul.f32 %v1527_v29, %v5364_v61  ;;  %v999_v1 = vadd.f32 %v6750_v58, %v883_v33  ;;  %v1317_v37 = vadd.f32 %v6752_v60, %v1157_v47  ;;  %v6753_v29 = vld [vmem:[#allocation34_spill] sm:$0xff]  ;;  %v6760_v47 = vld [vmem:[#allocation19_spill] sm:$0xff]  ;;  %v6764_v58 = vld [vmem:[#allocation20_spill] sm:$0xff] }
 0xc8c   :  { %3992 = vrot.lane.b32.xlu0 %v3991_v6, %s4346_s0  ;;  %v1318_v24 = vadd.f32 %v6753_v29, %v1158_v16  ;;  %v6762_v16 = vpack.c.bf16 %v6760_v47, %v6761_v26 }
 0xc8d   :  { %v1542_v10 = vadd.f32 %v1538_v56, %v1438_v11  ;;  %v1159_v11 = vadd.f32 %v6754_v20, %v999_v1  ;;  %v6755_v56 = vld [vmem:[#allocation26_spill] sm:$0xff]  ;;  %v1469_v55 = vadd.f32 %v1465_v39, %v1317_v37  ;;  %v6763_v39 = vld [vmem:[#allocation21_spill] sm:$0xff] }
 0xc8e   :  { %v1531_v13 = vpop.permute.xlu1 %1530  ;;  %v1160_v17 = vadd.f32 %v6755_v56, %v1000_v36  ;;  %v1470_v61 = vadd.f32 %v1466_v22, %v1318_v24  ;;  %v6765_v1 = vpack.c.bf16 %v6763_v39, %v6764_v58 }
 0xc8f   :  { %v3996_v42 = vpack.i.bf16 %v1542_v10, %v1541_v38  ;;  %v1539_v27 = vmul.f32 %v1531_v13, %v5380_v12  ;;  %v1467_v10 = vmul.f32 %v6756_v46, %v5380_v12  ;;  %v6757_v13 = vld [vmem:[#allocation41_spill] sm:$0xff] }
 0xc90   :  { %v1468_v57 = vmul.f32 %v6757_v13, %v5368_v7  ;;  %v6780_v13 = vld [vmem:[#allocation43_spill] sm:$0xff] }
 0xc91   :  { %v1543_v32 = vadd.f32 %v1539_v27, %v1439_v45  ;;  %3997 = vrot.lane.b32.xlu1 %v3996_v42, %s4360_s4  ;;  %v6758_v45 = vld [vmem:[#allocation36_spill] sm:$0xff]  ;;  %v6759_v27 = vld [vmem:[#allocation31_spill] sm:$0xff] }
 0xc92   :  { %v1319_v42 = vadd.f32 %v6758_v45, %v1159_v11 }
 0xc93   :  { %v4001_v0 = vpack.i.bf16 %v1544_v50, %v1543_v32  ;;  %v1320_v50 = vadd.f32 %v6759_v27, %v1160_v17 }
 0xc94   :  { %v1471_v49 = vadd.f32 %v1467_v10, %v1319_v42  ;;  %v6781_v42 = vld [vmem:[#allocation42_spill] sm:$0xff] }
 0xc95   :  { %1623 = vperm.xlu1 %4006, %v5439_v53   ;;  %4002 = vrot.lane.b32.xlu0 %v4001_v0, %s4360_s4  ;;  %v1472_v63 = vadd.f32 %v1468_v57, %v1320_v50  ;;  %v5552_v57 = vunpack.c.l.bf16 %v6780_v13  ;;  %v5556_v27 = vunpack.c.h.bf16 %v6781_v42 }
 0xc97   :  { %6782 = vst [vmem:[#allocation30_spill] sm:$0xff] %v5556_v27 }
 0xc99   :  { %1633 = vperm.xlu1 %4006, %v5443_v41   ;;  %1628 = vperm.xlu0 %4007, %v5445_v18  }
 0xc9d   :  { %1638 = vperm.xlu1 %4006, %v5449_v40   ;;  %4008 = vset.pattern.permute.xlu0 %v4392_v5 }
 0xc9e   :  { %1650 = vperm.xlu0 %4008, %v5439_v53  }
 0xca1   :  { %4009 = vset.pattern.permute.xlu1 %v4392_v5 }
 0xca2   :  { %1654 = vperm.xlu1 %4009, %v5445_v18   ;;  %1662 = vperm.xlu0 %4008, %v5449_v40  }
 0xca6   :  { %1658 = vperm.xlu1 %4009, %v5443_v41   ;;  %4011 = vset.pattern.permute.xlu0 %v4393_v3 }
 0xca7   :  { %1678 = vperm.xlu0 %4011, %v5445_v18  }
 0xcaa   :  { %4010 = vset.pattern.permute.xlu1 %v4393_v3 }
 0xcab   :  { %1674 = vperm.xlu1 %4010, %v5439_v53   ;;  %4012 = vset.pattern.permute.xlu0 %v4394_v52 }
 0xcac   :  { %1698 = vperm.xlu0 %4012, %v5439_v53  }
 0xcaf   :  { %1682 = vperm.xlu1 %4010, %v5443_v41  }
 0xcb0   :  { %1710 = vperm.xlu0 %4012, %v5449_v40  }
 0xcb3   :  { %1686 = vperm.xlu1 %4010, %v5449_v40  }
 0xcb4   :  { %4015 = vset.pattern.permute.xlu0 %v4395_v23 }
 0xcb5   :  { %1726 = vperm.xlu0 %4015, %v5445_v18  }
 0xcb7   :  { %4013 = vset.pattern.permute.xlu1 %v4394_v52 }
 0xcb8   :  { %1702 = vperm.xlu1 %4013, %v5445_v18  }
 0xcb9   :  { %4016 = vset.pattern.permute.xlu0 %v4396_v15 }
 0xcbc   :  { %1706 = vperm.xlu1 %4013, %v5443_v41  }
 0xcc0   :  { %4014 = vset.pattern.permute.xlu1 %v4395_v23 }
 0xcc1   :  { %1722 = vperm.xlu1 %4014, %v5439_v53  }
 0xcc5   :  { %1730 = vperm.xlu1 %4014, %v5443_v41  }
 0xcc9   :  { %1734 = vperm.xlu1 %4014, %v5449_v40  }
 0xccd   :  { %4017 = vset.pattern.permute.xlu1 %v4396_v15 }
 0xced   :  { %v3978_v62 = vpop.permute.xlu1 %3977 }
 0xcee   :  { %v3980_v6 = vunpack.i.h.bf16 %v3978_v62  ;;  %v3979_v48 = vunpack.i.l.bf16 %v3978_v62 }
 0xcf0   :  { %v1593_v0 = vsel %vm827_vm0, %v1469_v55, %v3979_v48  ;;  %v1594_v5 = vsel %vm827_vm0, %v1470_v61, %v3980_v6  ;;  %v6777_v61 = vld [vmem:[#allocation40_spill] sm:$0xff] }
 0xcf1   :  { %v3983_v30 = vpop.permute.xlu0 %3982  ;;  %v5543_v55 = vunpack.c.h.bf16 %v6777_v61 }
 0xcf2   :  { %v3985_v3 = vunpack.i.h.bf16 %v3983_v30  ;;  %v3984_v52 = vunpack.i.l.bf16 %v3983_v30 }
 0xcf4   :  { %v1596_v44 = vsel %vm827_vm0, %v1472_v63, %v3985_v3  ;;  %v1595_v14 = vsel %vm827_vm0, %v1471_v49, %v3984_v52  ;;  %v4397_v52 = vmov 51  }
 0xcf6   :  { %v3988_v35 = vpop.permute.xlu1 %3987 }
 0xcf7   :  { %v3990_v38 = vunpack.i.h.bf16 %v3988_v35  ;;  %v3989_v8 = vunpack.i.l.bf16 %v3988_v35 }
 0xcf9   :  { %v1597_v12 = vsel %vm832_vm1, %v1593_v0, %v3989_v8  ;;  %v1598_v7 = vsel %vm832_vm1, %v1594_v5, %v3990_v38  ;;  %v5561_v0 = vunpack.c.h.bf16 %v5372_v31 }
 0xcfb   :  { %6783 = vst [vmem:[#allocation34_spill] sm:$0xff] %v5561_v0 }
 0xcfe   :  { %v3993_v51 = vpop.permute.xlu0 %3992 }
 0xcff   :  { %v3995_v4 = vunpack.i.h.bf16 %v3993_v51  ;;  %v3994_v25 = vunpack.i.l.bf16 %v3993_v51 }
 0xd01   :  { %v1599_v34 = vsel %vm832_vm1, %v1595_v14, %v3994_v25  ;;  %v1600_v2 = vsel %vm832_vm1, %v1596_v44, %v3995_v4 }
 0xd03   :  { %v3998_v32 = vpop.permute.xlu1 %3997 }
 0xd04   :  { %v4000_v23 = vunpack.i.h.bf16 %v3998_v32  ;;  %v3999_v15 = vunpack.i.l.bf16 %v3998_v32 }
 0xd06   :  { %v1601_v62 = vsel %vm837_vm2, %v1597_v12, %v3999_v15  ;;  %v1602_v59 = vsel %vm837_vm2, %v1598_v7, %v4000_v23 }
 0xd07   :  { %v4003_v9 = vpop.permute.xlu0 %4002  ;;  %v1605_v43 = vpack.c.bf16 %v1602_v59, %v1601_v62 }
 0xd08   :  { %v4005_v33 = vunpack.i.h.bf16 %v4003_v9  ;;  %v4004_v21 = vunpack.i.l.bf16 %v4003_v9 }
 0xd09   :  { %3432 = vmatprep.mubr.bf16.mxu0 %v1605_v43 }
 0xd0a   :  { %3433 = vmatmul.mubr.bf16.vlgmr.msra.gmra.mrb[0].mxu0 %v6762_v16  ;;  %v1603_v28 = vsel %vm837_vm2, %v1599_v34, %v4004_v21  ;;  %v1604_v22 = vsel %vm837_vm2, %v1600_v2, %v4005_v33  ;;  %v4398_v2 = vmov 56  }
 0xd0b   :  { %v1606_v19 = vpack.c.bf16 %v1604_v22, %v1603_v28 }
 0xd0d   :  { %3440 = vmatprep.mubr.bf16.mxu0 %v1606_v19 }
 0xd12   :  { %3441 = vmatmul.mubr.bf16.gmra.mrb[4].mxu0 %v6765_v1 }
 0xd14   :  { %v5514_v54 = vpop.permute.xlu1 %1623 }
 0xd15   :  { %6766 = vst [vmem:[#allocation35_spill] sm:$0xff] %v5514_v54  ;;  %v6818_v54 = vmov 61  }
 0xd18   :  { %v5516_v36 = vpop.permute.xlu1 %1633  ;;  %v5518_v30 = vpop.permute.xlu0 %1628 }
 0xd19   :  { %6767 = vst [vmem:[#allocation16_spill] sm:$0xff] %v5516_v36  ;;  %6768 = vst [vmem:[#allocation24_spill] sm:$0xff] %v5518_v30 }
 0xd1c   :  { %v5520_v35 = vpop.permute.xlu1 %1638 }
 0xd1d   :  { %6769 = vst [vmem:[#allocation33_spill] sm:$0xff] %v5520_v35  ;;  %v5522_v60 = vpop.permute.xlu0 %1650  ;;  %v6815_v35 = vmov 78  }
 0xd21   :  { %v5524_v37 = vpop.permute.xlu1 %1654  ;;  %v5526_v29 = vpop.permute.xlu0 %1662 }
 0xd22   :  { %6770 = vst [vmem:[#allocation32_spill] sm:$0xff] %v5526_v29 }
 0xd25   :  { %v5528_v24 = vpop.permute.xlu1 %1658 }
 0xd26   :  { %6771 = vst [vmem:[#allocation18_spill] sm:$0xff] %v5528_v24  ;;  %v5530_v6 = vpop.permute.xlu0 %1678 }
 0xd27   :  { %6772 = vst [vmem:[#allocation25_spill] sm:$0xff] %v5530_v6 }
 0xd2a   :  { %v5532_v48 = vpop.permute.xlu1 %1674 }
 0xd2b   :  { %v5534_v20 = vpop.permute.xlu0 %1698 }
 0xd2c   :  { %6773 = vst [vmem:[#allocation29_spill] sm:$0xff] %v5534_v20 }
 0xd2e   :  { %v5536_v11 = vpop.permute.xlu1 %1682 }
 0xd2f   :  { %6774 = vst [vmem:[#allocation28_spill] sm:$0xff] %v5536_v11  ;;  %v5538_v56 = vpop.permute.xlu0 %1710 }
 0xd30   :  { %6775 = vst [vmem:[#allocation38_spill] sm:$0xff] %v5538_v56 }
 0xd32   :  { %v5540_v17 = vpop.permute.xlu1 %1686 }
 0xd33   :  { %6776 = vst [vmem:[#allocation37_spill] sm:$0xff] %v5540_v17 }
 0xd34   :  { %v1727_v38 = vpop.permute.xlu0 %1726 }
 0xd35   :  { %v1738_v8 = vmul.f32 %v1727_v38, %v5543_v55 }
 0xd37   :  { %1747 = vrot.lane.b32.xlu1 %v1738_v8, %s4360_s4  ;;  %v5547_v46 = vpop.permute.xlu1 %1702 }
 0xd38   :  { %6778 = vst [vmem:[#allocation23_spill] sm:$0xff] %v5547_v46  ;;  %v5949_v46 = vld [vmem:[#allocation3 + $0x18] sm:$0xff] }
 0xd3b   :  { %v5549_v10 = vpop.permute.xlu1 %1706 }
 0xd3c   :  { %6779 = vst [vmem:[#allocation22_spill] sm:$0xff] %v5549_v10 }
 0xd40   :  { %v1723_v51 = vpop.permute.xlu1 %1722 }
 0xd41   :  { %v1737_v45 = vmul.f32 %v1723_v51, %v5552_v57 }
 0xd43   :  { %1745 = vrot.lane.b32.xlu0 %v1737_v45, %s4360_s4 }
 0xd44   :  { %v1731_v50 = vpop.permute.xlu1 %1730 }
 0xd45   :  { %v1739_v32 = vmul.f32 %v1731_v50, %v5556_v27 }
 0xd47   :  { %1749 = vrot.lane.b32.xlu0 %v1739_v32, %s4360_s4 }
 0xd48   :  { %v1735_v5 = vpop.permute.xlu1 %1734 }
 0xd49   :  { %v1740_v3 = vmul.f32 %v1735_v5, %v5561_v0  ;;  %v4399_v5 = vmov 42  }
 0xd4b   :  { %1762 = vperm.xlu0 %4016, %v5439_v53   ;;  %1751 = vrot.lane.b32.xlu1 %v1740_v3, %s4360_s4 }
 0xd4f   :  { %1774 = vperm.xlu0 %4016, %v5449_v40   ;;  %1766 = vperm.xlu1 %4017, %v5445_v18  }
 0xd53   :  { %1770 = vperm.xlu1 %4017, %v5443_v41   ;;  %4019 = vset.pattern.permute.xlu0 %v4397_v52 }
 0xd57   :  { %4018 = vset.pattern.permute.xlu1 %v4397_v52 }
 0xda9   :  { %v5572_v23 = vpop.permute.xlu1 %1747 }
 0xdaa   :  { %6785 = vst [vmem:[#allocation26_spill] sm:$0xff] %v5572_v23  ;;  %v6817_v23 = vmov 65  }
 0xdb5   :  { %v5570_v31 = vpop.permute.xlu0 %1745 }
 0xdb6   :  { %6784 = vst [vmem:[#allocation27_spill] sm:$0xff] %v5570_v31 }
 0xdb9   :  { %v5574_v15 = vpop.permute.xlu0 %1749 }
 0xdba   :  { %6786 = vst [vmem:[#allocation39_spill] sm:$0xff] %v5574_v15 }
 0xdbd   :  { %v5576_v4 = vpop.permute.xlu1 %1751 }
 0xdbe   :  { %6787 = vst [vmem:[#allocation41_spill] sm:$0xff] %v5576_v4 }
 0xdca   :  { %v1763_v25 = vpop.permute.xlu0 %1762 }
 0xdcb   :  { %v1777_v12 = vmul.f32 %v1763_v25, %v5552_v57 }
 0xdcd   :  { %1785 = vrot.lane.b32.xlu1 %v1777_v12, %s4360_s4 }
 0xdce   :  { %v1767_v7 = vpop.permute.xlu1 %1766  ;;  %v1775_v63 = vpop.permute.xlu0 %1774 }
 0xdcf   :  { %v1778_v49 = vmul.f32 %v1767_v7, %v5543_v55  ;;  %v1780_v59 = vmul.f32 %v1775_v63, %v5561_v0 }
 0xdd1   :  { %1787 = vrot.lane.b32.xlu0 %v1778_v49, %s4360_s4 }
 0xdd2   :  { %v1771_v62 = vpop.permute.xlu1 %1770 }
 0xdd3   :  { %v1779_v9 = vmul.f32 %v1771_v62, %v5556_v27 }
 0xdd5   :  { %1791 = vrot.lane.b32.xlu0 %v1780_v59, %s4360_s4  ;;  %1789 = vrot.lane.b32.xlu1 %v1779_v9, %s4360_s4 }
 0xdd9   :  { %1806 = vperm.xlu0 %4019, %v5445_v18   ;;  %1802 = vperm.xlu1 %4018, %v5439_v53  }
 0xddd   :  { %1810 = vperm.xlu1 %4018, %v5443_v41   ;;  %v3705_v43 = vpop.f32.mrb[0].mxu0  ;;  %4020 = vset.pattern.permute.xlu0 %v4398_v2 }
 0xdde   :  { %v3706_v44 = vpop.f32.mrb[1].mxu0 }
 0xddf   :  { %v5589_v14 = vadd.f32 %v3706_v44, %v3705_v43  ;;  %v3708_v33 = vpop.f32.mrb[2].mxu0 }
 0xde0   :  { %v3709_v21 = vpop.f32.mrb[3].mxu0 }
 0xde1   :  { %6788 = vst [vmem:[#allocation36_spill] sm:$0xff] %v5589_v14  ;;  %v5591_v34 = vadd.f32 %v3709_v21, %v3708_v33  ;;  %1814 = vperm.xlu1 %4018, %v5449_v40   ;;  %v4400_v33 = vmov 47  }
 0xde3   :  { %6789 = vst [vmem:[#allocation31_spill] sm:$0xff] %v5591_v34  ;;  %v6813_v34 = vmov 73  }
 0xde5   :  { %v3711_v47 = vpop.f32.mrb[4].mxu0  ;;  %4021 = vset.pattern.permute.xlu1 %v4398_v2 }
 0xde6   :  { %v3712_v26 = vpop.f32.mrb[5].mxu0 }
 0xde7   :  { %v5594_v16 = vadd.f32 %v3712_v26, %v3711_v47  ;;  %v3714_v28 = vpop.f32.mrb[6].mxu0 }
 0xde8   :  { %v3715_v22 = vpop.f32.mrb[7].mxu0 }
 0xde9   :  { %6790 = vst [vmem:[#allocation19_spill] sm:$0xff] %v5594_v16  ;;  %v5596_v19 = vadd.f32 %v3715_v22, %v3714_v28  ;;  %v5804_v16 = vld [vmem:[#allocation6 + $0x8] ss:$16 sps:$4 sm:$0xff]  }
 0xdeb   :  { %6791 = vst [vmem:[#allocation17_spill] sm:$0xff] %v5596_v19 }
 0xe3f   :  { %v5600_v58 = vpop.permute.xlu1 %1785 }
 0xe43   :  { %v5598_v39 = vpop.permute.xlu0 %1787 }
 0xe47   :  { %v5602_v1 = vpop.permute.xlu0 %1791  ;;  %v5604_v61 = vpop.permute.xlu1 %1789 }
 0xe48   :  { %6792 = vst [vmem:[#allocation21_spill] sm:$0xff] %v5602_v1  ;;  %6793 = vst [vmem:[#allocation20_spill] sm:$0xff] %v5604_v61  ;;  %v6824_v61 = vmov 69  }
 0xe58   :  { %v1807_v38 = vpop.permute.xlu0 %1806  ;;  %v1803_v8 = vpop.permute.xlu1 %1802 }
 0xe59   :  { %v1818_v13 = vmul.f32 %v1807_v38, %v5543_v55  ;;  %v1817_v51 = vmul.f32 %v1803_v8, %v5552_v57 }
 0xe5b   :  { %1827 = vrot.lane.b32.xlu1 %v1818_v13, %s4360_s4  ;;  %1825 = vrot.lane.b32.xlu0 %v1817_v51, %s4360_s4 }
 0xe5c   :  { %v1811_v45 = vpop.permute.xlu1 %1810 }
 0xe5d   :  { %v1819_v42 = vmul.f32 %v1811_v45, %v5556_v27 }
 0xe5f   :  { %1829 = vrot.lane.b32.xlu0 %v1819_v42, %s4360_s4 }
 0xe60   :  { %v1815_v50 = vpop.permute.xlu1 %1814 }
 0xe61   :  { %v1820_v32 = vmul.f32 %v1815_v50, %v5561_v0  ;;  %v4401_v50 = vmov 52  }
 0xe63   :  { %1842 = vperm.xlu0 %4020, %v5439_v53   ;;  %1831 = vrot.lane.b32.xlu1 %v1820_v32, %s4360_s4 }
 0xe67   :  { %1854 = vperm.xlu0 %4020, %v5449_v40   ;;  %1846 = vperm.xlu1 %4021, %v5445_v18  }
 0xe6b   :  { %1850 = vperm.xlu1 %4021, %v5443_v41   ;;  %4023 = vset.pattern.permute.xlu0 %v4399_v5 }
 0xe6f   :  { %4022 = vset.pattern.permute.xlu1 %v4399_v5 }
 0xecd   :  { %v5618_v3 = vpop.permute.xlu0 %1825  ;;  %v5620_v52 = vpop.permute.xlu1 %1827 }
 0xece   :  { %6794 = vst [vmem:[#allocation40_spill] sm:$0xff] %v5618_v3  ;;  %6795 = vst [vmem:[#allocation43_spill] sm:$0xff] %v5620_v52  ;;  %v6828_v52 = vmov 59  }
 0xed1   :  { %v5622_v25 = vpop.permute.xlu0 %1829 }
 0xed2   :  { %6796 = vst [vmem:[#allocation42_spill] sm:$0xff] %v5622_v25  ;;  %v6820_v25 = vmov 75  }
 0xed5   :  { %v5624_v12 = vpop.permute.xlu1 %1831 }
 0xed6   :  { %6797 = vst [vmem:[#allocation44_spill] sm:$0xff] %v5624_v12 }
 0xee2   :  { %v1843_v7 = vpop.permute.xlu0 %1842 }
 0xee3   :  { %v1857_v49 = vmul.f32 %v1843_v7, %v5552_v57 }
 0xee5   :  { %1865 = vrot.lane.b32.xlu1 %v1857_v49, %s4360_s4 }
 0xee6   :  { %v1847_v63 = vpop.permute.xlu1 %1846  ;;  %v1855_v59 = vpop.permute.xlu0 %1854 }
 0xee7   :  { %v1858_v62 = vmul.f32 %v1847_v63, %v5543_v55  ;;  %v1860_v43 = vmul.f32 %v1855_v59, %v5561_v0 }
 0xee9   :  { %1867 = vrot.lane.b32.xlu0 %v1858_v62, %s4360_s4 }
 0xeea   :  { %v1851_v9 = vpop.permute.xlu1 %1850 }
 0xeeb   :  { %v1859_v44 = vmul.f32 %v1851_v9, %v5556_v27 }
 0xeed   :  { %1871 = vrot.lane.b32.xlu0 %v1860_v43, %s4360_s4  ;;  %1869 = vrot.lane.b32.xlu1 %v1859_v44, %s4360_s4 }
 0xef1   :  { %1886 = vperm.xlu0 %4023, %v5445_v18   ;;  %1882 = vperm.xlu1 %4022, %v5439_v53  }
 0xef5   :  { %1890 = vperm.xlu1 %4022, %v5443_v41   ;;  %4024 = vset.pattern.permute.xlu0 %v4400_v33 }
 0xef9   :  { %1894 = vperm.xlu1 %4022, %v5449_v40  }
 0xefd   :  { %4025 = vset.pattern.permute.xlu1 %v4400_v33 }
 0xf57   :  { %v5640_v2 = vpop.permute.xlu1 %1865 }
 0xf58   :  { %6799 = vst [vmem:[#allocation46_spill] sm:$0xff] %v5640_v2 }
 0xf5b   :  { %v5638_v21 = vpop.permute.xlu0 %1867 }
 0xf5c   :  { %6798 = vst [vmem:[#allocation45_spill] sm:$0xff] %v5638_v21 }
 0xf5f   :  { %v5642_v47 = vpop.permute.xlu0 %1871  ;;  %v5644_v26 = vpop.permute.xlu1 %1869 }
 0xf60   :  { %6800 = vst [vmem:[#allocation47_spill] sm:$0xff] %v5642_v47  ;;  %6801 = vst [vmem:[#allocation48_spill] sm:$0xff] %v5644_v26  ;;  %v6644_v26 = vmov 69   ;;  %v6819_v47 = vmov 70  }
 0xf70   :  { %v1887_v28 = vpop.permute.xlu0 %1886  ;;  %v1883_v22 = vpop.permute.xlu1 %1882 }
 0xf71   :  { %v1898_v38 = vmul.f32 %v1887_v28, %v5543_v55  ;;  %v1897_v8 = vmul.f32 %v1883_v22, %v5552_v57  ;;  %v4402_v22 = vmov 71  }
 0xf73   :  { %1907 = vrot.lane.b32.xlu1 %v1898_v38, %s4346_s0  ;;  %1905 = vrot.lane.b32.xlu0 %v1897_v8, %s4346_s0  ;;  %v4403_v38 = vmov 66  }
 0xf74   :  { %v1891_v13 = vpop.permute.xlu1 %1890 }
 0xf75   :  { %v1899_v51 = vmul.f32 %v1891_v13, %v5556_v27 }
 0xf77   :  { %1909 = vrot.lane.b32.xlu0 %v1899_v51, %s4346_s0 }
 0xf78   :  { %v1895_v45 = vpop.permute.xlu1 %1894 }
 0xf79   :  { %v1900_v42 = vmul.f32 %v1895_v45, %v5561_v0 }
 0xf7b   :  { %1922 = vperm.xlu0 %4024, %v5439_v53   ;;  %1911 = vrot.lane.b32.xlu1 %v1900_v42, %s4346_s0 }
 0xf7f   :  { %1934 = vperm.xlu0 %4024, %v5449_v40   ;;  %1926 = vperm.xlu1 %4025, %v5445_v18  }
 0xf83   :  { %1930 = vperm.xlu1 %4025, %v5443_v41   ;;  %4027 = vset.pattern.permute.xlu0 %v4401_v50 }
 0xf87   :  { %4026 = vset.pattern.permute.xlu1 %v4401_v50 }
 0xfe5   :  { %v5658_v32 = vpop.permute.xlu0 %1905  ;;  %v5660_v5 = vpop.permute.xlu1 %1907 }
 0xfe6   :  { %6802 = vst [vmem:[#allocation49_spill] sm:$0xff] %v5658_v32  ;;  %6803 = vst [vmem:[#allocation50_spill] sm:$0xff] %v5660_v5  ;;  %v6816_v32 = vmov 58  }
 0xfe9   :  { %v5662_v7 = vpop.permute.xlu0 %1909 }
 0xfea   :  { %6804 = vst [vmem:[#allocation51_spill] sm:$0xff] %v5662_v7  ;;  %v6814_v7 = vmov 53  }
 0xfed   :  { %v5664_v49 = vpop.permute.xlu1 %1911 }
 0xfee   :  { %6805 = vst [vmem:[#allocation52_spill] sm:$0xff] %v5664_v49  ;;  %v6638_v49 = vmov 62  }
 0xffa   :  { %v1923_v63 = vpop.permute.xlu0 %1922 }
 0xffb   :  { %v1937_v62 = vmul.f32 %v1923_v63, %v5552_v57 }
 0xffd   :  { %1945 = vrot.lane.b32.xlu1 %v1937_v62, %s4346_s0 }
 0xffe   :  { %v1927_v59 = vpop.permute.xlu1 %1926  ;;  %v1935_v43 = vpop.permute.xlu0 %1934 }
 0xfff   :  { %v1938_v9 = vmul.f32 %v1927_v59, %v5543_v55  ;;  %v1940_v33 = vmul.f32 %v1935_v43, %v5561_v0 }
0x1001   :  { %1947 = vrot.lane.b32.xlu0 %v1938_v9, %s4346_s0 }
0x1002   :  { %v1931_v44 = vpop.permute.xlu1 %1930 }
0x1003   :  { %v1939_v28 = vmul.f32 %v1931_v44, %v5556_v27 }
0x1005   :  { %1951 = vrot.lane.b32.xlu0 %v1940_v33, %s4346_s0  ;;  %1949 = vrot.lane.b32.xlu1 %v1939_v28, %s4346_s0  ;;  %v4404_v33 = vmov 72   ;;  %v4405_v28 = vmov 57  }
0x1009   :  { %1966 = vperm.xlu0 %4027, %v5445_v18   ;;  %1962 = vperm.xlu1 %4026, %v5439_v53  }
0x100d   :  { %1970 = vperm.xlu1 %4026, %v5443_v41   ;;  %4029 = vset.pattern.permute.xlu0 %v4402_v22 }
0x1011   :  { %1974 = vperm.xlu1 %4026, %v5449_v40  }
0x1015   :  { %4028 = vset.pattern.permute.xlu1 %v4403_v38 }
0x106f   :  { %v5682_v13 = vpop.permute.xlu1 %1945 }
0x1070   :  { %6806 = vst [vmem:[#allocation53_spill] sm:$0xff] %v5682_v13 }
0x1073   :  { %v5680_v8 = vpop.permute.xlu0 %1947 }
0x1077   :  { %v5684_v51 = vpop.permute.xlu0 %1951  ;;  %v5686_v45 = vpop.permute.xlu1 %1949 }
0x1078   :  { %6807 = vst [vmem:[#allocation54_spill] sm:$0xff] %v5684_v51  ;;  %6808 = vst [vmem:[#allocation55_spill] sm:$0xff] %v5686_v45 }
0x1088   :  { %v1967_v42 = vpop.permute.xlu0 %1966  ;;  %v1963_v50 = vpop.permute.xlu1 %1962 }
0x1089   :  { %v1978_v63 = vmul.f32 %v1967_v42, %v5543_v55  ;;  %v1977_v62 = vmul.f32 %v1963_v50, %v5552_v57  ;;  %v4406_v42 = vmov 76   ;;  %v6626_v50 = vmov 53  }
0x108b   :  { %1987 = vrot.lane.b32.xlu1 %v1978_v63, %s4346_s0  ;;  %1985 = vrot.lane.b32.xlu0 %v1977_v62, %s4346_s0  ;;  %v4408_v63 = vmov 67   ;;  %v4409_v62 = vmov 77  }
0x108c   :  { %v1971_v59 = vpop.permute.xlu1 %1970 }
0x108d   :  { %v1979_v9 = vmul.f32 %v1971_v59, %v5556_v27  ;;  %v4410_v59 = vmov 68  }
0x108f   :  { %1989 = vrot.lane.b32.xlu0 %v1979_v9, %s4346_s0  ;;  %v4411_v9 = vmov 48  }
0x1090   :  { %v1975_v43 = vpop.permute.xlu1 %1974 }
0x1091   :  { %v1980_v44 = vmul.f32 %v1975_v43, %v5561_v0  ;;  %v6624_v43 = vmov 73  }
0x1093   :  { %1991 = vrot.lane.b32.xlu1 %v1980_v44, %s4346_s0  ;;  %2562 = vperm.xlu0 %4029, %v5439_v53   ;;  %v6625_v44 = vmov 78  }
0x1097   :  { %2522 = vperm.xlu1 %4028, %v5439_v53   ;;  %4033 = vset.pattern.permute.xlu0 %v4404_v33 }
0x1098   :  { %2722 = vperm.xlu0 %4033, %v5439_v53  }
0x109b   :  { %2526 = vperm.xlu1 %4028, %v5445_v18  }
0x109c   :  { %4034 = vset.pattern.permute.xlu0 %v4405_v28 }
0x109d   :  { %2002 = vperm.xlu0 %4034, %v5439_v53  }
0x109f   :  { %4030 = vset.pattern.permute.xlu1 %v4402_v22 }
0x10a0   :  { %2566 = vperm.xlu1 %4030, %v5445_v18  }
0x10a1   :  { %2006 = vperm.xlu0 %4034, %v5445_v18  }
0x10a4   :  { %4031 = vset.pattern.permute.xlu1 %v4406_v42 }
0x10a5   :  { %2602 = vperm.xlu1 %4031, %v5439_v53   ;;  %4041 = vset.pattern.permute.xlu0 %v6626_v50 }
0x10a6   :  { %2126 = vperm.xlu0 %4041, %v5445_v18  }
0x10a9   :  { %4032 = vset.pattern.permute.xlu1 %v4408_v63 }
0x10aa   :  { %2682 = vperm.xlu1 %4032, %v5439_v53   ;;  %4045 = vset.pattern.permute.xlu0 %v4403_v38 }
0x10ab   :  { %2534 = vperm.xlu0 %4045, %v5449_v40  }
0x10ae   :  { %2686 = vperm.xlu1 %4032, %v5445_v18  }
0x10af   :  { %4046 = vset.pattern.permute.xlu0 %v4406_v42 }
0x10b0   :  { %2606 = vperm.xlu0 %4046, %v5445_v18  }
0x10b2   :  { %4035 = vset.pattern.permute.xlu1 %v4404_v33 }
0x10b3   :  { %2726 = vperm.xlu1 %4035, %v5445_v18  }
0x10b4   :  { %2610 = vperm.xlu0 %4046, %v5443_v41  }
0x10b7   :  { %4036 = vset.pattern.permute.xlu1 %v4409_v62 }
0x10b8   :  { %2762 = vperm.xlu1 %4036, %v5439_v53   ;;  %4050 = vset.pattern.permute.xlu0 %v4408_v63 }
0x10b9   :  { %2694 = vperm.xlu0 %4050, %v5449_v40  }
0x10bc   :  { %4037 = vset.pattern.permute.xlu1 %v4410_v59 }
0x10bd   :  { %2842 = vperm.xlu1 %4037, %v5439_v53   ;;  %4051 = vset.pattern.permute.xlu0 %v4409_v62 }
0x10be   :  { %2766 = vperm.xlu0 %4051, %v5445_v18  }
0x10c1   :  { %2846 = vperm.xlu1 %4037, %v5445_v18  }
0x10c2   :  { %2770 = vperm.xlu0 %4051, %v5443_v41  }
0x10c5   :  { %4038 = vset.pattern.permute.xlu1 %v4411_v9 }
0x10c6   :  { %2082 = vperm.xlu1 %4038, %v5439_v53   ;;  %4055 = vset.pattern.permute.xlu0 %v4410_v59 }
0x10c7   :  { %2854 = vperm.xlu0 %4055, %v5449_v40  }
0x10ca   :  { %2086 = vperm.xlu1 %4038, %v5445_v18  }
0x10cb   :  { %4057 = vset.pattern.permute.xlu0 %v4411_v9 }
0x10cc   :  { %2090 = vperm.xlu0 %4057, %v5443_v41  }
0x10ce   :  { %4039 = vset.pattern.permute.xlu1 %v6624_v43 }
0x10cf   :  { %2886 = vperm.xlu1 %4039, %v5445_v18  }
0x10d0   :  { %4058 = vset.pattern.permute.xlu0 %v6624_v43  ;;  %v6627_v43 = vmov 58  }
0x10d1   :  { %2882 = vperm.xlu0 %4058, %v5439_v53  }
0x10d3   :  { %4040 = vset.pattern.permute.xlu1 %v6626_v50  ;;  %v6632_v50 = vmov 70  }
0x10d4   :  { %2122 = vperm.xlu1 %4040, %v5439_v53  }
0x10d5   :  { %2894 = vperm.xlu0 %4058, %v5449_v40  }
0x10d8   :  { %4042 = vset.pattern.permute.xlu1 %v6625_v44 }
0x10d9   :  { %2922 = vperm.xlu1 %4042, %v5439_v53   ;;  %4062 = vset.pattern.permute.xlu0 %v6625_v44  ;;  %v6634_v44 = vmov 61  }
0x10da   :  { %2930 = vperm.xlu0 %4062, %v5443_v41  }
0x10dd   :  { %2926 = vperm.xlu1 %4042, %v5445_v18  }
0x10de   :  { %4063 = vset.pattern.permute.xlu0 %v6627_v43 }
0x10df   :  { %2162 = vperm.xlu0 %4063, %v5439_v53  }
0x10e1   :  { %4043 = vset.pattern.permute.xlu1 %v6627_v43  ;;  %v6636_v43 = vmov 65  }
0x10e2   :  { %2166 = vperm.xlu1 %4043, %v5445_v18  }
0x10e3   :  { %2174 = vperm.xlu0 %4063, %v5449_v40  }
0x10e6   :  { %4044 = vset.pattern.permute.xlu1 %v4403_v38  ;;  %v6628_v38 = vmov 79  }
0x10e7   :  { %2530 = vperm.xlu1 %4044, %v5443_v41   ;;  %4067 = vset.pattern.permute.xlu0 %v6634_v44 }
0x10e8   :  { %2482 = vperm.xlu0 %4067, %v5439_v53  }
0x10eb   :  { %4047 = vset.pattern.permute.xlu1 %v4402_v22  ;;  %v6630_v22 = vmov 75  }
0x10ec   :  { %2570 = vperm.xlu1 %4047, %v5443_v41   ;;  %4070 = vset.pattern.permute.xlu0 %v6632_v50 }
0x10ed   :  { %2438 = vperm.xlu0 %4070, %v5445_v18  }
0x10f0   :  { %2574 = vperm.xlu1 %4047, %v5449_v40  }
0x10f1   :  { %4080 = vset.pattern.permute.xlu0 %v6636_v43 }
0x10f2   :  { %2422 = vperm.xlu0 %4080, %v5449_v40  }
0x10f4   :  { %4048 = vset.pattern.permute.xlu1 %v4406_v42 }
0x10f5   :  { %2614 = vperm.xlu1 %4048, %v5449_v40  }
0x10f6   :  { %4082 = vset.pattern.permute.xlu0 %v6628_v38 }
0x10f7   :  { %3042 = vperm.xlu0 %4082, %v5439_v53  }
0x10f9   :  { %4049 = vset.pattern.permute.xlu1 %v4408_v63 }
0x10fa   :  { %2690 = vperm.xlu1 %4049, %v5443_v41  }
0x10fb   :  { %4086 = vset.pattern.permute.xlu0 %v6630_v22  ;;  %v5785_v22 = vld [vmem:[#allocation6] sm:$0xff]  }
0x10fc   :  { %v5794_v50 = vunpack.c.l.bf16 %v5785_v22 }
0x10fd   :  { %v5776_v42 = vpop.permute.xlu0 %1985  ;;  %v5781_v63 = vpop.permute.xlu1 %1987 }
0x10fe   :  { %4052 = vset.pattern.permute.xlu1 %v4404_v33  ;;  %6809 = vst [vmem:[#allocation56_spill] sm:$0xff] %v5776_v42  ;;  %6810 = vst [vmem:[#allocation57_spill] sm:$0xff] %v5781_v63 }
0x10ff   :  { %2730 = vperm.xlu1 %4052, %v5443_v41  }
0x1101   :  { %v5783_v38 = vpop.permute.xlu0 %1989 }
0x1102   :  { %6811 = vst [vmem:[#allocation58_spill] sm:$0xff] %v5783_v38 }
0x1103   :  { %2734 = vperm.xlu1 %4052, %v5449_v40  }
0x1105   :  { %v5788_v33 = vpop.permute.xlu1 %1991 }
0x1106   :  { %6812 = vst [vmem:[#allocation59_spill] sm:$0xff] %v5788_v33 }
0x1107   :  { %4053 = vset.pattern.permute.xlu1 %v4409_v62 }
0x1108   :  { %2774 = vperm.xlu1 %4053, %v5449_v40  }
0x110c   :  { %4054 = vset.pattern.permute.xlu1 %v4410_v59 }
0x110d   :  { %2850 = vperm.xlu1 %4054, %v5443_v41  }
0x1111   :  { %4056 = vset.pattern.permute.xlu1 %v4405_v28 }
0x1112   :  { %2010 = vperm.xlu1 %4056, %v5443_v41   ;;  %v5791_v62 = vpop.permute.xlu0 %2562 }
0x1116   :  { %2014 = vperm.xlu1 %4056, %v5449_v40   ;;  %v2523_v59 = vpop.permute.xlu1 %2522 }
0x1117   :  { %v2537_v44 = vmul.f32 %v2523_v59, %v5794_v50  ;;  %v2723_v43 = vpop.permute.xlu0 %2722 }
0x1118   :  { %v2737_v31 = vmul.f32 %v2723_v43, %v5794_v50 }
0x1119   :  { %2545 = vrot.lane.b32.xlu0 %v2537_v44, %s4360_s4 }
0x111a   :  { %4059 = vset.pattern.permute.xlu1 %v4411_v9  ;;  %v5800_v28 = vpop.permute.xlu1 %2526  ;;  %v5812_v9 = vunpack.c.l.bf16 %v5804_v16 }
0x111b   :  { %2094 = vperm.xlu1 %4059, %v5449_v40  }
0x111c   :  { %v2003_v19 = vpop.permute.xlu0 %2002 }
0x111d   :  { %2466 = vperm.xlu0 %4086, %v5443_v41   ;;  %v2017_v38 = vmul.f32 %v2003_v19, %v5552_v57  ;;  %v6821_v19 = vmov 62  }
0x111f   :  { %4060 = vset.pattern.permute.xlu1 %v6813_v34  ;;  %v2567_v14 = vpop.permute.xlu1 %2566 }
0x1120   :  { %2890 = vperm.xlu1 %4060, %v5443_v41   ;;  %v5808_v59 = vpop.permute.xlu0 %2006  ;;  %v2578_v44 = vmul.f32 %v2567_v14, %v5812_v9 }
0x1121   :  { %4087 = vset.pattern.permute.xlu0 %v6638_v49 }
0x1122   :  { %2642 = vperm.xlu0 %4087, %v5439_v53  }
0x1124   :  { %4061 = vset.pattern.permute.xlu1 %v6814_v7  ;;  %v5817_v4 = vpop.permute.xlu1 %2602  ;;  %v6640_v7 = vmov 63  }
0x1125   :  { %2130 = vperm.xlu1 %4061, %v5443_v41   ;;  %v5820_v34 = vpop.permute.xlu0 %2126 }
0x1126   :  { %2587 = vrot.lane.b32.xlu0 %v2578_v44, %s4360_s4  ;;  %v2138_v51 = vmul.f32 %v5820_v34, %v5543_v55  ;;  %v6825_v34 = vmov 49  }
0x1129   :  { %2134 = vperm.xlu1 %4061, %v5449_v40   ;;  %v2683_v49 = vpop.permute.xlu1 %2682 }
0x112a   :  { %2654 = vperm.xlu0 %4087, %v5449_v40   ;;  %v5825_v15 = vpop.permute.xlu0 %2534  ;;  %v2697_v44 = vmul.f32 %v2683_v49, %v5794_v50 }
0x112d   :  { %4064 = vset.pattern.permute.xlu1 %v6815_v35  ;;  %v5828_v14 = vpop.permute.xlu1 %2686 }
0x112e   :  { %2934 = vperm.xlu1 %4064, %v5449_v40   ;;  %4090 = vset.pattern.permute.xlu0 %v6640_v7 }
0x112f   :  { %2806 = vperm.xlu0 %4090, %v5445_v18   ;;  %v5833_v36 = vpop.permute.xlu0 %2606 }
0x1132   :  { %4065 = vset.pattern.permute.xlu1 %v6816_v32  ;;  %v5837_v5 = vpop.permute.xlu1 %2726 }
0x1133   :  { %2170 = vperm.xlu1 %4065, %v5443_v41   ;;  %2705 = vrot.lane.b32.xlu0 %v2697_v44, %s4346_s0  ;;  %v5842_v35 = vpop.permute.xlu0 %2610  ;;  %v6642_v44 = vmov 43  }
0x1137   :  { %4066 = vset.pattern.permute.xlu1 %v6817_v23  ;;  %2745 = vrot.lane.b32.xlu0 %v2737_v31, %s4346_s0  ;;  %v5846_v7 = vpop.permute.xlu1 %2762 }
0x1138   :  { %2410 = vperm.xlu1 %4066, %v5439_v53   ;;  %v5849_v49 = vpop.permute.xlu0 %2694 }
0x113b   :  { %2810 = vperm.xlu0 %4090, %v5443_v41  }
0x113c   :  { %2414 = vperm.xlu1 %4066, %v5445_v18   ;;  %v2843_v32 = vpop.permute.xlu1 %2842 }
0x113d   :  { %v5853_v43 = vpop.permute.xlu0 %2766  ;;  %v2857_v56 = vmul.f32 %v2843_v32, %v5794_v50 }
0x113f   :  { %4093 = vset.pattern.permute.xlu0 %v6642_v44 }
0x1140   :  { %4068 = vset.pattern.permute.xlu1 %v6818_v54  ;;  %2054 = vperm.xlu0 %4093, %v5449_v40   ;;  %v5858_v31 = vpop.permute.xlu1 %2846 }
0x1141   :  { %2486 = vperm.xlu1 %4068, %v5445_v18   ;;  %v5861_v30 = vpop.permute.xlu0 %2770 }
0x1144   :  { %4094 = vset.pattern.permute.xlu0 %v6644_v26 }
0x1145   :  { %4069 = vset.pattern.permute.xlu1 %v6819_v47  ;;  %2994 = vperm.xlu0 %4094, %v5439_v53   ;;  %v2083_v10 = vpop.permute.xlu1 %2082 }
0x1146   :  { %2434 = vperm.xlu1 %4069, %v5439_v53   ;;  %v5867_v44 = vpop.permute.xlu0 %2854  ;;  %v2097_v11 = vmul.f32 %v2083_v10, %v5552_v57 }
0x1149   :  { %2865 = vrot.lane.b32.xlu0 %v2857_v56, %s4364_s23  ;;  %v5872_v33 = vpop.permute.xlu1 %2086 }
0x114a   :  { %4071 = vset.pattern.permute.xlu1 %v6820_v25 }
0x114b   :  { %2458 = vperm.xlu1 %4071, %v5439_v53   ;;  %v5876_v26 = vpop.permute.xlu0 %2090 }
0x114d   :  { %2025 = vrot.lane.b32.xlu0 %v2017_v38, %s4346_s0  ;;  %v6822_v38 = vmov 63  }
0x114e   :  { %v5879_v12 = vpop.permute.xlu1 %2886 }
0x114f   :  { %2462 = vperm.xlu1 %4071, %v5445_v18  }
0x1150   :  { %v2883_v32 = vpop.permute.xlu0 %2882 }
0x1151   :  { %2105 = vrot.lane.b32.xlu0 %v2097_v11, %s4364_s23  ;;  %v2897_v56 = vmul.f32 %v2883_v32, %v5794_v50  ;;  %v6823_v11 = vmov 43   ;;  %v6646_v32 = vmov 49  }
0x1153   :  { %4072 = vset.pattern.permute.xlu1 %v6821_v19  ;;  %v5886_v17 = vpop.permute.xlu1 %2122 }
0x1154   :  { %2646 = vperm.xlu1 %4072, %v5445_v18  }
0x1155   :  { %2905 = vrot.lane.b32.xlu0 %v2897_v56, %s4364_s23 }
0x1158   :  { %4073 = vset.pattern.permute.xlu1 %v6822_v38  ;;  %v5891_v45 = vpop.permute.xlu1 %2922 }
0x1159   :  { %2802 = vperm.xlu1 %4073, %v5439_v53   ;;  %3002 = vperm.xlu0 %4094, %v5443_v41  }
0x115c   :  { %v5895_v10 = vpop.permute.xlu1 %2926 }
0x115d   :  { %4074 = vset.pattern.permute.xlu1 %v6823_v11  ;;  %4095 = vset.pattern.permute.xlu0 %v6646_v32  ;;  %v6648_v32 = vmov 74  }
0x115e   :  { %2042 = vperm.xlu1 %4074, %v5439_v53   ;;  %2238 = vperm.xlu0 %4095, %v5445_v18  }
0x1161   :  { %v2167_v56 = vpop.permute.xlu1 %2166 }
0x1162   :  { %2046 = vperm.xlu1 %4074, %v5445_v18   ;;  %2147 = vrot.lane.b32.xlu0 %v2138_v51, %s4364_s23  ;;  %v6649_v51 = vmov 54   ;;  %v2178_v21 = vmul.f32 %v2167_v56, %v5543_v55  ;;  %v5936_v56 = vld [vmem:[#allocation3 + $0x10] sm:$0xff] }
0x1166   :  { %4075 = vset.pattern.permute.xlu1 %v6824_v61  ;;  %2246 = vperm.xlu0 %4095, %v5449_v40   ;;  %v5907_v1 = vpop.permute.xlu1 %2530 }
0x1167   :  { %2998 = vperm.xlu1 %4075, %v5445_v18  }
0x116a   :  { %4098 = vset.pattern.permute.xlu0 %v6648_v32 }
0x116b   :  { %4076 = vset.pattern.permute.xlu1 %v6825_v34  ;;  %3026 = vperm.xlu0 %4098, %v5443_v41   ;;  %v5913_v24 = vpop.permute.xlu1 %2570 }
0x116c   :  { %2234 = vperm.xlu1 %4076, %v5439_v53  }
0x116f   :  { %4099 = vset.pattern.permute.xlu0 %v6649_v51  ;;  %v2575_v29 = vpop.permute.xlu1 %2574 }
0x1170   :  { %4077 = vset.pattern.permute.xlu1 %v6648_v32  ;;  %2258 = vperm.xlu0 %4099, %v5439_v53   ;;  %v6650_v32 = vmov 59  }
0x1171   :  { %3018 = vperm.xlu1 %4077, %v5439_v53  }
0x1174   :  { %2187 = vrot.lane.b32.xlu0 %v2178_v21, %s4364_s23  ;;  %v2615_v2 = vpop.permute.xlu1 %2614  ;;  %v5934_v21 = vunpack.c.h.bf16 %v5804_v16 }
0x1175   :  { %3022 = vperm.xlu1 %4077, %v5445_v18  }
0x1176   :  { %6826 = vst [vmem:[#allocation60_spill] sm:$0xff] %v5934_v21 }
0x1178   :  { %2270 = vperm.xlu0 %4099, %v5449_v40   ;;  %v2540_v40 = vmul.f32 %v5825_v15, %v5934_v21  ;;  %v6827_v15 = vmov 79  }
0x1179   :  { %4078 = vset.pattern.permute.xlu1 %v6649_v51  ;;  %v5925_v41 = vpop.permute.xlu1 %2690  ;;  %v2895_v51 = vpop.permute.xlu0 %2894 }
0x117a   :  { %2262 = vperm.xlu1 %4078, %v5445_v18  }
0x117c   :  { %4102 = vset.pattern.permute.xlu0 %v6650_v32 }
0x117d   :  { %2286 = vperm.xlu0 %4102, %v5445_v18   ;;  %v6652_v18 = vmov 60   ;;  %v5947_v63 = vpop.permute.xlu0 %2930 }
0x117e   :  { %4079 = vset.pattern.permute.xlu1 %v6817_v23  ;;  %v5931_v53 = vpop.permute.xlu1 %2730  ;;  %v2580_v23 = vmul.f32 %v2575_v29, %v5934_v21 }
0x117f   :  { %2418 = vperm.xlu1 %4079, %v5936_v56  }
0x1181   :  { %2290 = vperm.xlu0 %4102, %v5936_v56   ;;  %v5963_v29 = vpop.permute.xlu0 %2162 }
0x1182   :  { %v2735_v32 = vpop.permute.xlu1 %2734 }
0x1183   :  { %4081 = vset.pattern.permute.xlu1 %v6818_v54  ;;  %v2620_v54 = vmul.f32 %v2615_v2, %v5934_v21 }
0x1184   :  { %2490 = vperm.xlu1 %4081, %v5936_v56  }
0x1185   :  { %2551 = vrot.lane.b32.xlu0 %v2540_v40, %s4360_s4  ;;  %v2700_v40 = vmul.f32 %v5849_v49, %v5934_v21  ;;  %v2740_v49 = vmul.f32 %v2735_v32, %v5934_v21  ;;  %v2175_v42 = vpop.permute.xlu0 %2174  ;;  %v2538_v32 = vmul.f32 %v5800_v28, %v5812_v9  ;;  %v2577_v28 = vmul.f32 %v5791_v62, %v5794_v50 }
0x1186   :  { %4106 = vset.pattern.permute.xlu0 %v6652_v18  ;;  %v5959_v18 = vld [vmem:[#allocation3 + $0x8] sm:$0xff]  ;;  %v2617_v62 = vmul.f32 %v5817_v4, %v5794_v50  ;;  %v2698_v4 = vmul.f32 %v5828_v14, %v5812_v9 }
0x1187   :  { %v2775_v16 = vpop.permute.xlu1 %2774 }
0x1188   :  { %2494 = vperm.xlu1 %4081, %v5949_v46  }
0x1189   :  { %2591 = vrot.lane.b32.xlu0 %v2580_v23, %s4360_s4  ;;  %v5969_v23 = vld [vmem:[#allocation3] sm:$0xff]  ;;  %v5980_v6 = vpop.permute.xlu0 %2482 }
0x118c   :  { %4083 = vset.pattern.permute.xlu1 %v6827_v15  ;;  %v5955_v20 = vpop.permute.xlu1 %2850 }
0x118d   :  { %3046 = vperm.xlu1 %4083, %v5959_v18   ;;  %2631 = vrot.lane.b32.xlu0 %v2620_v54, %s4360_s4  ;;  %v2780_v54 = vmul.f32 %v2775_v16, %v5934_v21 }
0x1191   :  { %4084 = vset.pattern.permute.xlu1 %v6828_v52  ;;  %2711 = vrot.lane.b32.xlu0 %v2700_v40, %s4346_s0  ;;  %v5967_v2 = vpop.permute.xlu1 %2010  ;;  %v2860_v40 = vmul.f32 %v5867_v44, %v5934_v21 }
0x1192   :  { %2282 = vperm.xlu1 %4084, %v5969_v23  }
0x1195   :  { %2751 = vrot.lane.b32.xlu0 %v2740_v49, %s4346_s0  ;;  %v2015_v13 = vpop.permute.xlu1 %2014  ;;  %v5990_v49 = vpop.permute.xlu0 %2438 }
0x1196   :  { %4085 = vset.pattern.permute.xlu1 %v6819_v47  ;;  %v2020_v47 = vmul.f32 %v2015_v13, %v5561_v0  ;;  %v2900_v13 = vmul.f32 %v2895_v51, %v5934_v21 }
0x1197   :  { %2442 = vperm.xlu1 %4085, %v5936_v56  }
0x1199   :  { %2791 = vrot.lane.b32.xlu0 %v2780_v54, %s4346_s0 }
0x119a   :  { %v2095_v3 = vpop.permute.xlu1 %2094 }
0x119b   :  { %2446 = vperm.xlu1 %4085, %v5949_v46   ;;  %v2100_v44 = vmul.f32 %v2095_v3, %v5561_v0 }
0x119d   :  { %2871 = vrot.lane.b32.xlu0 %v2860_v40, %s4364_s23  ;;  %v6002_v40 = vpop.permute.xlu0 %2422 }
0x119e   :  { %6829 = vst [vmem:[#allocation61_spill] sm:$0xff] %v6002_v40  ;;  %v6839_v40 = vmov 60  }
0x119f   :  { %2547 = vrot.lane.b32.xlu1 %v2538_v32, %s4360_s4  ;;  %v5988_v16 = vpop.permute.xlu1 %2890 }
0x11a0   :  { %4088 = vset.pattern.permute.xlu1 %v6820_v25 }
0x11a1   :  { %2031 = vrot.lane.b32.xlu0 %v2020_v47, %s4346_s0  ;;  %v6009_v32 = vpop.permute.xlu0 %3042 }
0x11a3   :  { %2470 = vperm.xlu1 %4088, %v5949_v46  }
0x11a4   :  { %v5996_v54 = vpop.permute.xlu1 %2130 }
0x11a5   :  { %2111 = vrot.lane.b32.xlu0 %v2100_v44, %s4364_s23  ;;  %v2618_v44 = vmul.f32 %v5833_v36, %v5812_v9 }
0x11a7   :  { %2585 = vrot.lane.b32.xlu1 %v2577_v28, %s4360_s4  ;;  %v6021_v28 = vpop.permute.xlu0 %2545 }
0x11a8   :  { %v2135_v25 = vpop.permute.xlu1 %2134  ;;  %4089 = vset.pattern.permute.xlu1 %v6821_v19  ;;  %v2180_v19 = vmul.f32 %v2175_v42, %v5561_v0  ;;  %v2738_v42 = vmul.f32 %v5837_v5, %v5812_v9 }
0x11a9   :  { %2911 = vrot.lane.b32.xlu0 %v2900_v13, %s4364_s23  ;;  %v2140_v3 = vmul.f32 %v2135_v25, %v5561_v0 }
0x11ab   :  { %2650 = vperm.xlu1 %4089, %v5936_v56   ;;  %v6029_v36 = vpop.permute.xlu0 %2466 }
0x11ac   :  { %6830 = vst [vmem:[#allocation62_spill] sm:$0xff] %v6029_v36 }
0x11ad   :  { %2151 = vrot.lane.b32.xlu0 %v2140_v3, %s4364_s23  ;;  %v2935_v51 = vpop.permute.xlu1 %2934 }
0x11ae   :  { %v2940_v47 = vmul.f32 %v2935_v51, %v5934_v21  ;;  %v6656_v51 = vmov 64   ;;  %v6855_v21 = vmov 44  }
0x11af   :  { %2625 = vrot.lane.b32.xlu1 %v2617_v62, %s4360_s4  ;;  %v2643_v3 = vpop.permute.xlu0 %2642 }
0x11b0   :  { %4091 = vset.pattern.permute.xlu1 %v6822_v38  ;;  %v2657_v14 = vmul.f32 %v2643_v3, %v5794_v50 }
0x11b1   :  { %2951 = vrot.lane.b32.xlu0 %v2940_v47, %s4364_s23  ;;  %v2777_v47 = vmul.f32 %v5846_v7, %v5794_v50  ;;  %v2018_v7 = vmul.f32 %v5808_v59, %v5543_v55 }
0x11b2   :  { %v6023_v13 = vpop.permute.xlu1 %2170 }
0x11b3   :  { %2627 = vrot.lane.b32.xlu1 %v2618_v44, %s4360_s4  ;;  %v2778_v44 = vmul.f32 %v5853_v43, %v5812_v9 }
0x11b5   :  { %2191 = vrot.lane.b32.xlu0 %v2180_v19, %s4364_s23 }
0x11b7   :  { %2707 = vrot.lane.b32.xlu1 %v2698_v4, %s4346_s0  ;;  %v6032_v38 = vpop.permute.xlu1 %2410 }
0x11b9   :  { %2388 = vperm.xlu0 %4106, %v5959_v18  }
0x11bb   :  { %2747 = vrot.lane.b32.xlu1 %v2738_v42, %s4346_s0  ;;  %v6038_v25 = vpop.permute.xlu1 %2414 }
0x11bd   :  { %2398 = vperm.xlu0 %4106, %v5949_v46  }
0x11bf   :  { %2814 = vperm.xlu1 %4091, %v5949_v46  }
0x11c0   :  { %v6043_v62 = vpop.permute.xlu1 %2486 }
0x11c1   :  { %2665 = vrot.lane.b32.xlu0 %v2657_v14, %s4346_s0 }
0x11c2   :  { %4110 = vset.pattern.permute.xlu0 %v6656_v51  ;;  %v6136_v51 = vld [vmem:[#allocation6 + $0x10] sm:$0xff]  }
0x11c3   :  { %4092 = vset.pattern.permute.xlu1 %v6823_v11  ;;  %v2858_v11 = vmul.f32 %v5858_v31, %v5812_v9  ;;  %v2898_v31 = vmul.f32 %v5879_v12, %v5812_v9  ;;  %6837 = vst [vmem:[#allocation67_spill] sm:$0xff] %v6136_v51 }
0x11c4   :  { %2050 = vperm.xlu1 %4092, %v5936_v56  }
0x11c5   :  { %v6049_v5 = vpop.permute.xlu1 %2434 }
0x11c8   :  { %2785 = vrot.lane.b32.xlu1 %v2777_v47, %s4346_s0  ;;  %v2137_v47 = vmul.f32 %v5886_v17, %v5552_v57  ;;  %v2937_v17 = vmul.f32 %v5891_v45, %v5794_v50  ;;  %v2177_v45 = vmul.f32 %v5963_v29, %v5552_v57 }
0x11c9   :  { %4096 = vset.pattern.permute.xlu1 %v6824_v61  ;;  %v2098_v61 = vmul.f32 %v5872_v33, %v5543_v55 }
0x11ca   :  { %v6057_v19 = vpop.permute.xlu1 %2458 }
0x11cc   :  { %2787 = vrot.lane.b32.xlu1 %v2778_v44, %s4346_s0  ;;  %v6085_v44 = vpop.permute.xlu0 %2587 }
0x11ce   :  { %v6062_v4 = vpop.permute.xlu1 %2462 }
0x11d0   :  { %2867 = vrot.lane.b32.xlu1 %v2858_v11, %s4364_s23  ;;  %v6092_v11 = vpop.permute.xlu0 %2654 }
0x11d1   :  { %6831 = vst [vmem:[#allocation63_spill] sm:$0xff] %v6092_v11 }
0x11d3   :  { %v6067_v42 = vpop.permute.xlu1 %2646 }
0x11d4   :  { %2027 = vrot.lane.b32.xlu1 %v2018_v7, %s4346_s0  ;;  %v6654_v7 = vmov 44  }
0x11d8   :  { %2107 = vrot.lane.b32.xlu1 %v2098_v61, %s4364_s23  ;;  %v2803_v43 = vpop.permute.xlu1 %2802 }
0x11d9   :  { %v2817_v3 = vmul.f32 %v2803_v43, %v5794_v50  ;;  %v6832_v43 = vmov 74  }
0x11db   :  { %2825 = vrot.lane.b32.xlu0 %v2817_v3, %s4364_s23  ;;  %v6106_v3 = vpop.permute.xlu0 %2806 }
0x11dc   :  { %2907 = vrot.lane.b32.xlu1 %v2898_v31, %s4364_s23 }
0x11dd   :  { %v2043_v59 = vpop.permute.xlu1 %2042 }
0x11de   :  { %v2057_v14 = vmul.f32 %v2043_v59, %v5552_v57 }
0x11df   :  { %v6114_v59 = vpop.permute.xlu0 %2705 }
0x11e0   :  { %3006 = vperm.xlu1 %4096, %v5949_v46   ;;  %2065 = vrot.lane.b32.xlu0 %v2057_v14, %s4364_s23 }
0x11e1   :  { %v6081_v33 = vpop.permute.xlu1 %2046 }
0x11e4   :  { %2145 = vrot.lane.b32.xlu1 %v2137_v47, %s4364_s23  ;;  %2978 = vperm.xlu0 %4110, %v5936_v56   ;;  %v6119_v47 = vpop.permute.xlu0 %2745 }
0x11e5   :  { %4097 = vset.pattern.permute.xlu1 %v6825_v34  ;;  %v2938_v34 = vmul.f32 %v5895_v10, %v5812_v9 }
0x11e6   :  { %v6090_v12 = vpop.permute.xlu1 %2998 }
0x11e8   :  { %2242 = vperm.xlu1 %4097, %v5936_v56   ;;  %4111 = vset.pattern.permute.xlu0 %v6654_v7 }
0x11e9   :  { %2210 = vperm.xlu0 %4111, %v5969_v23  }
0x11eb   :  { %v6099_v61 = vpop.permute.xlu1 %2234 }
0x11ec   :  { %2945 = vrot.lane.b32.xlu1 %v2937_v17, %s4364_s23  ;;  %v6834_v17 = vmov 54  }
0x11ed   :  { %4100 = vset.pattern.permute.xlu1 %v6832_v43  ;;  %2222 = vperm.xlu0 %4111, %v5949_v46   ;;  %v6126_v43 = vpop.permute.xlu0 %2810 }
0x11f0   :  { %2947 = vrot.lane.b32.xlu1 %v2938_v34, %s4364_s23  ;;  %v6109_v31 = vpop.permute.xlu1 %3018 }
0x11f1   :  { %4174 = vset.pattern.permute.xlu0 %v6827_v15  ;;  %v6134_v7 = vpop.permute.xlu0 %2054 }
0x11f2   :  { %6836 = vst [vmem:[#allocation66_spill] sm:$0xff] %v6134_v7 }
0x11f4   :  { %3030 = vperm.xlu1 %4100, %v5949_v46   ;;  %v6117_v14 = vpop.permute.xlu1 %3022 }
0x11f5   :  { %v6145_v36 = vpop.permute.xlu0 %2994 }
0x11f8   :  { %2185 = vrot.lane.b32.xlu1 %v2177_v45, %s4364_s23 }
0x11f9   :  { %v6122_v10 = vpop.permute.xlu1 %2262  ;;  %4101 = vset.pattern.permute.xlu1 %v6834_v17  ;;  %v6142_v17 = vunpack.c.l.bf16 %v6136_v51  ;;  %v2866_v51 = vpop.permute.xlu0 %2865 }
0x11fa   :  { %6833 = vst [vmem:[#allocation64_spill] sm:$0xff] %v6122_v10 }
0x11fb   :  { %v2579_v7 = vmul.f32 %v5913_v24, %v6142_v17 }
0x11fc   :  { %2266 = vperm.xlu1 %4101, %v5936_v56  }
0x11fd   :  { %v6161_v11 = vpop.permute.xlu0 %2025 }
0x11fe   :  { %v6128_v34 = vpop.permute.xlu1 %2418  ;;  %6841 = vst [vmem:[#allocation70_spill] sm:$0xff] %v6161_v11 }
0x11ff   :  { %6835 = vst [vmem:[#allocation65_spill] sm:$0xff] %v6128_v34 }
0x1200   :  { %4103 = vset.pattern.permute.xlu1 %v6827_v15  ;;  %v2539_v15 = vmul.f32 %v5907_v1, %v6142_v17 }
0x1201   :  { %3050 = vperm.xlu1 %4103, %v5936_v56  }
0x1203   :  { %v6132_v29 = vpop.permute.xlu1 %2490 }
0x1205   :  { %3054 = vperm.xlu1 %4103, %v5949_v46  }
0x1207   :  { %v6139_v45 = vpop.permute.xlu1 %2494 }
0x1208   :  { %6838 = vst [vmem:[#allocation68_spill] sm:$0xff] %v6139_v45 }
0x1209   :  { %4104 = vset.pattern.permute.xlu1 %v6828_v52  ;;  %v2619_v52 = vmul.f32 %v5842_v35, %v6142_v17 }
0x120a   :  { %2294 = vperm.xlu1 %4104, %v5949_v46  }
0x120c   :  { %v6150_v34 = vpop.permute.xlu1 %3046 }
0x120e   :  { %2549 = vrot.lane.b32.xlu1 %v2539_v15, %s4360_s4  ;;  %v2699_v15 = vmul.f32 %v5925_v41, %v6142_v17 }
0x120f   :  { %4105 = vset.pattern.permute.xlu1 %v6839_v40 }
0x1211   :  { %v6156_v0 = vpop.permute.xlu1 %2282 }
0x1212   :  { %6840 = vst [vmem:[#allocation69_spill] sm:$0xff] %v6156_v0  ;;  %2589 = vrot.lane.b32.xlu1 %v2579_v7, %s4360_s4  ;;  %v2739_v0 = vmul.f32 %v5931_v53, %v6142_v17  ;;  %v6173_v7 = vpop.permute.xlu0 %2105 }
0x1213   :  { %6844 = vst [vmem:[#allocation73_spill] sm:$0xff] %v6173_v7 }
0x1216   :  { %2629 = vrot.lane.b32.xlu1 %v2619_v52, %s4360_s4  ;;  %v6164_v1 = vpop.permute.xlu1 %2442  ;;  %v2779_v52 = vmul.f32 %v5861_v30, %v6142_v17  ;;  %v6178_v11 = vpop.permute.xlu0 %2905 }
0x1217   :  { %6842 = vst [vmem:[#allocation71_spill] sm:$0xff] %v6164_v1  ;;  %v2019_v1 = vmul.f32 %v5967_v2, %v5556_v27 }
0x121a   :  { %2709 = vrot.lane.b32.xlu1 %v2699_v15, %s4346_s0  ;;  %v6169_v24 = vpop.permute.xlu1 %2446  ;;  %v2859_v15 = vmul.f32 %v5955_v20, %v6142_v17 }
0x121b   :  { %6843 = vst [vmem:[#allocation72_spill] sm:$0xff] %v6169_v24 }
0x121e   :  { %2749 = vrot.lane.b32.xlu1 %v2739_v0, %s4346_s0  ;;  %v2548_v35 = vpop.permute.xlu1 %2547  ;;  %v6188_v0 = vpop.permute.xlu0 %3002 }
0x121f   :  { %6846 = vst [vmem:[#allocation75_spill] sm:$0xff] %v6188_v0 }
0x1222   :  { %2789 = vrot.lane.b32.xlu1 %v2779_v52, %s4346_s0  ;;  %v6181_v41 = vpop.permute.xlu1 %2470  ;;  %v2099_v52 = vmul.f32 %v5876_v26, %v5556_v27  ;;  %v6195_v24 = vpop.permute.xlu0 %2238 }
0x1223   :  { %6845 = vst [vmem:[#allocation74_spill] sm:$0xff] %v6181_v41 }
0x1226   :  { %2869 = vrot.lane.b32.xlu1 %v2859_v15, %s4364_s23  ;;  %v2586_v53 = vpop.permute.xlu1 %2585  ;;  %v2899_v15 = vmul.f32 %v5988_v16, %v6142_v17  ;;  %v6207_v41 = vpop.permute.xlu0 %2147 }
0x1227   :  { %6847 = vst [vmem:[#allocation76_spill] sm:$0xff] %v6207_v41 }
0x122a   :  { %2029 = vrot.lane.b32.xlu1 %v2019_v1, %s4346_s0  ;;  %v6191_v30 = vpop.permute.xlu1 %2650  ;;  %v2139_v1 = vmul.f32 %v5996_v54, %v5556_v27  ;;  %v6212_v0 = vpop.permute.xlu0 %2246 }
0x122b   :  { %6848 = vst [vmem:[#allocation77_spill] sm:$0xff] %v6212_v0 }
0x122e   :  { %2109 = vrot.lane.b32.xlu1 %v2099_v52, %s4364_s23  ;;  %v6198_v20 = vpop.permute.xlu1 %2625  ;;  %v2939_v52 = vmul.f32 %v5947_v63, %v6142_v17  ;;  %v6217_v10 = vpop.permute.xlu0 %3026  ;;  %v2425_v63 = vmul.f32 %v6032_v38, %v5794_v50 }
0x122f   :  { %6849 = vst [vmem:[#allocation78_spill] sm:$0xff] %v6217_v10 }
0x1230   :  { %v2557_v10 = vadd.f32 %v6021_v28, %v2425_v63 }
0x1232   :  { %2909 = vrot.lane.b32.xlu1 %v2899_v15, %s4364_s23  ;;  %v6203_v2 = vpop.permute.xlu1 %2627  ;;  %v2179_v15 = vmul.f32 %v6023_v13, %v5556_v27  ;;  %v6227_v0 = vpop.permute.xlu0 %2258 }
0x1233   :  { %6852 = vst [vmem:[#allocation81_spill] sm:$0xff] %v6227_v0 }
0x1236   :  { %2149 = vrot.lane.b32.xlu1 %v2139_v1, %s4364_s23  ;;  %v2708_v26 = vpop.permute.xlu1 %2707  ;;  %v6241_v27 = vpop.permute.xlu0 %2187 }
0x1237   :  { %6854 = vst [vmem:[#allocation82_spill] sm:$0xff] %v6241_v27  ;;  %v2449_v27 = vmul.f32 %v6049_v5, %v5794_v50 }
0x123a   :  { %2949 = vrot.lane.b32.xlu1 %v2939_v52, %s4364_s23  ;;  %v2748_v16 = vpop.permute.xlu1 %2747  ;;  %v6853_v52 = vmov 64   ;;  %v6257_v7 = vpop.permute.xlu0 %2270 }
0x123e   :  { %2189 = vrot.lane.b32.xlu1 %v2179_v15, %s4364_s23  ;;  %v6220_v54 = vpop.permute.xlu1 %2814  ;;  %v6234_v15 = vld [vmem:[#allocation6 + $0x4] ss:$8 sps:$4 sm:$0xff]   ;;  %v6266_v5 = vpop.permute.xlu0 %2286 }
0x123f   :  { %6850 = vst [vmem:[#allocation79_spill] sm:$0xff] %v6220_v54  ;;  %v6237_v54 = vunpack.c.h.bf16 %v5785_v22  ;;  %v6248_v41 = vunpack.c.h.bf16 %v6234_v15 }
0x1241   :  { %v3009_v63 = vmul.f32 %v6145_v36, %v6237_v54  ;;  %v3010_v0 = vmul.f32 %v6090_v12, %v6248_v41 }
0x1242   :  { %2383 = vperm.xlu1 %4105, %v5969_v23  }
0x1243   :  { %v6223_v1 = vpop.permute.xlu1 %2050 }
0x1244   :  { %6851 = vst [vmem:[#allocation80_spill] sm:$0xff] %v6223_v1  ;;  %v2426_v1 = vmul.f32 %v6038_v25, %v5812_v9 }
0x1246   :  { %4107 = vset.pattern.permute.xlu1 %v6853_v52  ;;  %v2558_v28 = vadd.f32 %v2548_v35, %v2426_v1  ;;  %v2597_v35 = vadd.f32 %v2586_v53, %v2449_v27  ;;  %v2497_v27 = vmul.f32 %v5980_v6, %v5794_v50  ;;  %v2498_v53 = vmul.f32 %v6043_v62, %v5812_v9 }
0x1247   :  { %2970 = vperm.xlu1 %4107, %v5969_v23   ;;  %v6231_v13 = vpop.permute.xlu1 %2785  ;;  %v2717_v23 = vadd.f32 %v6114_v59, %v2557_v10  ;;  %v3034_v6 = vmul.f32 %v6117_v14, %v6248_v41 }
0x1248   :  { %v2718_v45 = vadd.f32 %v2708_v26, %v2558_v28  ;;  %v2757_v12 = vadd.f32 %v6119_v47, %v2597_v35 }
0x1249   :  { %v2877_v22 = vadd.f32 %v2866_v51, %v2717_v23  ;;  %v2450_v51 = vmul.f32 %v5990_v49, %v5812_v9  ;;  %v6284_v23 = vpop.permute.xlu0 %2290 }
0x124a   :  { %v2917_v49 = vadd.f32 %v6178_v11, %v2757_v12 }
0x124b   :  { %2974 = vperm.xlu1 %4107, %v5959_v18   ;;  %v6244_v38 = vpop.permute.xlu1 %2787  ;;  %v3013_v10 = vadd.f32 %v3009_v63, %v2877_v22  ;;  %v2659_v22 = vmul.f32 %v6191_v30, %v6142_v17 }
0x124d   :  { %v6292_v63 = vpop.permute.xlu0 %2551 }
0x124f   :  { %4108 = vset.pattern.permute.xlu1 %v6855_v21  ;;  %v2868_v25 = vpop.permute.xlu1 %2867 }
0x1250   :  { %v2878_v59 = vadd.f32 %v2868_v25, %v2718_v45  ;;  %2214 = vperm.xlu1 %4108, %v5959_v18   ;;  %v2598_v45 = vadd.f32 %v6085_v44, %v2450_v51 }
0x1252   :  { %v3014_v1 = vadd.f32 %v3010_v0, %v2878_v59  ;;  %v3033_v0 = vmul.f32 %v6109_v31, %v6237_v54  ;;  %v2818_v31 = vmul.f32 %v6106_v3, %v5812_v9  ;;  %v2473_v59 = vmul.f32 %v6057_v19, %v5794_v50  ;;  %v4191_v19 = vld [vmem:[#allocation8 + $0xc0] sm:$0xff]  }
0x1253   :  { %v6260_v36 = vpop.permute.xlu1 %2027  ;;  %v2474_v3 = vmul.f32 %v6062_v4, %v5812_v9  ;;  %3717 = vmatprep.subr.bf16.mxu1 %v4191_v19  ;;  %v6863_v19 = vld [vmem:[#allocation60_spill] sm:$0xff] }
0x1254   :  { %v4114_v26 = vpack.i.bf16 %v3014_v1, %v3013_v10  ;;  %4109 = vset.pattern.permute.xlu1 %v6839_v40  ;;  %v2758_v40 = vadd.f32 %v2748_v16, %v2598_v45  ;;  %v3037_v11 = vadd.f32 %v3033_v0, %v2917_v49  ;;  %v2658_v16 = vmul.f32 %v6067_v42, %v5812_v9  ;;  %v6309_v10 = vpop.permute.xlu0 %2591  ;;  %v4192_v45 = vld [vmem:[#allocation8 + $0x80] sm:$0xff]   ;;  %v4194_v0 = vld [vmem:[#allocation8 + $0x88] sm:$0xff]  }
0x1255   :  { %2393 = vperm.xlu1 %4109, %v5936_v56   ;;  %v2058_v42 = vmul.f32 %v6081_v33, %v5543_v55  ;;  %v2637_v30 = vadd.f32 %v6198_v20, %v2473_v59  ;;  %v2638_v1 = vadd.f32 %v6203_v2, %v2474_v3  ;;  %v1666_v33 = vmul.f32 %v5524_v37, %v5543_v55  ;;  %v6324_v20 = vld [vmem:[#allocation6 + $0xc] ss:$16 sps:$4 sm:$0xff]  }
0x1256   :  { %4115 = vrot.lane.b32.xlu0 %v4114_v26, %s4364_s23  ;;  %v3057_v2 = vmul.f32 %v6009_v32, %v6237_v54  ;;  %v3058_v37 = vmul.f32 %v6150_v34, %v6248_v41  ;;  %3718 = vmatpush3.bf16.msra.mxu1 %v4192_v45  ;;  %v6340_v32 = vunpack.c.l.bf16 %v6234_v15  ;;  %v6860_v59 = vld [vmem:[#allocation43_spill] sm:$0xff]  ;;  %v2819_v3 = vmul.f32 %v6126_v43, %v6142_v17 }
0x1257   :  { %v6272_v18 = vpop.permute.xlu1 %2107  ;;  %v2797_v51 = vadd.f32 %v6231_v13, %v2637_v30  ;;  %v2798_v12 = vadd.f32 %v6244_v38, %v2638_v1  ;;  %v1798_v4 = vadd.f32 %v5598_v39, %v1666_v33  ;;  %v1665_v13 = vmul.f32 %v5522_v60, %v5552_v57  ;;  %v6861_v30 = vld [vmem:[#allocation73_spill] sm:$0xff] }
0x1258   :  { %v6320_v26 = vpop.permute.xlu0 %2631  ;;  %v1689_v38 = vmul.f32 %v5532_v48, %v5552_v57 }
0x1259   :  { %2505 = vrot.lane.b32.xlu1 %v2497_v27, %s4360_s4  ;;  %v1958_v39 = vadd.f32 %v5680_v8, %v1798_v4  ;;  %v1797_v60 = vadd.f32 %v5600_v58, %v1665_v13  ;;  %v6865_v4 = vld [vmem:[#allocation29_spill] sm:$0xff] }
0x125a   :  { %4112 = vset.pattern.permute.xlu1 %v6853_v52 }
0x125b   :  { %v2908_v47 = vpop.permute.xlu1 %2907 }
0x125c   :  { %v2918_v44 = vadd.f32 %v2908_v47, %v2758_v40  ;;  %v4193_v40 = vld [vmem:[#allocation8 + $0xc8] sm:$0xff]   ;;  %v6351_v15 = vpop.permute.xlu0 %2711 }
0x125d   :  { %2507 = vrot.lane.b32.xlu1 %v2498_v53, %s4360_s4  ;;  %v6337_v53 = vunpack.c.l.bf16 %v6324_v20  ;;  %3719 = vmatprep.subr.bf16.mxu1 %v4193_v40 }
0x125e   :  { %v3038_v28 = vadd.f32 %v3034_v6, %v2918_v44  ;;  %v6856_v6 = vld [vmem:[#allocation40_spill] sm:$0xff]  ;;  %3720 = vmatpush3.bf16.msra.mxu1 %v4194_v0 }
0x125f   :  { %v6289_v52 = vpop.permute.xlu1 %3006  ;;  %v1837_v48 = vadd.f32 %v6856_v6, %v1689_v38  ;;  %v2250_v8 = vmul.f32 %v6195_v24, %v6337_v53  ;;  %v2249_v24 = vmul.f32 %v6099_v61, %v6340_v32 }
0x1260   :  { %v4124_v62 = vpack.i.bf16 %v3038_v28, %v3037_v11  ;;  %v2118_v28 = vadd.f32 %v6272_v18, %v1958_v39  ;;  %v6868_v39 = vld [vmem:[#allocation64_spill] sm:$0xff] }
0x1261   :  { %2667 = vrot.lane.b32.xlu1 %v2658_v16, %s4346_s0  ;;  %v6858_v16 = vld [vmem:[#allocation53_spill] sm:$0xff]  ;;  %v2274_v40 = vmul.f32 %v6868_v39, %v6337_v53  ;;  %v4206_v39 = vld [vmem:[#allocation8 + $0xb8] sm:$0xff]  }
0x1262   :  { %4125 = vrot.lane.b32.xlu0 %v4124_v62, %s4346_s0  ;;  %v1957_v62 = vadd.f32 %v6858_v16, %v1797_v60  ;;  %v6870_v60 = vld [vmem:[#allocation45_spill] sm:$0xff] }
0x1263   :  { %v6297_v14 = vpop.permute.xlu1 %2145 }
0x1265   :  { %2827 = vrot.lane.b32.xlu1 %v2818_v31, %s4364_s23  ;;  %v4195_v31 = vld [vmem:[#allocation8 + $0xd0] sm:$0xff]  }
0x1266   :  { %2669 = vrot.lane.b32.xlu0 %v2659_v22, %s4346_s0  ;;  %v6859_v22 = vld [vmem:[#allocation56_spill] sm:$0xff]  ;;  %3721 = vmatprep.subr.bf16.mxu1 %v4195_v31  ;;  %v6874_v31 = vld [vmem:[#allocation70_spill] sm:$0xff] }
0x1267   :  { %v6305_v25 = vpop.permute.xlu1 %2242 }
0x1269   :  { %2067 = vrot.lane.b32.xlu1 %v2058_v42, %s4364_s23  ;;  %v1997_v42 = vadd.f32 %v6859_v22, %v1837_v48 }
0x126b   :  { %v2946_v35 = vpop.permute.xlu1 %2945  ;;  %v2157_v45 = vadd.f32 %v6297_v14, %v1997_v42  ;;  %v4198_v14 = vld [vmem:[#allocation8 + $0x98] sm:$0xff]  }
0x126c   :  { %v2957_v27 = vadd.f32 %v2946_v35, %v2797_v51  ;;  %v2117_v35 = vadd.f32 %v6861_v30, %v1957_v62  ;;  %v6862_v51 = vld [vmem:[#allocation81_spill] sm:$0xff]  ;;  %v4199_v62 = vld [vmem:[#allocation8 + $0xe0] sm:$0xff]  }
0x126d   :  { %2982 = vperm.xlu1 %4112, %v5949_v46   ;;  %v2273_v33 = vmul.f32 %v6862_v51, %v6340_v32  ;;  %v2298_v51 = vmul.f32 %v6266_v5, %v6337_v53  ;;  %v4204_v5 = vld [vmem:[#allocation8 + $0xb0] sm:$0xff]  }
0x126e   :  { %v3061_v34 = vadd.f32 %v3057_v2, %v2957_v27  ;;  %v2254_v27 = vadd.f32 %v2250_v8, %v2118_v28  ;;  %v6866_v2 = vld [vmem:[#allocation23_spill] sm:$0xff]  ;;  %v2253_v38 = vadd.f32 %v2249_v24, %v2117_v35  ;;  %v6871_v8 = vld [vmem:[#allocation76_spill] sm:$0xff]  ;;  %v6872_v28 = vld [vmem:[#allocation30_spill] sm:$0xff] }
0x126f   :  { %v2948_v49 = vpop.permute.xlu1 %2947  ;;  %v1714_v43 = vmul.f32 %v6866_v2, %v5543_v55  ;;  %v2277_v16 = vadd.f32 %v2273_v33, %v2157_v45  ;;  %v4201_v35 = vld [vmem:[#allocation8 + $0xe8] sm:$0xff]   ;;  %v6877_v45 = vld [vmem:[#allocation63_spill] sm:$0xff]  ;;  %v4203_v2 = vld [vmem:[#allocation8 + $0xf0] sm:$0xff]  }
0x1270   :  { %v2958_v46 = vadd.f32 %v2948_v49, %v2798_v12  ;;  %v6864_v12 = vld [vmem:[#allocation68_spill] sm:$0xff]  ;;  %v1713_v49 = vmul.f32 %v6865_v4, %v5552_v57  ;;  %v6875_v33 = vld [vmem:[#allocation69_spill] sm:$0xff] }
0x1271   :  { %4113 = vset.pattern.permute.xlu1 %v6855_v21  ;;  %v2499_v21 = vmul.f32 %v6132_v29, %v6142_v17  ;;  %v4196_v29 = vld [vmem:[#allocation8 + $0x90] sm:$0xff]   ;;  %v2500_v61 = vmul.f32 %v6864_v12, %v6863_v19  ;;  %v1878_v6 = vadd.f32 %v6870_v60, %v1714_v43 }
0x1272   :  { %v3062_v47 = vadd.f32 %v3058_v37, %v2958_v46  ;;  %2218 = vperm.xlu1 %4113, %v5936_v56   ;;  %v6857_v56 = vld [vmem:[#allocation25_spill] sm:$0xff]  ;;  %3722 = vmatpush3.bf16.msra.mxu1 %v4196_v29  ;;  %v4197_v37 = vld [vmem:[#allocation8 + $0xd8] sm:$0xff]   ;;  %v4200_v29 = vld [vmem:[#allocation8 + $0xa0] sm:$0xff]  }
0x1273   :  { %v6345_v44 = vpop.permute.xlu1 %3030  ;;  %v1690_v58 = vmul.f32 %v6857_v56, %v5543_v55  ;;  %v6867_v46 = vld [vmem:[#allocation57_spill] sm:$0xff]  ;;  %3723 = vmatprep.subr.bf16.mxu1 %v4197_v37  ;;  %v2038_v24 = vadd.f32 %v6260_v36, %v1878_v6  ;;  %v2297_v36 = vmul.f32 %v6875_v33, %v6340_v32  ;;  %v6876_v12 = vld [vmem:[#allocation82_spill] sm:$0xff]  ;;  %v6883_v33 = vld [vmem:[#allocation67_spill] sm:$0xff] }
0x1274   :  { %v4134_v11 = vpack.i.bf16 %v3062_v47, %v3061_v34  ;;  %v6378_v34 = vpop.permute.xlu0 %2751  ;;  %v6869_v47 = vld [vmem:[#allocation46_spill] sm:$0xff] }
0x1275   :  { %v1838_v18 = vadd.f32 %v6860_v59, %v1690_v58  ;;  %v1877_v0 = vadd.f32 %v6869_v47, %v1713_v49  ;;  %v4119_v58 = vpack.i.bf16 %v2254_v27, %v2253_v38  ;;  %v4202_v27 = vld [vmem:[#allocation8 + $0xa8] sm:$0xff]   ;;  %v4205_v38 = vld [vmem:[#allocation8 + $0xf8] sm:$0xff]   ;;  %v6879_v60 = vld [vmem:[#allocation34_spill] sm:$0xff] }
0x1276   :  { %2509 = vrot.lane.b32.xlu1 %v2499_v21, %s4360_s4  ;;  %4135 = vrot.lane.b32.xlu0 %v4134_v11, %s4360_s4  ;;  %v6873_v11 = vld [vmem:[#allocation80_spill] sm:$0xff]  ;;  %v6880_v6 = vld [vmem:[#allocation66_spill] sm:$0xff] }
0x1277   :  { %v2186_v1 = vpop.permute.xlu1 %2185  ;;  %v1998_v13 = vadd.f32 %v6867_v46, %v1838_v18  ;;  %v2059_v56 = vmul.f32 %v6873_v11, %v6872_v28  ;;  %3724 = vmatpush3.bf16.msra.mxu1 %v4198_v14  ;;  %v2037_v22 = vadd.f32 %v6874_v31, %v1877_v0  ;;  %v6878_v14 = vld [vmem:[#allocation79_spill] sm:$0xff] }
0x1278   :  { %3725 = vmatprep.subr.bf16.mxu1 %v4199_v62  ;;  %v6393_v59 = vpop.permute.xlu0 %2791  ;;  %v2820_v47 = vmul.f32 %v6878_v14, %v6863_v19  ;;  %v6881_v62 = vld [vmem:[#allocation61_spill] sm:$0xff] }
0x1279   :  { %v2158_v21 = vadd.f32 %v6871_v8, %v1998_v13  ;;  %v2197_v18 = vadd.f32 %v2186_v1, %v2037_v22  ;;  %v2660_v1 = vmul.f32 %v6877_v45, %v6863_v19  ;;  %v2060_v8 = vmul.f32 %v6880_v6, %v6879_v60  ;;  %v2203_v22 = vld [vmem:[#allocation6 + $0x14] ss:$8 sps:$4 sm:$0xff]  }
0x127a   :  { %2511 = vrot.lane.b32.xlu1 %v2500_v61, %s4360_s4  ;;  %2829 = vrot.lane.b32.xlu0 %v2819_v3, %s4364_s23  ;;  %v2198_v61 = vadd.f32 %v6876_v12, %v2038_v24  ;;  %v2428_v31 = vmul.f32 %v6881_v62, %v6863_v19 }
0x127b   :  { %v6384_v48 = vpop.permute.xlu1 %2266  ;;  %v2278_v42 = vadd.f32 %v2274_v40, %v2158_v21  ;;  %3726 = vmatpush3.bf16.msra.mxu1 %v4200_v29  ;;  %v2301_v4 = vadd.f32 %v2297_v36, %v2197_v18  ;;  %v6882_v18 = vld [vmem:[#allocation65_spill] sm:$0xff]  ;;  %v6431_v36 = vunpack.c.h.bf16 %v6883_v33 }
0x127c   :  { %3727 = vmatprep.subr.bf16.mxu1 %v4201_v35  ;;  %v2872_v43 = vpop.permute.xlu0 %2871  ;;  %v2302_v37 = vadd.f32 %v2298_v51, %v2198_v61  ;;  %v2560_v24 = vadd.f32 %v6292_v63, %v2428_v31  ;;  %v6426_v35 = vunpack.c.h.bf16 %v2203_v22  ;;  %v6889_v31 = vld [vmem:[#allocation20_spill] sm:$0xff] }
0x127d   :  { %v4129_v30 = vpack.i.bf16 %v2278_v42, %v2277_v16 }
0x127e   :  { %4120 = vrot.lane.b32.xlu1 %v4119_v58, %s4364_s23  ;;  %2069 = vrot.lane.b32.xlu0 %v2059_v56, %s4364_s23  ;;  %v4139_v46 = vpack.i.bf16 %v2302_v37, %v2301_v4  ;;  %v2720_v12 = vadd.f32 %v6351_v15, %v2560_v24  ;;  %v3012_v45 = vmul.f32 %v6289_v52, %v6426_v35  ;;  %v6884_v4 = vld [vmem:[#allocation32_spill] sm:$0xff]  ;;  %v6885_v37 = vld [vmem:[#allocation75_spill] sm:$0xff]  ;;  %v6448_v52 = vunpack.c.h.bf16 %v6324_v20  ;;  %v6892_v20 = vld [vmem:[#allocation77_spill] sm:$0xff] }
0x127f   :  { %3728 = vmatpush3.bf16.msra.mxu1 %v4202_v27  ;;  %v6887_v15 = vld [vmem:[#allocation72_spill] sm:$0xff] }
0x1280   :  { %v6395_v3 = vpop.permute.xlu1 %3050  ;;  %3729 = vmatprep.subr.bf16.mxu1 %v4203_v2  ;;  %v6411_v40 = vpop.permute.xlu0 %2031  ;;  %v1668_v2 = vmul.f32 %v6884_v4, %v6879_v60  ;;  %v2252_v4 = vmul.f32 %v6892_v20, %v6448_v52  ;;  %v6900_v20 = vld [vmem:[#allocation78_spill] sm:$0xff] }
0x1282   :  { %4130 = vrot.lane.b32.xlu1 %v4129_v30, %s4346_s0  ;;  %v2427_v30 = vmul.f32 %v6882_v18, %v6142_v17  ;;  %v6890_v18 = vld [vmem:[#allocation54_spill] sm:$0xff] }
0x1283   :  { %3730 = vmatpush3.bf16.msra.mxu1 %v4204_v5  ;;  %v3011_v5 = vmul.f32 %v6885_v37, %v6431_v36 }
0x1284   :  { %v6405_v49 = vpop.permute.xlu1 %3054  ;;  %3731 = vmatprep.subr.bf16.mxu1 %v4205_v38  ;;  %v2112_v11 = vpop.permute.xlu0 %2111 }
0x1286   :  { %2671 = vrot.lane.b32.xlu1 %v2660_v1, %s4346_s0 }
0x1287   :  { %3732 = vmatpush3.bf16.msra.mxu1 %v4206_v39  ;;  %v6886_v39 = vld [vmem:[#allocation18_spill] sm:$0xff] }
0x1288   :  { %v2912_v58 = vpop.permute.xlu0 %2911  ;;  %v1667_v14 = vmul.f32 %v6886_v39, %v6872_v28 }
0x1289   :  { %v6408_v13 = vpop.permute.xlu1 %2294 }
0x128a   :  { %4140 = vrot.lane.b32.xlu1 %v4139_v46, %s4360_s4  ;;  %v2880_v46 = vadd.f32 %v2872_v43, %v2720_v12  ;;  %v1799_v24 = vadd.f32 %v6889_v31, %v1667_v14 }
0x128c   :  { %v2152_v29 = vpop.permute.xlu0 %2151 }
0x128d   :  { %v2550_v0 = vpop.permute.xlu1 %2549 }
0x128e   :  { %2831 = vrot.lane.b32.xlu1 %v2820_v47, %s4364_s23  ;;  %v2559_v61 = vadd.f32 %v2550_v0, %v2427_v30  ;;  %v2452_v47 = vmul.f32 %v6887_v15, %v6863_v19  ;;  %v6888_v0 = vld [vmem:[#allocation21_spill] sm:$0xff]  ;;  %v6454_v30 = vunpack.c.l.bf16 %v2203_v22  ;;  %v6895_v15 = vld [vmem:[#allocation28_spill] sm:$0xff] }
0x128f   :  { %v1800_v6 = vadd.f32 %v6888_v0, %v1668_v2  ;;  %v6896_v0 = vld [vmem:[#allocation44_spill] sm:$0xff] }
0x1290   :  { %v6434_v27 = vpop.permute.xlu0 %2951 }
0x1291   :  { %v2590_v21 = vpop.permute.xlu1 %2589  ;;  %v1960_v43 = vadd.f32 %v6890_v18, %v1800_v6 }
0x1292   :  { %2071 = vrot.lane.b32.xlu1 %v2060_v8, %s4364_s23  ;;  %v3016_v8 = vadd.f32 %v3012_v45, %v2880_v46  ;;  %v6893_v45 = vld [vmem:[#allocation71_spill] sm:$0xff] }
0x1293   :  { %v2451_v2 = vmul.f32 %v6893_v45, %v6142_v17  ;;  %v2120_v37 = vadd.f32 %v2112_v11, %v1960_v43  ;;  %v6897_v11 = vld [vmem:[#allocation74_spill] sm:$0xff]  ;;  %v3035_v45 = vmul.f32 %v6900_v20, %v6431_v36 }
0x1294   :  { %v6456_v33 = vpop.permute.xlu0 %2191 }
0x1295   :  { %v6419_v56 = vpop.permute.xlu1 %2629  ;;  %v2599_v39 = vadd.f32 %v2590_v21, %v2451_v2  ;;  %v2256_v31 = vadd.f32 %v2252_v4, %v2120_v37  ;;  %v6899_v21 = vld [vmem:[#allocation59_spill] sm:$0xff] }
0x1299   :  { %v2710_v16 = vpop.permute.xlu1 %2709 }
0x129a   :  { %v2719_v63 = vadd.f32 %v2710_v16, %v2559_v61  ;;  %v2600_v61 = vadd.f32 %v6309_v10, %v2452_v47  ;;  %v2251_v10 = vmul.f32 %v6305_v25, %v6454_v30  ;;  %v1691_v47 = vmul.f32 %v6895_v15, %v6872_v28 }
0x129d   :  { %v2750_v42 = vpop.permute.xlu1 %2749 }
0x129e   :  { %v2759_v18 = vadd.f32 %v2750_v42, %v2599_v39  ;;  %v2276_v42 = vmul.f32 %v6257_v7, %v6448_v52  ;;  %v6904_v7 = vld [vmem:[#allocation22_spill] sm:$0xff] }
0x12a1   :  { %v6428_v51 = vpop.permute.xlu1 %2789 }
0x12a5   :  { %v2870_v1 = vpop.permute.xlu1 %2869 }
0x12a6   :  { %v2879_v38 = vadd.f32 %v2870_v1, %v2719_v63  ;;  %v6891_v63 = vld [vmem:[#allocation55_spill] sm:$0xff] }
0x12a7   :  { %v1959_v1 = vadd.f32 %v6891_v63, %v1799_v24  ;;  %v3036_v24 = vmul.f32 %v6345_v44, %v6426_v35 }
0x12a8   :  { %v3015_v16 = vadd.f32 %v3011_v5, %v2879_v38  ;;  %v6894_v5 = vld [vmem:[#allocation37_spill] sm:$0xff]  ;;  %v6467_v38 = vpop.permute.xlu0 %2388 }
0x12a9   :  { %v6450_v62 = vpop.permute.xlu1 %2029  ;;  %v1692_v22 = vmul.f32 %v6894_v5, %v6879_v60 }
0x12aa   :  { %v4144_v12 = vpack.i.bf16 %v3016_v8, %v3015_v16  ;;  %v2476_v8 = vmul.f32 %v6897_v11, %v6863_v19  ;;  %v2760_v16 = vadd.f32 %v6378_v34, %v2600_v61  ;;  %v6902_v34 = vld [vmem:[#allocation62_spill] sm:$0xff] }
0x12ab   :  { %v1840_v6 = vadd.f32 %v6896_v0, %v1692_v22  ;;  %v2475_v61 = vmul.f32 %v6902_v34, %v6142_v17 }
0x12ac   :  { %4145 = vrot.lane.b32.xlu0 %v4144_v12, %s4364_s23  ;;  %v6898_v12 = vld [vmem:[#allocation42_spill] sm:$0xff]  ;;  %v2920_v2 = vadd.f32 %v2912_v58, %v2760_v16  ;;  %v2640_v44 = vadd.f32 %v6320_v26, %v2476_v8  ;;  %v6489_v37 = vpop.permute.xlu0 %2398 }
0x12ad   :  { %v2110_v46 = vpop.permute.xlu1 %2109  ;;  %v1839_v25 = vadd.f32 %v6898_v12, %v1691_v47  ;;  %v2000_v63 = vadd.f32 %v6899_v21, %v1840_v6  ;;  %v2639_v47 = vadd.f32 %v6419_v56, %v2475_v61  ;;  %v6903_v26 = vld [vmem:[#allocation38_spill] sm:$0xff] }
0x12ae   :  { %v2119_v14 = vadd.f32 %v2110_v46, %v1959_v1  ;;  %v6901_v46 = vld [vmem:[#allocation58_spill] sm:$0xff]  ;;  %v1716_v11 = vmul.f32 %v6903_v26, %v6879_v60  ;;  %v2800_v8 = vadd.f32 %v6393_v59, %v2640_v44  ;;  %v3059_v59 = vmul.f32 %v6395_v3, %v6431_v36 }
0x12af   :  { %v1999_v15 = vadd.f32 %v6901_v46, %v1839_v25  ;;  %v2160_v4 = vadd.f32 %v2152_v29, %v2000_v63  ;;  %v1715_v29 = vmul.f32 %v6904_v7, %v6872_v28  ;;  %v2402_v7 = vmul.f32 %v6467_v38, %v5812_v9 }
0x12b0   :  { %v2255_v43 = vadd.f32 %v2251_v10, %v2119_v14  ;;  %v3040_v10 = vadd.f32 %v3036_v24, %v2920_v2  ;;  %v2275_v14 = vmul.f32 %v6384_v48, %v6454_v30  ;;  %v2799_v24 = vadd.f32 %v6428_v51, %v2639_v47  ;;  %v6905_v48 = vld [vmem:[#allocation47_spill] sm:$0xff]  ;;  %v2666_v63 = vpop.permute.xlu0 %2665 }
0x12b1   :  { %v2910_v1 = vpop.permute.xlu1 %2909  ;;  %v2280_v16 = vadd.f32 %v2276_v42, %v2160_v4  ;;  %v1880_v56 = vadd.f32 %v6905_v48, %v1716_v11  ;;  %v2960_v21 = vadd.f32 %v6434_v27, %v2800_v8  ;;  %v2300_v51 = vmul.f32 %v6408_v13, %v6448_v52 }
0x12b2   :  { %v4149_v5 = vpack.i.bf16 %v2256_v31, %v2255_v43  ;;  %v2919_v22 = vadd.f32 %v2910_v1, %v2759_v18  ;;  %v3060_v31 = vmul.f32 %v6405_v49, %v6426_v35  ;;  %v6906_v43 = vld [vmem:[#allocation48_spill] sm:$0xff]  ;;  %v2299_v27 = vmul.f32 %v6284_v23, %v6454_v30 }
0x12b3   :  { %v1879_v12 = vadd.f32 %v6906_v43, %v1715_v29  ;;  %v2040_v49 = vadd.f32 %v6411_v40, %v1880_v56 }
0x12b4   :  { %v3039_v39 = vadd.f32 %v3035_v45, %v2919_v22  ;;  %4150 = vrot.lane.b32.xlu1 %v4149_v5, %s4364_s23  ;;  %v3064_v45 = vadd.f32 %v3060_v31, %v2960_v21  ;;  %v2826_v34 = vpop.permute.xlu0 %2825 }
0x12b5   :  { %v2150_v58 = vpop.permute.xlu1 %2149  ;;  %v2039_v2 = vadd.f32 %v6450_v62, %v1879_v12  ;;  %v2200_v46 = vadd.f32 %v6456_v33, %v2040_v49 }
0x12b6   :  { %v2159_v0 = vadd.f32 %v2150_v58, %v1999_v15  ;;  %v4154_v6 = vpack.i.bf16 %v3040_v10, %v3039_v39 }
0x12b7   :  { %v2304_v61 = vadd.f32 %v2300_v51, %v2200_v46 }
0x12b8   :  { %v2279_v18 = vadd.f32 %v2275_v14, %v2159_v0  ;;  %4155 = vrot.lane.b32.xlu0 %v4154_v6, %s4346_s0  ;;  %v6519_v62 = vpop.permute.xlu0 %2065 }
0x12b9   :  { %v2950_v25 = vpop.permute.xlu1 %2949 }
0x12ba   :  { %v2959_v1 = vadd.f32 %v2950_v25, %v2799_v24  ;;  %v4159_v20 = vpack.i.bf16 %v2280_v16, %v2279_v18 }
0x12bc   :  { %v3063_v5 = vadd.f32 %v3059_v59, %v2959_v1  ;;  %4160 = vrot.lane.b32.xlu1 %v4159_v20, %s4346_s0  ;;  %v2979_v4 = vpop.permute.xlu0 %2978 }
0x12bd   :  { %v2190_v22 = vpop.permute.xlu1 %2189 }
0x12be   :  { %v4164_v3 = vpack.i.bf16 %v3064_v45, %v3063_v5  ;;  %v2199_v15 = vadd.f32 %v2190_v22, %v2039_v2 }
0x12c0   :  { %v2303_v40 = vadd.f32 %v2299_v27, %v2199_v15  ;;  %4165 = vrot.lane.b32.xlu0 %v4164_v3, %s4360_s4  ;;  %v2211_v23 = vpop.permute.xlu0 %2210 }
0x12c1   :  { %v2384_v44 = vpop.permute.xlu1 %2383 }
0x12c2   :  { %v4169_v13 = vpack.i.bf16 %v2304_v61, %v2303_v40  ;;  %v2401_v14 = vmul.f32 %v2384_v44, %v5794_v50  ;;  %v2987_v61 = vmul.f32 %v2979_v4, %v6431_v36  ;;  %v6912_v36 = vld [vmem:[#allocation49_spill] sm:$0xff] }
0x12c4   :  { %4170 = vrot.lane.b32.xlu1 %v4169_v13, %s4360_s4  ;;  %v6521_v58 = vpop.permute.xlu0 %2222 }
0x12c6   :  { %v2971_v42 = vpop.permute.xlu1 %2970 }
0x12c7   :  { %v2985_v8 = vmul.f32 %v2971_v42, %v6237_v54 }
0x12c8   :  { %v4116_v6 = vpop.permute.xlu0 %4115 }
0x12c9   :  { %v4117_v12 = vunpack.i.l.bf16 %v4116_v6  ;;  %v4118_v21 = vunpack.i.h.bf16 %v4116_v6  ;;  %v6908_v6 = vld [vmem:[#allocation35_spill] sm:$0xff] }
0x12ca   :  { %v2975_v10 = vpop.permute.xlu1 %2974 }
0x12cb   :  { %v2986_v50 = vmul.f32 %v2975_v10, %v6248_v41 }
0x12cf   :  { %v2215_v39 = vpop.permute.xlu1 %2214 }
0x12d4   :  { %v2394_v33 = vpop.permute.xlu1 %2393  ;;  %v4126_v29 = vpop.permute.xlu0 %4125 }
0x12d5   :  { %v4128_v1 = vunpack.i.h.bf16 %v4126_v29  ;;  %v4127_v9 = vunpack.i.l.bf16 %v4126_v29  ;;  %v2403_v3 = vmul.f32 %v2394_v33, %v6142_v17  ;;  %v6910_v17 = vld [vmem:[#allocation27_spill] sm:$0xff] }
0x12d8   :  { %v2506_v47 = vpop.permute.xlu1 %2505  ;;  %v2670_v56 = vpop.permute.xlu0 %2669 }
0x12d9   :  { %v2517_v0 = vadd.f32 %v2506_v47, %v2401_v14  ;;  %v6907_v47 = vld [vmem:[#allocation24_spill] sm:$0xff] }
0x12db   :  { %v2677_v26 = vadd.f32 %v2666_v63, %v2517_v0  ;;  %v1642_v0 = vmul.f32 %v6907_v47, %v5543_v55 }
0x12dc   :  { %v2508_v11 = vpop.permute.xlu1 %2507 }
0x12dd   :  { %v2837_v16 = vadd.f32 %v2826_v34, %v2677_v26  ;;  %v2518_v24 = vadd.f32 %v2508_v11, %v2402_v7  ;;  %v1641_v26 = vmul.f32 %v6908_v6, %v5552_v57  ;;  %v6909_v11 = vld [vmem:[#allocation26_spill] sm:$0xff]  ;;  %v2404_v57 = vmul.f32 %v6489_v37, %v6863_v19 }
0x12de   :  { %v1758_v7 = vadd.f32 %v6909_v11, %v1642_v0  ;;  %v6918_v0 = vld [vmem:[#allocation52_spill] sm:$0xff] }
0x12df   :  { %v2989_v18 = vadd.f32 %v2985_v8, %v2837_v16  ;;  %v1757_v33 = vadd.f32 %v6910_v17, %v1641_v26  ;;  %v6911_v8 = vld [vmem:[#allocation50_spill] sm:$0xff]  ;;  %v2228_v17 = vmul.f32 %v6521_v58, %v6448_v52 }
0x12e0   :  { %v2668_v31 = vpop.permute.xlu1 %2667  ;;  %v1918_v16 = vadd.f32 %v6911_v8, %v1758_v7 }
0x12e1   :  { %v2678_v48 = vadd.f32 %v2668_v31, %v2518_v24  ;;  %v3113_v59 = vsel %vm827_vm0, %v2989_v18, %v4117_v12  ;;  %v1917_v4 = vadd.f32 %v6912_v36, %v1757_v33  ;;  %v2225_v31 = vmul.f32 %v2211_v23, %v6340_v32 }
0x12e2   :  { %v3117_v51 = vsel %vm832_vm1, %v3113_v59, %v4127_v9  ;;  %v2226_v24 = vmul.f32 %v2215_v39, %v6337_v53 }
0x12e3   :  { %v2077_v55 = vadd.f32 %v6519_v62, %v1917_v4 }
0x12e4   :  { %v2828_v43 = vpop.permute.xlu1 %2827 }
0x12e5   :  { %v2838_v25 = vadd.f32 %v2828_v43, %v2678_v48 }
0x12e7   :  { %v2990_v63 = vadd.f32 %v2986_v50, %v2838_v25  ;;  %v2229_v25 = vadd.f32 %v2225_v31, %v2077_v55 }
0x12e8   :  { %v4136_v38 = vpop.permute.xlu0 %4135  ;;  %v2068_v20 = vpop.permute.xlu1 %2067 }
0x12e9   :  { %v4138_v54 = vunpack.i.h.bf16 %v4136_v38  ;;  %v4137_v49 = vunpack.i.l.bf16 %v4136_v38  ;;  %v3114_v45 = vsel %vm827_vm0, %v2990_v63, %v4118_v21  ;;  %v2078_v18 = vadd.f32 %v2068_v20, %v1918_v16 }
0x12ea   :  { %v3118_v2 = vsel %vm832_vm1, %v3114_v45, %v4128_v1 }
0x12eb   :  { %v3121_v5 = vsel %vm837_vm2, %v3117_v51, %v4137_v49  ;;  %v3122_v41 = vsel %vm837_vm2, %v3118_v2, %v4138_v54  ;;  %v2230_v21 = vadd.f32 %v2226_v24, %v2078_v18 }
0x12ec   :  { %v2983_v22 = vpop.permute.xlu1 %2982  ;;  %v3125_v27 = vpack.c.bf16 %v3122_v41, %v3121_v5  ;;  %v2830_v44 = vpop.permute.xlu0 %2829  ;;  %v6913_v41 = vld [vmem:[#allocation16_spill] sm:$0xff] }
0x12ed   :  { %v2988_v54 = vmul.f32 %v2983_v22, %v6426_v35  ;;  %v6917_v22 = vld [vmem:[#allocation51_spill] sm:$0xff] }
0x12ee   :  { %3481 = vmatprep.mubr.bf16.mxu1 %v3125_v27  ;;  %v1643_v27 = vmul.f32 %v6913_v41, %v6872_v28 }
0x12f0   :  { %v2070_v51 = vpop.permute.xlu0 %2069 }
0x12f1   :  { %v6534_v46 = vpop.permute.xlu1 %2218 }
0x12f2   :  { %v2227_v28 = vmul.f32 %v6534_v46, %v6454_v30 }
0x12f5   :  { %v2510_v15 = vpop.permute.xlu1 %2509 }
0x12f6   :  { %v2519_v34 = vadd.f32 %v2510_v15, %v2403_v3  ;;  %v6914_v3 = vld [vmem:[#allocation33_spill] sm:$0xff] }
0x12f7   :  { %v1644_v15 = vmul.f32 %v6914_v3, %v6879_v60 }
0x12f8   :  { %v2679_v40 = vadd.f32 %v2670_v56, %v2519_v34  ;;  %v6915_v34 = vld [vmem:[#allocation39_spill] sm:$0xff] }
0x12f9   :  { %v2512_v13 = vpop.permute.xlu1 %2511 }
0x12fa   :  { %v2839_v42 = vadd.f32 %v2830_v44, %v2679_v40  ;;  %v2520_v63 = vadd.f32 %v2512_v13, %v2404_v57  ;;  %v6916_v40 = vld [vmem:[#allocation41_spill] sm:$0xff] }
0x12fb   :  { %v1760_v44 = vadd.f32 %v6916_v40, %v1644_v15 }
0x12fc   :  { %v2991_v10 = vadd.f32 %v2987_v61, %v2839_v42  ;;  %v1759_v61 = vadd.f32 %v6915_v34, %v1643_v27  ;;  %v6920_v27 = vld [vmem:[#allocation31_spill] sm:$0xff] }
0x12fd   :  { %v4121_v14 = vpop.permute.xlu1 %4120  ;;  %v1920_v6 = vadd.f32 %v6918_v0, %v1760_v44 }
0x12fe   :  { %v4123_v56 = vunpack.i.h.bf16 %v4121_v14  ;;  %v4122_v43 = vunpack.i.l.bf16 %v4121_v14  ;;  %v1919_v47 = vadd.f32 %v6917_v22, %v1759_v61 }
0x1300   :  { %v2354_v1 = vsel %vm827_vm0, %v2230_v21, %v4123_v56  ;;  %v2353_v32 = vsel %vm827_vm0, %v2229_v25, %v4122_v43  ;;  %v2079_v7 = vadd.f32 %v2070_v51, %v1919_v47 }
0x1301   :  { %v4131_v29 = vpop.permute.xlu1 %4130 }
0x1302   :  { %v4133_v12 = vunpack.i.h.bf16 %v4131_v29  ;;  %v4132_v50 = vunpack.i.l.bf16 %v4131_v29  ;;  %v2231_v46 = vadd.f32 %v2227_v28, %v2079_v7 }
0x1304   :  { %v2357_v23 = vsel %vm832_vm1, %v2353_v32, %v4132_v50  ;;  %v2358_v62 = vsel %vm832_vm1, %v2354_v1, %v4133_v12 }
0x1305   :  { %v2672_v48 = vpop.permute.xlu1 %2671 }
0x1306   :  { %v2680_v9 = vadd.f32 %v2672_v48, %v2520_v63 }
0x1309   :  { %v4141_v59 = vpop.permute.xlu1 %4140 }
0x130a   :  { %v4143_v53 = vunpack.i.h.bf16 %v4141_v59  ;;  %v4142_v39 = vunpack.i.l.bf16 %v4141_v59 }
0x130c   :  { %v2361_v38 = vsel %vm837_vm2, %v2357_v23, %v4142_v39  ;;  %v2362_v19 = vsel %vm837_vm2, %v2358_v62, %v4143_v53  ;;  %v4207_v53 = vld [vmem:[#allocation9] sm:$0xff]   ;;  %v4208_v39 = vld [vmem:[#allocation9 + $0x8] sm:$0xff]   ;;  %v4209_v23 = vld [vmem:[#allocation9 + $0x10] sm:$0xff]  }
0x130d   :  { %v2832_v37 = vpop.permute.xlu1 %2831  ;;  %v2365_v20 = vpack.c.bf16 %v2362_v19, %v2361_v38  ;;  %3755 = vmatprep.subr.bf16.mxu0 %v4207_v53  ;;  %v4210_v62 = vld [vmem:[#allocation9 + $0x18] sm:$0xff]   ;;  %v4212_v38 = vld [vmem:[#allocation9 + $0x28] sm:$0xff]   ;;  %v4213_v19 = vld [vmem:[#allocation9 + $0x30] sm:$0xff]  }
0x130e   :  { %v2840_v49 = vadd.f32 %v2832_v37, %v2680_v9  ;;  %3756 = vmatpush3.bf16.msra.mxu0 %v4207_v53  ;;  %v4211_v9 = vld [vmem:[#allocation9 + $0x20] sm:$0xff]   ;;  %v4214_v37 = vld [vmem:[#allocation9 + $0x38] sm:$0xff]  }
0x130f   :  { %3482 = vmatmul.mubr.bf16.vlgmr.msra.gmra.mrb[0].mxu1 %v2365_v20  ;;  %3757 = vmatprep.subr.bf16.mxu0 %v4208_v39  ;;  %v3647_v20 = vld [vmem:[%s6610_s3] ss:$0 sm:$0xff] }
0x1310   :  { %v2992_v45 = vadd.f32 %v2988_v54, %v2840_v49  ;;  %v3438_v3 = vadd.f32 %v6920_v27, %v3647_v20 }
0x1311   :  { %v2072_v2 = vpop.permute.xlu1 %2071 }
0x1312   :  { %v2080_v29 = vadd.f32 %v2072_v2, %v1920_v6  ;;  %3758 = vmatpush3.bf16.msra.mxu0 %v4208_v39 }
0x1313   :  { %3759 = vmatprep.subr.bf16.mxu0 %v4209_v23 }
0x1314   :  { %v2232_v56 = vadd.f32 %v2228_v17, %v2080_v29 }
0x1316   :  { %3760 = vmatpush3.bf16.msra.mxu0 %v4209_v23 }
0x1317   :  { %3761 = vmatprep.subr.bf16.mxu0 %v4210_v62 }
0x131a   :  { %3762 = vmatpush3.bf16.msra.mxu0 %v4210_v62 }
0x131b   :  { %3763 = vmatprep.subr.bf16.mxu0 %v4211_v9 }
0x131e   :  { %v4146_v5 = vpop.permute.xlu0 %4145  ;;  %3764 = vmatpush3.bf16.msra.mxu0 %v4211_v9 }
0x131f   :  { %v4148_v14 = vunpack.i.h.bf16 %v4146_v5  ;;  %v4147_v35 = vunpack.i.l.bf16 %v4146_v5  ;;  %3765 = vmatprep.subr.bf16.mxu0 %v4212_v38 }
0x1321   :  { %v3115_v33 = vsel %vm827_vm0, %v2991_v10, %v4147_v35  ;;  %v3116_v8 = vsel %vm827_vm0, %v2992_v45, %v4148_v14  ;;  %v6919_v45 = vld [vmem:[#allocation36_spill] sm:$0xff]  ;;  %v6921_v35 = vld [vmem:[#allocation19_spill] sm:$0xff] }
0x1322   :  { %3766 = vmatpush3.bf16.msra.mxu0 %v4212_v38  ;;  %v3435_v51 = vadd.f32 %v6919_v45, %v3647_v20  ;;  %v3443_v22 = vadd.f32 %v6921_v35, %v3647_v20 }
0x1323   :  { %3767 = vmatprep.subr.bf16.mxu0 %v4213_v19 }
0x1326   :  { %v4151_v13 = vpop.permute.xlu1 %4150  ;;  %3768 = vmatpush3.bf16.msra.mxu0 %v4213_v19 }
0x1327   :  { %v4153_v36 = vunpack.i.h.bf16 %v4151_v13  ;;  %v4152_v4 = vunpack.i.l.bf16 %v4151_v13  ;;  %3769 = vmatprep.subr.bf16.mxu0 %v4214_v37 }
0x1329   :  { %v2356_v57 = vsel %vm827_vm0, %v2232_v56, %v4153_v36  ;;  %v2355_v12 = vsel %vm827_vm0, %v2231_v46, %v4152_v4 }
0x132a   :  { %v4156_v42 = vpop.permute.xlu0 %4155  ;;  %3770 = vmatpush3.bf16.msra.mxu0 %v4214_v37 }
0x132b   :  { %v4158_v26 = vunpack.i.h.bf16 %v4156_v42  ;;  %v4157_v11 = vunpack.i.l.bf16 %v4156_v42 }
0x132d   :  { %v3119_v18 = vsel %vm832_vm1, %v3115_v33, %v4157_v11  ;;  %v3120_v48 = vsel %vm832_vm1, %v3116_v8, %v4158_v26  ;;  %v6922_v26 = vld [vmem:[#allocation17_spill] sm:$0xff]  ;;  %v3680_v8 = vld [vmem:[%s6612_s5] ss:$0 sm:$0xff] }
0x132e   :  { %v4161_v60 = vpop.permute.xlu1 %4160  ;;  %v3446_v11 = vadd.f32 %v6922_v26, %v3647_v20 }
0x132f   :  { %v4163_v55 = vunpack.i.h.bf16 %v4161_v60  ;;  %v4162_v30 = vunpack.i.l.bf16 %v4161_v60 }
0x1331   :  { %v2359_v21 = vsel %vm832_vm1, %v2355_v12, %v4162_v30  ;;  %v2360_v63 = vsel %vm832_vm1, %v2356_v57, %v4163_v55 }
0x1332   :  { %v4166_v16 = vpop.permute.xlu0 %4165 }
0x1333   :  { %v4168_v31 = vunpack.i.h.bf16 %v4166_v16  ;;  %v4167_v24 = vunpack.i.l.bf16 %v4166_v16 }
0x1335   :  { %v3123_v43 = vsel %vm837_vm2, %v3119_v18, %v4167_v24  ;;  %v3124_v52 = vsel %vm837_vm2, %v3120_v48, %v4168_v31 }
0x1336   :  { %v4171_v58 = vpop.permute.xlu1 %4170  ;;  %v3126_v10 = vpack.c.bf16 %v3124_v52, %v3123_v43 }
0x1337   :  { %v4173_v50 = vunpack.i.h.bf16 %v4171_v58  ;;  %v4172_v25 = vunpack.i.l.bf16 %v4171_v58 }
0x1338   :  { %3489 = vmatprep.mubr.bf16.mxu1 %v3126_v10 }
0x1339   :  { %v2363_v59 = vsel %vm837_vm2, %v2359_v21, %v4172_v25  ;;  %v2364_v1 = vsel %vm837_vm2, %v2360_v63, %v4173_v50 }
0x133a   :  { %v2366_v32 = vpack.c.bf16 %v2364_v1, %v2363_v59 }
0x133c   :  { %3490 = vmatmul.mubr.bf16.gmra.mrb[4].mxu1 %v2366_v32 }
0x13e2   :  { %v3733_v54 = vpop.f32.mrb[0].mxu1 }
0x13e3   :  { %v3734_v49 = vpop.f32.mrb[1].mxu1 }
0x13e4   :  { %v3735_v2 = vadd.f32 %v3734_v49, %v3733_v54  ;;  %v3736_v5 = vpop.f32.mrb[2].mxu1 }
0x13e5   :  { %v3737_v41 = vpop.f32.mrb[3].mxu1 }
0x13e6   :  { %v3484_v15 = vadd.f32 %v3735_v2, %v3435_v51  ;;  %v3738_v34 = vadd.f32 %v3737_v41, %v3736_v5 }
0x13e8   :  { %v3487_v61 = vadd.f32 %v3738_v34, %v3438_v3  ;;  %v3498_v40 = vmax.f32 %v3484_v15, 0.0 }
0x13ea   :  { %v3499_v44 = vmax.f32 %v3487_v61, 0.0 }
0x13ec   :  { %v3502_v13 = vpack.c.bf16 %v3499_v44, %v3498_v40 }
0x13ee   :  { %3771 = vmatprep.mubr.bf16.mxu0 %v3502_v13 }
0x140f   :  { %v3739_v42 = vpop.f32.mrb[4].mxu1 }
0x1410   :  { %v3740_v14 = vpop.f32.mrb[5].mxu1 }
0x1411   :  { %v3741_v47 = vadd.f32 %v3740_v14, %v3739_v42  ;;  %v3742_v0 = vpop.f32.mrb[6].mxu1 }
0x1412   :  { %v3743_v6 = vpop.f32.mrb[7].mxu1 }
0x1413   :  { %v3492_v7 = vadd.f32 %v3741_v47, %v3443_v22  ;;  %v3744_v28 = vadd.f32 %v3743_v6, %v3742_v0 }
0x1415   :  { %v3495_v29 = vadd.f32 %v3744_v28, %v3446_v11  ;;  %v3500_v60 = vmax.f32 %v3492_v7, 0.0 }
0x1417   :  { %v3501_v17 = vmax.f32 %v3495_v29, 0.0 }
0x1419   :  { %v3503_v33 = vpack.c.bf16 %v3501_v17, %v3500_v60 }
0x141b   :  { %3772 = vmatmul.mubr.bf16.vlgmr.msra.gmra.mrb[8].mxu0 %v3503_v33 }
0x14ee   :  { %v3773_v16 = vpop.f32.mrb[8].mxu0 }
0x14ef   :  { %v3618_v36 = vadd.f32 %v3773_v16, %v3680_v8  ;;  %v3609_v4 = vpop.f32.mrb[9].mxu0 }
0x14f0   :  { %v3610_v31 = vadd.f32 %v3680_v8, %v3609_v4  ;;  %v3774_v24 = vpop.f32.mrb[10].mxu0 }
0x14f1   :  { %3626 = vst [vmem:[#allocation11 + $0x10] sm:$0xff] %v3618_v36  ;;  %v3621_v18 = vadd.f32 %v3774_v24, %v3680_v8  ;;  %v3612_v48 = vpop.f32.mrb[11].mxu0 }
0x14f2   :  { %3624 = vst [vmem:[#allocation11] sm:$0xff] %v3610_v31  ;;  %v3613_v55 = vadd.f32 %v3680_v8, %v3612_v48 }
0x14f3   :  { %3627 = vst [vmem:[#allocation11 + $0x18] sm:$0xff] %v3621_v18 }
0x14f4   :  { %3625 = vst [vmem:[#allocation11 + $0x8] sm:$0xff] %v3613_v55 }
0x14f5   :  { %4322 = shalt.err (!%p4319_p8)
}
0x14f6   :  { %s4323_s8 = scalar_lea.hbm %s6613_s6, 512 }
0x14f7   :  { %p4324_p9 = scmp.ne.s32.totalorder %s6613_s6, %s4323_s8  ;;  %p4327_p10 = scmp.lt.u32.totalorder %s4323_s8, %s6613_s6 }
0x14f9   :  { %p4329_p11 = pnand %p4327_p10, %p4324_p9 }
0x14fb   :  { %4332 = shalt.err (!%p4329_p11)
}
0x14fc   :  { %3639 = dma.vmem_to_hbm [thread:$0]  %s3634_s29, 512, %s6613_s6, [#allocation5], %s4343_s9, %s4343_s9, %s4344_s10  }
0x14fd   :  { %4339 = dma.done.wait [#allocation5], 512  }
0x14fe   :  { %4340 = vsyncadd [#allocation5], 4294966784 }
0x14ff   :  { %3643 = vsyncpa [#allocation4], 1 }
0x1500   :  { %3644 = vsyncpa [#allocation7], 1 }
0x1501   :  { %3645 = vsyncpa [#allocation10], 1 }
0x1502   :  { %3646 = vsyncpa [#allocation5], 1 }

</bundles_post_ra>
